<compile_context>
chip_gen: v6e
topology: v6e:2x2x1
jax: 0.10.0
libtpu: 0.0.40
codegen_flags: <defaults>
</compile_context>

<pallas_src>
import math

import jax
import jax.numpy as jnp
from jax.experimental import pallas as pl
from jax.experimental.pallas import tpu as pltpu

# ----------------------------- model config (small, synthetic) ---------------
B = 2                     # batch
C = 3                     # input channels (RGB, like the reference)
IMG = 16                  # image side
PATCH = 4                 # patch side
N = (IMG // PATCH) ** 2   # 16 patches
T = N + 1                 # +1 cls token -> 17 tokens
T_PAD = 24                # tokens padded to a sublane multiple (8-aligned)
R = B * T_PAD             # stacked token rows for the whole batch = 48
P = C * PATCH * PATCH     # flattened patch dim = 48
D = 32                    # embed dim
HEADS = 4
HEAD_DIM = D // HEADS     # 8
MLP = 4 * D               # 128
DEPTH = 2                 # number of transformer blocks
NUM_CLASSES = 2           # new head: Linear(dim, 2)
NUM_CLASSES_PAD = 128     # lane-dense padded logits width
QKV_PAD = 128             # fused qkv output width (3*D = 96 padded to 128)
EPS = 1e-6                # timm ViT LayerNorm eps
_INV_SQRT2 = 1.0 / math.sqrt(2.0)
_NEG_BIG = -1e30          # additive attention mask value


# ----------------------------- in-kernel helpers -----------------------------
def _layernorm(x, g, b):
    # One-pass variance (E[x^2] - E[x]^2) -> single extra lane reduction.
    mu = jnp.mean(x, axis=-1, keepdims=True)
    ms = jnp.mean(x * x, axis=-1, keepdims=True)
    var = jnp.maximum(ms - mu * mu, 0.0)
    return (x - mu) * jax.lax.rsqrt(var + EPS) * g + b


def _erf(x):
    # Abramowitz & Stegun 7.1.26 rational approximation of erf.
    # Only mul/add/exp/compare/select/reciprocal -> guaranteed Mosaic lowering;
    # the divide goes through the EUP via pl.reciprocal(approx=True).
    a1, a2, a3, a4, a5 = 0.254829592, -0.284496736, 1.421413741, -1.453152027, 1.061405429
    p = 0.3275911
    sgn = jnp.where(x < 0.0, -1.0, 1.0)
    ax = jnp.abs(x)
    t = pl.reciprocal(1.0 + p * ax, approx=True)
    poly = t * (a1 + t * (a2 + t * (a3 + t * (a4 + t * a5))))
    return sgn * (1.0 - poly * jnp.exp(-ax * ax))


def _gelu(x):
    # erf-based GELU (matches nn.GELU default in timm).
    return 0.5 * x * (1.0 + _erf(x * _INV_SQRT2))


# ----------------------------- fused Pallas kernel ---------------------------
def vit_kernel(patches_ref, mask_ref, w_patch_ref, tok_bias_ref,
               w_qkv_ref, b_qkv_ref, w_proj_ref, blk_vecs_ref,
               w_fc1_ref, b_fc1_ref, w_fc2_ref,
               ln_f_ref, w_head_ref, b_head_ref,
               out_ref):
    # patches_ref: [R, P]  both images stacked along sublanes; each image owns
    #              T_PAD rows (row 0 = zeroed cls slot, rows T..T_PAD-1 = pad).
    # mask_ref:    [R, R]  0 where (same image, real key), else -1e30.
    # tok_bias_ref:[R, D]  cls+pos / pos+b_patch rows, zeros on pad rows.
    mask = mask_ref[...]

    # ---- patch embed + cls token + pos embed: one aligned [R, D] block -------
    x = jnp.dot(patches_ref[...], w_patch_ref[...],
                preferred_element_type=jnp.float32) + tok_bias_ref[...]

    # ---- DEPTH pre-norm transformer blocks (statically unrolled) -------------
    for d in range(DEPTH):
        vec = blk_vecs_ref[d]      # [6, D]: ln1_g, ln1_b, b_proj, ln2_g, ln2_b, b_fc2

        # attention branch: single fused qkv matmul (scale pre-folded into q).
        h = _layernorm(x, vec[0:1], vec[1:2])
        qkv = jnp.dot(h, w_qkv_ref[d],
                      preferred_element_type=jnp.float32) + b_qkv_ref[d]   # [R, 128]

        y = jnp.zeros((R, D), jnp.float32)
        for hh in range(HEADS):
            lo = hh * HEAD_DIM
            qh = qkv[:, lo:lo + HEAD_DIM]                  # [R, Hd] (already scaled)
            kh = qkv[:, D + lo:D + lo + HEAD_DIM]
            vh = qkv[:, 2 * D + lo:2 * D + lo + HEAD_DIM]
            # Scores over all stacked rows; the additive mask blocks cross-image
            # and padded-key attention, so real rows are mathematically exact.
            s = jax.lax.dot_general(qh, kh, (((1,), (1,)), ((), ())),
                                    preferred_element_type=jnp.float32) + mask
            s = s - jnp.max(s, axis=-1, keepdims=True)
            e = jnp.exp(s)
            a = e * pl.reciprocal(jnp.sum(e, axis=-1, keepdims=True), approx=True)
            oh = jnp.dot(a, vh, preferred_element_type=jnp.float32)        # [R, Hd]
            # Per-head projection accumulate (== concat + W_proj).
            y = y + jnp.dot(oh, w_proj_ref[d, hh], preferred_element_type=jnp.float32)
        x = x + y + vec[2:3]                                               # residual 1

        # MLP branch
        h2 = _layernorm(x, vec[3:4], vec[4:5])
        m = jnp.dot(h2, w_fc1_ref[d], preferred_element_type=jnp.float32) + b_fc1_ref[d]
        m = _gelu(m)
        x = x + jnp.dot(m, w_fc2_ref[d], preferred_element_type=jnp.float32) + vec[5:6]

    # ---- final LN on the cls rows only + head (Dropout(0.4) = identity) ------
    cls = jnp.concatenate([x[b * T_PAD:b * T_PAD + 1, :] for b in range(B)],
                          axis=0)                                          # [B, D]
    lnf = ln_f_ref[...]
    cls = _layernorm(cls, lnf[0:1], lnf[1:2])
    out_ref[...] = (jnp.dot(cls, w_head_ref[...], preferred_element_type=jnp.float32)
                    + b_head_ref[...])                                     # [B, 128]


# ----------------------------- pallas_call wrapper ----------------------------
def _full(shape):
    # Whole-array block (single grid step).
    return pl.BlockSpec(shape, lambda i: (0,) * len(shape))


def vit_pallas(patches, mask, packed):
    (w_patch, tok_bias, w_qkv, b_qkv, w_proj, blk_vecs,
     w_fc1, b_fc1, w_fc2, ln_f, w_head, b_head) = packed
    out = pl.pallas_call(
        vit_kernel,
        out_shape=jax.ShapeDtypeStruct((B, NUM_CLASSES_PAD), jnp.float32),
        grid=(1,),
        in_specs=[
            _full((R, P)),                                   # stacked patches
            _full((R, R)),                                   # attention mask
            _full((P, D)),                                   # w_patch
            _full((R, D)),                                   # tok_bias
            _full((DEPTH, D, QKV_PAD)),                      # fused lane-dense qkv weight
            _full((DEPTH, 1, QKV_PAD)),                      # fused lane-dense qkv bias
            _full((DEPTH, HEADS, HEAD_DIM, D)),              # per-head projection
            _full((DEPTH, 6, D)),                            # packed LN/bias vecs
            _full((DEPTH, D, MLP)),                          # w_fc1
            _full((DEPTH, 1, MLP)),                          # b_fc1
            _full((DEPTH, MLP, D)),                          # w_fc2
            _full((2, D)),                                   # final LN gamma/beta
            _full((D, NUM_CLASSES_PAD)),                     # padded head weight
            _full((1, NUM_CLASSES_PAD)),                     # padded head bias
        ],
        out_specs=_full((B, NUM_CLASSES_PAD)),
        compiler_params=pltpu.CompilerParams(dimension_semantics=("arbitrary",)),
    )(patches, mask, w_patch, tok_bias, w_qkv, b_qkv, w_proj, blk_vecs,
      w_fc1, b_fc1, w_fc2, ln_f, w_head, b_head)
    return out[:, :NUM_CLASSES]


# ----------------------------- parameters ------------------------------------
def init_params(key):
    def nrm(k, shape, scale=0.02):
        return (scale * jax.random.normal(k, shape)).astype(jnp.float32)

    keys = iter(jax.random.split(key, 8 + DEPTH * 8))
    params = {
        "w_patch": nrm(next(keys), (P, D)),
        "b_patch": jnp.zeros((1, D), jnp.float32),
        "cls": nrm(next(keys), (1, D)),
        "pos": nrm(next(keys), (T, D)),
        "ln_f_g": jnp.ones((1, D), jnp.float32),
        "ln_f_b": jnp.zeros((1, D), jnp.float32),
        "w_head": nrm(next(keys), (D, NUM_CLASSES)),
        "b_head": jnp.zeros((1, NUM_CLASSES), jnp.float32),
        "blocks": [],
    }
    for _ in range(DEPTH):
        params["blocks"].append({
            "ln1_g": jnp.ones((1, D), jnp.float32),
            "ln1_b": jnp.zeros((1, D), jnp.float32),
            "w_qkv": nrm(next(keys), (D, 3 * D)),
            "b_qkv": jnp.zeros((1, 3 * D), jnp.float32),
            "w_proj": nrm(next(keys), (D, D)),
            "b_proj": jnp.zeros((1, D), jnp.float32),
            "ln2_g": jnp.ones((1, D), jnp.float32),
            "ln2_b": jnp.zeros((1, D), jnp.float32),
            "w_fc1": nrm(next(keys), (D, MLP)),
            "b_fc1": jnp.zeros((1, MLP), jnp.float32),
            "w_fc2": nrm(next(keys), (MLP, D)),
            "b_fc2": jnp.zeros((1, D), jnp.float32),
        })
    return params


def pack_params(params):
    # Repack the logical (timm-like) parameter layout into a small number of
    # stacked, lane-dense, kernel-friendly operands.  Pure parameter plumbing,
    # exact math.  Called ONCE at setup, never on the per-call jit path.
    scale = HEAD_DIM ** -0.5
    pad_rows = T_PAD - T
    tok_bias_one = jnp.concatenate(
        [params["cls"] + params["pos"][0:1],
         params["pos"][1:] + params["b_patch"],
         jnp.zeros((pad_rows, D), jnp.float32)], axis=0)                  # [T_PAD, D]
    tok_bias = jnp.tile(tok_bias_one, (B, 1))                             # [R, D]

    # Fold the attention scale into q columns (columns [0, D) of the fused qkv).
    col_scale = jnp.concatenate([jnp.full((D,), scale, jnp.float32),
                                 jnp.ones((2 * D,), jnp.float32)])[None, :]

    w_qkv, b_qkv, w_proj, vecs, w_fc1, b_fc1, w_fc2 = [], [], [], [], [], [], []
    for blk in params["blocks"]:
        wq = (blk["w_qkv"] * col_scale).astype(jnp.float32)               # [D, 3D]
        bq = (blk["b_qkv"] * col_scale).astype(jnp.float32)               # [1, 3D]
        w_qkv.append(jnp.pad(wq, ((0, 0), (0, QKV_PAD - 3 * D))))         # [D, 128]
        b_qkv.append(jnp.pad(bq, ((0, 0), (0, QKV_PAD - 3 * D))))         # [1, 128]
        # [D, D] -> [HEADS, HEAD_DIM, D]: per-head projection rows.
        w_proj.append(blk["w_proj"].reshape(HEADS, HEAD_DIM, D))
        vecs.append(jnp.stack([blk["ln1_g"][0], blk["ln1_b"][0], blk["b_proj"][0],
                               blk["ln2_g"][0], blk["ln2_b"][0], blk["b_fc2"][0]], axis=0))
        w_fc1.append(blk["w_fc1"])
        b_fc1.append(blk["b_fc1"])
        w_fc2.append(blk["w_fc2"])

    ln_f = jnp.concatenate([params["ln_f_g"], params["ln_f_b"]], axis=0)  # [2, D]
    w_head = jnp.pad(params["w_head"], ((0, 0), (0, NUM_CLASSES_PAD - NUM_CLASSES)))
    b_head = jnp.pad(params["b_head"], ((0, 0), (0, NUM_CLASSES_PAD - NUM_CLASSES)))

    return (params["w_patch"], tok_bias,
            jnp.stack(w_qkv), jnp.stack(b_qkv), jnp.stack(w_proj), jnp.stack(vecs),
            jnp.stack(w_fc1), jnp.stack(b_fc1), jnp.stack(w_fc2),
            ln_f, w_head, b_head)


def build_attn_mask():
    # [R, R] additive mask: 0 where (query, key) belong to the same image AND
    # the key is a real (non-pad) token; -1e30 otherwise.  Block-diagonal
    # attention over sublane-stacked images, exact for all real rows.
    idx = jnp.arange(R)
    same_img = (idx[:, None] // T_PAD) == (idx[None, :] // T_PAD)
    key_real = (idx[None, :] % T_PAD) < T
    return jnp.where(same_img & key_real, 0.0, _NEG_BIG).astype(jnp.float32)


# ----------------------------- full forward ----------------------------------
def extract_patches(x):
    # x: NCHW [B, C, IMG, IMG] -> [B*T_PAD, P] matching Conv2d(k=p, s=p) +
    # flatten, with a zero cls row and zero pad rows per image so every image
    # starts on an 8-aligned sublane.
    b, c, h, w = x.shape
    p = x.reshape(b, c, h // PATCH, PATCH, w // PATCH, PATCH)
    p = p.transpose(0, 2, 4, 1, 3, 5).reshape(b, N, P)
    p = jnp.pad(p, ((0, 0), (1, T_PAD - N - 1), (0, 0)))     # [B, T_PAD, P]
    return p.reshape(b * T_PAD, P)


def vit_forward(x, mask, packed):
    # Packed weights and attention mask are precomputed once outside this
    # function; only the input-dependent patch extraction runs per call.
    patches = extract_patches(x)
    return vit_pallas(patches, mask, packed)


# ----------------------------- main -------------------------------------------
if __name__ == "__main__":
    key = jax.random.PRNGKey(0)
    k_x, k_p = jax.random.split(key)
    x = jax.random.normal(k_x, (B, C, IMG, IMG), dtype=jnp.float32)   # NCHW
    params = init_params(k_p)

    # Hoisted out of the hot path: packed weights + mask built exactly once.
    packed = pack_params(params)
    mask = build_attn_mask()

    fwd = jax.jit(vit_forward)
    logits = jax.block_until_ready(fwd(x, mask, packed))

    assert logits.shape == (B, NUM_CLASSES)
    assert bool(jnp.all(jnp.isfinite(logits)))
    print("KERNEL_OK")
</pallas_src>

<mosaic_0001>
module attributes {stable_mosaic.version = 11 : i64} {
  func.func @vit_kernel(%arg0: i32, %arg1: memref<48x48xf32, #tpu.memory_space<vmem>>, %arg2: memref<48x48xf32, #tpu.memory_space<vmem>>, %arg3: memref<48x32xf32, #tpu.memory_space<vmem>>, %arg4: memref<48x32xf32, #tpu.memory_space<vmem>>, %arg5: memref<2x32x128xf32, #tpu.memory_space<vmem>>, %arg6: memref<2x1x128xf32, #tpu.memory_space<vmem>>, %arg7: memref<2x4x8x32xf32, #tpu.memory_space<vmem>>, %arg8: memref<2x6x32xf32, #tpu.memory_space<vmem>>, %arg9: memref<2x32x128xf32, #tpu.memory_space<vmem>>, %arg10: memref<2x1x128xf32, #tpu.memory_space<vmem>>, %arg11: memref<2x128x32xf32, #tpu.memory_space<vmem>>, %arg12: memref<2x32xf32, #tpu.memory_space<vmem>>, %arg13: memref<32x128xf32, #tpu.memory_space<vmem>>, %arg14: memref<1x128xf32, #tpu.memory_space<vmem>>, %arg15: memref<2x128xf32, #tpu.memory_space<vmem>>) attributes {dimension_semantics = [#tpu.dimension_semantics<arbitrary>], iteration_bounds = array<i64: 1>, scalar_prefetch = 0 : i64, scratch_operands = 0 : i64, tpu.core_type = #tpu.core_type<tc>, window_params = [{pipeline_mode = #tpu.pipeline_mode<synchronous>, transform_indices = @transform_0, window_bounds = array<i64: 48, 48>}, {pipeline_mode = #tpu.pipeline_mode<synchronous>, transform_indices = @transform_1, window_bounds = array<i64: 48, 48>}, {pipeline_mode = #tpu.pipeline_mode<synchronous>, transform_indices = @transform_2, window_bounds = array<i64: 48, 32>}, {pipeline_mode = #tpu.pipeline_mode<synchronous>, transform_indices = @transform_3, window_bounds = array<i64: 48, 32>}, {pipeline_mode = #tpu.pipeline_mode<synchronous>, transform_indices = @transform_4, window_bounds = array<i64: 2, 32, 128>}, {pipeline_mode = #tpu.pipeline_mode<synchronous>, transform_indices = @transform_5, window_bounds = array<i64: 2, 1, 128>}, {pipeline_mode = #tpu.pipeline_mode<synchronous>, transform_indices = @transform_6, window_bounds = array<i64: 2, 4, 8, 32>}, {pipeline_mode = #tpu.pipeline_mode<synchronous>, transform_indices = @transform_7, window_bounds = array<i64: 2, 6, 32>}, {pipeline_mode = #tpu.pipeline_mode<synchronous>, transform_indices = @transform_8, window_bounds = array<i64: 2, 32, 128>}, {pipeline_mode = #tpu.pipeline_mode<synchronous>, transform_indices = @transform_9, window_bounds = array<i64: 2, 1, 128>}, {pipeline_mode = #tpu.pipeline_mode<synchronous>, transform_indices = @transform_10, window_bounds = array<i64: 2, 128, 32>}, {pipeline_mode = #tpu.pipeline_mode<synchronous>, transform_indices = @transform_11, window_bounds = array<i64: 2, 32>}, {pipeline_mode = #tpu.pipeline_mode<synchronous>, transform_indices = @transform_12, window_bounds = array<i64: 32, 128>}, {pipeline_mode = #tpu.pipeline_mode<synchronous>, transform_indices = @transform_13, window_bounds = array<i64: 1, 128>}, {pipeline_mode = #tpu.pipeline_mode<synchronous>, transform_indices = @transform_14, window_bounds = array<i64: 2, 128>}]} {
    %c0 = arith.constant 0 : index
    %c0_0 = arith.constant 0 : index
    %0 = vector.load %arg2[%c0, %c0_0] : memref<48x48xf32, #tpu.memory_space<vmem>>, vector<48x48xf32>
    %c0_1 = arith.constant 0 : index
    %c0_2 = arith.constant 0 : index
    %1 = vector.load %arg1[%c0_1, %c0_2] : memref<48x48xf32, #tpu.memory_space<vmem>>, vector<48x48xf32>
    %c0_3 = arith.constant 0 : index
    %c0_4 = arith.constant 0 : index
    %2 = vector.load %arg3[%c0_3, %c0_4] : memref<48x32xf32, #tpu.memory_space<vmem>>, vector<48x32xf32>
    %cst = arith.constant dense<0.000000e+00> : vector<48x32xf32>
    %3 = tpu.matmul %1, %2, %cst {dimension_numbers = #tpu.dot_dimension_numbers<[1], [0], [0], [1], [0, 0, 1, 1], [], []>} : vector<48x48xf32>, vector<48x32xf32>, vector<48x32xf32> -> vector<48x32xf32>
    %c0_5 = arith.constant 0 : index
    %c0_6 = arith.constant 0 : index
    %4 = vector.load %arg4[%c0_5, %c0_6] : memref<48x32xf32, #tpu.memory_space<vmem>>, vector<48x32xf32>
    %5 = arith.addf %3, %4 : vector<48x32xf32>
    %c0_7 = arith.constant 0 : index
    %c0_8 = arith.constant 0 : index
    %c0_9 = arith.constant 0 : index
    %6 = vector.load %arg8[%c0_7, %c0_8, %c0_9] : memref<2x6x32xf32, #tpu.memory_space<vmem>>, vector<1x6x32xf32>
    %7 = vector.shape_cast %6 : vector<1x6x32xf32> to vector<6x32xf32>
    %8 = vector.extract_strided_slice %7 {offsets = [0, 0], sizes = [1, 32], strides = [1, 1]} : vector<6x32xf32> to vector<1x32xf32>
    %9 = vector.extract_strided_slice %7 {offsets = [1, 0], sizes = [1, 32], strides = [1, 1]} : vector<6x32xf32> to vector<1x32xf32>
    %cst_10 = arith.constant dense<0.000000e+00> : vector<48xf32>
    %10 = vector.multi_reduction <add>, %5, %cst_10 [1] : vector<48x32xf32> to vector<48xf32>
    %11 = vector.shape_cast %10 : vector<48xf32> to vector<48x1xf32>
    %cst_11 = arith.constant 3.200000e+01 : f32
    %12 = vector.broadcast %cst_11 : f32 to vector<48x1xf32>
    %13 = arith.divf %11, %12 : vector<48x1xf32>
    %14 = arith.mulf %5, %5 : vector<48x32xf32>
    %cst_12 = arith.constant dense<0.000000e+00> : vector<48xf32>
    %15 = vector.multi_reduction <add>, %14, %cst_12 [1] : vector<48x32xf32> to vector<48xf32>
    %16 = vector.shape_cast %15 : vector<48xf32> to vector<48x1xf32>
    %cst_13 = arith.constant 3.200000e+01 : f32
    %17 = vector.broadcast %cst_13 : f32 to vector<48x1xf32>
    %18 = arith.divf %16, %17 : vector<48x1xf32>
    %19 = arith.mulf %13, %13 : vector<48x1xf32>
    %20 = arith.subf %18, %19 : vector<48x1xf32>
    %cst_14 = arith.constant 0.000000e+00 : f32
    %21 = vector.broadcast %cst_14 : f32 to vector<48x1xf32>
    %22 = arith.maximumf %20, %21 : vector<48x1xf32>
    %23 = vector.broadcast %13 : vector<48x1xf32> to vector<48x32xf32>
    %24 = arith.subf %5, %23 : vector<48x32xf32>
    %cst_15 = arith.constant 9.99999997E-7 : f32
    %25 = vector.broadcast %cst_15 : f32 to vector<48x1xf32>
    %26 = arith.addf %22, %25 : vector<48x1xf32>
    %27 = math.rsqrt %26 : vector<48x1xf32>
    %28 = vector.broadcast %27 : vector<48x1xf32> to vector<48x32xf32>
    %29 = arith.mulf %24, %28 : vector<48x32xf32>
    %30 = vector.broadcast %8 : vector<1x32xf32> to vector<48x32xf32>
    %31 = arith.mulf %29, %30 : vector<48x32xf32>
    %32 = vector.broadcast %9 : vector<1x32xf32> to vector<48x32xf32>
    %33 = arith.addf %31, %32 : vector<48x32xf32>
    %c0_16 = arith.constant 0 : index
    %c0_17 = arith.constant 0 : index
    %c0_18 = arith.constant 0 : index
    %34 = vector.load %arg5[%c0_16, %c0_17, %c0_18] : memref<2x32x128xf32, #tpu.memory_space<vmem>>, vector<1x32x128xf32>
    %35 = vector.shape_cast %34 : vector<1x32x128xf32> to vector<32x128xf32>
    %cst_19 = arith.constant dense<0.000000e+00> : vector<48x128xf32>
    %36 = tpu.matmul %33, %35, %cst_19 {dimension_numbers = #tpu.dot_dimension_numbers<[1], [0], [0], [1], [0, 0, 1, 1], [], []>} : vector<48x32xf32>, vector<32x128xf32>, vector<48x128xf32> -> vector<48x128xf32>
    %c0_20 = arith.constant 0 : index
    %c0_21 = arith.constant 0 : index
    %c0_22 = arith.constant 0 : index
    %37 = vector.load %arg6[%c0_20, %c0_21, %c0_22] : memref<2x1x128xf32, #tpu.memory_space<vmem>>, vector<1x1x128xf32>
    %38 = vector.shape_cast %37 : vector<1x1x128xf32> to vector<1x128xf32>
    %39 = vector.broadcast %38 : vector<1x128xf32> to vector<48x128xf32>
    %40 = arith.addf %36, %39 : vector<48x128xf32>
    %cst_23 = arith.constant 0.000000e+00 : f32
    %41 = vector.broadcast %cst_23 : f32 to vector<48x32xf32>
    %42 = vector.extract_strided_slice %40 {offsets = [0, 0], sizes = [48, 8], strides = [1, 1]} : vector<48x128xf32> to vector<48x8xf32>
    %43 = vector.extract_strided_slice %40 {offsets = [0, 32], sizes = [48, 8], strides = [1, 1]} : vector<48x128xf32> to vector<48x8xf32>
    %44 = vector.extract_strided_slice %40 {offsets = [0, 64], sizes = [48, 8], strides = [1, 1]} : vector<48x128xf32> to vector<48x8xf32>
    %cst_24 = arith.constant dense<0.000000e+00> : vector<48x48xf32>
    %45 = tpu.matmul %42, %43, %cst_24 {dimension_numbers = #tpu.dot_dimension_numbers<[1], [1], [0], [0], [0, 0, 1, 0], [], []>} : vector<48x8xf32>, vector<48x8xf32>, vector<48x48xf32> -> vector<48x48xf32>
    %46 = arith.addf %45, %0 : vector<48x48xf32>
    %cst_25 = arith.constant dense<0xFF800000> : vector<48xf32>
    %47 = vector.multi_reduction <maximumf>, %46, %cst_25 [1] : vector<48x48xf32> to vector<48xf32>
    %48 = vector.shape_cast %47 : vector<48xf32> to vector<48x1xf32>
    %49 = vector.broadcast %48 : vector<48x1xf32> to vector<48x48xf32>
    %50 = arith.subf %46, %49 : vector<48x48xf32>
    %51 = math.exp %50 : vector<48x48xf32>
    %cst_26 = arith.constant dense<0.000000e+00> : vector<48xf32>
    %52 = vector.multi_reduction <add>, %51, %cst_26 [1] : vector<48x48xf32> to vector<48xf32>
    %53 = vector.shape_cast %52 : vector<48xf32> to vector<48x1xf32>
    %54 = tpu.reciprocal %53 {approx = true} : vector<48x1xf32> -> vector<48x1xf32>
    %55 = vector.broadcast %54 : vector<48x1xf32> to vector<48x48xf32>
    %56 = arith.mulf %51, %55 : vector<48x48xf32>
    %cst_27 = arith.constant dense<0.000000e+00> : vector<48x8xf32>
    %57 = tpu.matmul %56, %44, %cst_27 {dimension_numbers = #tpu.dot_dimension_numbers<[1], [0], [0], [1], [0, 0, 1, 1], [], []>} : vector<48x48xf32>, vector<48x8xf32>, vector<48x8xf32> -> vector<48x8xf32>
    %c0_28 = arith.constant 0 : index
    %c0_29 = arith.constant 0 : index
    %c0_30 = arith.constant 0 : index
    %c0_31 = arith.constant 0 : index
    %58 = vector.load %arg7[%c0_28, %c0_29, %c0_30, %c0_31] : memref<2x4x8x32xf32, #tpu.memory_space<vmem>>, vector<1x1x8x32xf32>
    %59 = vector.shape_cast %58 : vector<1x1x8x32xf32> to vector<8x32xf32>
    %cst_32 = arith.constant dense<0.000000e+00> : vector<48x32xf32>
    %60 = tpu.matmul %57, %59, %cst_32 {dimension_numbers = #tpu.dot_dimension_numbers<[1], [0], [0], [1], [0, 0, 1, 1], [], []>} : vector<48x8xf32>, vector<8x32xf32>, vector<48x32xf32> -> vector<48x32xf32>
    %61 = arith.addf %41, %60 : vector<48x32xf32>
    %62 = vector.extract_strided_slice %40 {offsets = [0, 8], sizes = [48, 8], strides = [1, 1]} : vector<48x128xf32> to vector<48x8xf32>
    %63 = vector.extract_strided_slice %40 {offsets = [0, 40], sizes = [48, 8], strides = [1, 1]} : vector<48x128xf32> to vector<48x8xf32>
    %64 = vector.extract_strided_slice %40 {offsets = [0, 72], sizes = [48, 8], strides = [1, 1]} : vector<48x128xf32> to vector<48x8xf32>
    %cst_33 = arith.constant dense<0.000000e+00> : vector<48x48xf32>
    %65 = tpu.matmul %62, %63, %cst_33 {dimension_numbers = #tpu.dot_dimension_numbers<[1], [1], [0], [0], [0, 0, 1, 0], [], []>} : vector<48x8xf32>, vector<48x8xf32>, vector<48x48xf32> -> vector<48x48xf32>
    %66 = arith.addf %65, %0 : vector<48x48xf32>
    %cst_34 = arith.constant dense<0xFF800000> : vector<48xf32>
    %67 = vector.multi_reduction <maximumf>, %66, %cst_34 [1] : vector<48x48xf32> to vector<48xf32>
    %68 = vector.shape_cast %67 : vector<48xf32> to vector<48x1xf32>
    %69 = vector.broadcast %68 : vector<48x1xf32> to vector<48x48xf32>
    %70 = arith.subf %66, %69 : vector<48x48xf32>
    %71 = math.exp %70 : vector<48x48xf32>
    %cst_35 = arith.constant dense<0.000000e+00> : vector<48xf32>
    %72 = vector.multi_reduction <add>, %71, %cst_35 [1] : vector<48x48xf32> to vector<48xf32>
    %73 = vector.shape_cast %72 : vector<48xf32> to vector<48x1xf32>
    %74 = tpu.reciprocal %73 {approx = true} : vector<48x1xf32> -> vector<48x1xf32>
    %75 = vector.broadcast %74 : vector<48x1xf32> to vector<48x48xf32>
    %76 = arith.mulf %71, %75 : vector<48x48xf32>
    %cst_36 = arith.constant dense<0.000000e+00> : vector<48x8xf32>
    %77 = tpu.matmul %76, %64, %cst_36 {dimension_numbers = #tpu.dot_dimension_numbers<[1], [0], [0], [1], [0, 0, 1, 1], [], []>} : vector<48x48xf32>, vector<48x8xf32>, vector<48x8xf32> -> vector<48x8xf32>
    %c0_37 = arith.constant 0 : index
    %c1 = arith.constant 1 : index
    %c0_38 = arith.constant 0 : index
    %c0_39 = arith.constant 0 : index
    %78 = vector.load %arg7[%c0_37, %c1, %c0_38, %c0_39] : memref<2x4x8x32xf32, #tpu.memory_space<vmem>>, vector<1x1x8x32xf32>
    %79 = vector.shape_cast %78 : vector<1x1x8x32xf32> to vector<8x32xf32>
    %cst_40 = arith.constant dense<0.000000e+00> : vector<48x32xf32>
    %80 = tpu.matmul %77, %79, %cst_40 {dimension_numbers = #tpu.dot_dimension_numbers<[1], [0], [0], [1], [0, 0, 1, 1], [], []>} : vector<48x8xf32>, vector<8x32xf32>, vector<48x32xf32> -> vector<48x32xf32>
    %81 = arith.addf %61, %80 : vector<48x32xf32>
    %82 = vector.extract_strided_slice %40 {offsets = [0, 16], sizes = [48, 8], strides = [1, 1]} : vector<48x128xf32> to vector<48x8xf32>
    %83 = vector.extract_strided_slice %40 {offsets = [0, 48], sizes = [48, 8], strides = [1, 1]} : vector<48x128xf32> to vector<48x8xf32>
    %84 = vector.extract_strided_slice %40 {offsets = [0, 80], sizes = [48, 8], strides = [1, 1]} : vector<48x128xf32> to vector<48x8xf32>
    %cst_41 = arith.constant dense<0.000000e+00> : vector<48x48xf32>
    %85 = tpu.matmul %82, %83, %cst_41 {dimension_numbers = #tpu.dot_dimension_numbers<[1], [1], [0], [0], [0, 0, 1, 0], [], []>} : vector<48x8xf32>, vector<48x8xf32>, vector<48x48xf32> -> vector<48x48xf32>
    %86 = arith.addf %85, %0 : vector<48x48xf32>
    %cst_42 = arith.constant dense<0xFF800000> : vector<48xf32>
    %87 = vector.multi_reduction <maximumf>, %86, %cst_42 [1] : vector<48x48xf32> to vector<48xf32>
    %88 = vector.shape_cast %87 : vector<48xf32> to vector<48x1xf32>
    %89 = vector.broadcast %88 : vector<48x1xf32> to vector<48x48xf32>
    %90 = arith.subf %86, %89 : vector<48x48xf32>
    %91 = math.exp %90 : vector<48x48xf32>
    %cst_43 = arith.constant dense<0.000000e+00> : vector<48xf32>
    %92 = vector.multi_reduction <add>, %91, %cst_43 [1] : vector<48x48xf32> to vector<48xf32>
    %93 = vector.shape_cast %92 : vector<48xf32> to vector<48x1xf32>
    %94 = tpu.reciprocal %93 {approx = true} : vector<48x1xf32> -> vector<48x1xf32>
    %95 = vector.broadcast %94 : vector<48x1xf32> to vector<48x48xf32>
    %96 = arith.mulf %91, %95 : vector<48x48xf32>
    %cst_44 = arith.constant dense<0.000000e+00> : vector<48x8xf32>
    %97 = tpu.matmul %96, %84, %cst_44 {dimension_numbers = #tpu.dot_dimension_numbers<[1], [0], [0], [1], [0, 0, 1, 1], [], []>} : vector<48x48xf32>, vector<48x8xf32>, vector<48x8xf32> -> vector<48x8xf32>
    %c0_45 = arith.constant 0 : index
    %c2 = arith.constant 2 : index
    %c0_46 = arith.constant 0 : index
    %c0_47 = arith.constant 0 : index
    %98 = vector.load %arg7[%c0_45, %c2, %c0_46, %c0_47] : memref<2x4x8x32xf32, #tpu.memory_space<vmem>>, vector<1x1x8x32xf32>
    %99 = vector.shape_cast %98 : vector<1x1x8x32xf32> to vector<8x32xf32>
    %cst_48 = arith.constant dense<0.000000e+00> : vector<48x32xf32>
    %100 = tpu.matmul %97, %99, %cst_48 {dimension_numbers = #tpu.dot_dimension_numbers<[1], [0], [0], [1], [0, 0, 1, 1], [], []>} : vector<48x8xf32>, vector<8x32xf32>, vector<48x32xf32> -> vector<48x32xf32>
    %101 = arith.addf %81, %100 : vector<48x32xf32>
    %102 = vector.extract_strided_slice %40 {offsets = [0, 24], sizes = [48, 8], strides = [1, 1]} : vector<48x128xf32> to vector<48x8xf32>
    %103 = vector.extract_strided_slice %40 {offsets = [0, 56], sizes = [48, 8], strides = [1, 1]} : vector<48x128xf32> to vector<48x8xf32>
    %104 = vector.extract_strided_slice %40 {offsets = [0, 88], sizes = [48, 8], strides = [1, 1]} : vector<48x128xf32> to vector<48x8xf32>
    %cst_49 = arith.constant dense<0.000000e+00> : vector<48x48xf32>
    %105 = tpu.matmul %102, %103, %cst_49 {dimension_numbers = #tpu.dot_dimension_numbers<[1], [1], [0], [0], [0, 0, 1, 0], [], []>} : vector<48x8xf32>, vector<48x8xf32>, vector<48x48xf32> -> vector<48x48xf32>
    %106 = arith.addf %105, %0 : vector<48x48xf32>
    %cst_50 = arith.constant dense<0xFF800000> : vector<48xf32>
    %107 = vector.multi_reduction <maximumf>, %106, %cst_50 [1] : vector<48x48xf32> to vector<48xf32>
    %108 = vector.shape_cast %107 : vector<48xf32> to vector<48x1xf32>
    %109 = vector.broadcast %108 : vector<48x1xf32> to vector<48x48xf32>
    %110 = arith.subf %106, %109 : vector<48x48xf32>
    %111 = math.exp %110 : vector<48x48xf32>
    %cst_51 = arith.constant dense<0.000000e+00> : vector<48xf32>
    %112 = vector.multi_reduction <add>, %111, %cst_51 [1] : vector<48x48xf32> to vector<48xf32>
    %113 = vector.shape_cast %112 : vector<48xf32> to vector<48x1xf32>
    %114 = tpu.reciprocal %113 {approx = true} : vector<48x1xf32> -> vector<48x1xf32>
    %115 = vector.broadcast %114 : vector<48x1xf32> to vector<48x48xf32>
    %116 = arith.mulf %111, %115 : vector<48x48xf32>
    %cst_52 = arith.constant dense<0.000000e+00> : vector<48x8xf32>
    %117 = tpu.matmul %116, %104, %cst_52 {dimension_numbers = #tpu.dot_dimension_numbers<[1], [0], [0], [1], [0, 0, 1, 1], [], []>} : vector<48x48xf32>, vector<48x8xf32>, vector<48x8xf32> -> vector<48x8xf32>
    %c0_53 = arith.constant 0 : index
    %c3 = arith.constant 3 : index
    %c0_54 = arith.constant 0 : index
    %c0_55 = arith.constant 0 : index
    %118 = vector.load %arg7[%c0_53, %c3, %c0_54, %c0_55] : memref<2x4x8x32xf32, #tpu.memory_space<vmem>>, vector<1x1x8x32xf32>
    %119 = vector.shape_cast %118 : vector<1x1x8x32xf32> to vector<8x32xf32>
    %cst_56 = arith.constant dense<0.000000e+00> : vector<48x32xf32>
    %120 = tpu.matmul %117, %119, %cst_56 {dimension_numbers = #tpu.dot_dimension_numbers<[1], [0], [0], [1], [0, 0, 1, 1], [], []>} : vector<48x8xf32>, vector<8x32xf32>, vector<48x32xf32> -> vector<48x32xf32>
    %121 = arith.addf %101, %120 : vector<48x32xf32>
    %122 = arith.addf %5, %121 : vector<48x32xf32>
    %123 = vector.extract_strided_slice %7 {offsets = [2, 0], sizes = [1, 32], strides = [1, 1]} : vector<6x32xf32> to vector<1x32xf32>
    %124 = vector.broadcast %123 : vector<1x32xf32> to vector<48x32xf32>
    %125 = arith.addf %122, %124 : vector<48x32xf32>
    %126 = vector.extract_strided_slice %7 {offsets = [3, 0], sizes = [1, 32], strides = [1, 1]} : vector<6x32xf32> to vector<1x32xf32>
    %127 = vector.extract_strided_slice %7 {offsets = [4, 0], sizes = [1, 32], strides = [1, 1]} : vector<6x32xf32> to vector<1x32xf32>
    %cst_57 = arith.constant dense<0.000000e+00> : vector<48xf32>
    %128 = vector.multi_reduction <add>, %125, %cst_57 [1] : vector<48x32xf32> to vector<48xf32>
    %129 = vector.shape_cast %128 : vector<48xf32> to vector<48x1xf32>
    %cst_58 = arith.constant 3.200000e+01 : f32
    %130 = vector.broadcast %cst_58 : f32 to vector<48x1xf32>
    %131 = arith.divf %129, %130 : vector<48x1xf32>
    %132 = arith.mulf %125, %125 : vector<48x32xf32>
    %cst_59 = arith.constant dense<0.000000e+00> : vector<48xf32>
    %133 = vector.multi_reduction <add>, %132, %cst_59 [1] : vector<48x32xf32> to vector<48xf32>
    %134 = vector.shape_cast %133 : vector<48xf32> to vector<48x1xf32>
    %cst_60 = arith.constant 3.200000e+01 : f32
    %135 = vector.broadcast %cst_60 : f32 to vector<48x1xf32>
    %136 = arith.divf %134, %135 : vector<48x1xf32>
    %137 = arith.mulf %131, %131 : vector<48x1xf32>
    %138 = arith.subf %136, %137 : vector<48x1xf32>
    %cst_61 = arith.constant 0.000000e+00 : f32
    %139 = vector.broadcast %cst_61 : f32 to vector<48x1xf32>
    %140 = arith.maximumf %138, %139 : vector<48x1xf32>
    %141 = vector.broadcast %131 : vector<48x1xf32> to vector<48x32xf32>
    %142 = arith.subf %125, %141 : vector<48x32xf32>
    %cst_62 = arith.constant 9.99999997E-7 : f32
    %143 = vector.broadcast %cst_62 : f32 to vector<48x1xf32>
    %144 = arith.addf %140, %143 : vector<48x1xf32>
    %145 = math.rsqrt %144 : vector<48x1xf32>
    %146 = vector.broadcast %145 : vector<48x1xf32> to vector<48x32xf32>
    %147 = arith.mulf %142, %146 : vector<48x32xf32>
    %148 = vector.broadcast %126 : vector<1x32xf32> to vector<48x32xf32>
    %149 = arith.mulf %147, %148 : vector<48x32xf32>
    %150 = vector.broadcast %127 : vector<1x32xf32> to vector<48x32xf32>
    %151 = arith.addf %149, %150 : vector<48x32xf32>
    %c0_63 = arith.constant 0 : index
    %c0_64 = arith.constant 0 : index
    %c0_65 = arith.constant 0 : index
    %152 = vector.load %arg9[%c0_63, %c0_64, %c0_65] : memref<2x32x128xf32, #tpu.memory_space<vmem>>, vector<1x32x128xf32>
    %153 = vector.shape_cast %152 : vector<1x32x128xf32> to vector<32x128xf32>
    %cst_66 = arith.constant dense<0.000000e+00> : vector<48x128xf32>
    %154 = tpu.matmul %151, %153, %cst_66 {dimension_numbers = #tpu.dot_dimension_numbers<[1], [0], [0], [1], [0, 0, 1, 1], [], []>} : vector<48x32xf32>, vector<32x128xf32>, vector<48x128xf32> -> vector<48x128xf32>
    %c0_67 = arith.constant 0 : index
    %c0_68 = arith.constant 0 : index
    %c0_69 = arith.constant 0 : index
    %155 = vector.load %arg10[%c0_67, %c0_68, %c0_69] : memref<2x1x128xf32, #tpu.memory_space<vmem>>, vector<1x1x128xf32>
    %156 = vector.shape_cast %155 : vector<1x1x128xf32> to vector<1x128xf32>
    %157 = vector.broadcast %156 : vector<1x128xf32> to vector<48x128xf32>
    %158 = arith.addf %154, %157 : vector<48x128xf32>
    %cst_70 = arith.constant 5.000000e-01 : f32
    %159 = vector.broadcast %cst_70 : f32 to vector<48x128xf32>
    %160 = arith.mulf %159, %158 : vector<48x128xf32>
    %cst_71 = arith.constant 0.707106769 : f32
    %161 = vector.broadcast %cst_71 : f32 to vector<48x128xf32>
    %162 = arith.mulf %158, %161 : vector<48x128xf32>
    %cst_72 = arith.constant 0.000000e+00 : f32
    %163 = vector.broadcast %cst_72 : f32 to vector<48x128xf32>
    %164 = arith.cmpf olt, %162, %163 : vector<48x128xf32>
    %cst_73 = arith.constant -1.000000e+00 : f32
    %cst_74 = arith.constant 1.000000e+00 : f32
    %165 = vector.broadcast %cst_73 : f32 to vector<48x128xf32>
    %166 = vector.broadcast %cst_74 : f32 to vector<48x128xf32>
    %167 = arith.select %164, %165, %166 : vector<48x128xi1>, vector<48x128xf32>
    %168 = math.absf %162 : vector<48x128xf32>
    %cst_75 = arith.constant 0.327591091 : f32
    %169 = vector.broadcast %cst_75 : f32 to vector<48x128xf32>
    %170 = arith.mulf %169, %168 : vector<48x128xf32>
    %cst_76 = arith.constant 1.000000e+00 : f32
    %171 = vector.broadcast %cst_76 : f32 to vector<48x128xf32>
    %172 = arith.addf %171, %170 : vector<48x128xf32>
    %173 = tpu.reciprocal %172 {approx = true} : vector<48x128xf32> -> vector<48x128xf32>
    %cst_77 = arith.constant 1.06140542 : f32
    %174 = vector.broadcast %cst_77 : f32 to vector<48x128xf32>
    %175 = arith.mulf %173, %174 : vector<48x128xf32>
    %cst_78 = arith.constant -1.45315206 : f32
    %176 = vector.broadcast %cst_78 : f32 to vector<48x128xf32>
    %177 = arith.addf %176, %175 : vector<48x128xf32>
    %178 = arith.mulf %173, %177 : vector<48x128xf32>
    %cst_79 = arith.constant 1.42141378 : f32
    %179 = vector.broadcast %cst_79 : f32 to vector<48x128xf32>
    %180 = arith.addf %179, %178 : vector<48x128xf32>
    %181 = arith.mulf %173, %180 : vector<48x128xf32>
    %cst_80 = arith.constant -0.284496725 : f32
    %182 = vector.broadcast %cst_80 : f32 to vector<48x128xf32>
    %183 = arith.addf %182, %181 : vector<48x128xf32>
    %184 = arith.mulf %173, %183 : vector<48x128xf32>
    %cst_81 = arith.constant 0.254829586 : f32
    %185 = vector.broadcast %cst_81 : f32 to vector<48x128xf32>
    %186 = arith.addf %185, %184 : vector<48x128xf32>
    %187 = arith.mulf %173, %186 : vector<48x128xf32>
    %cst_82 = arith.constant 0.000000e+00 : f32
    %188 = vector.broadcast %cst_82 : f32 to vector<48x128xf32>
    %189 = arith.subf %188, %168 : vector<48x128xf32>
    %190 = arith.mulf %189, %168 : vector<48x128xf32>
    %191 = math.exp %190 : vector<48x128xf32>
    %192 = arith.mulf %187, %191 : vector<48x128xf32>
    %cst_83 = arith.constant 1.000000e+00 : f32
    %193 = vector.broadcast %cst_83 : f32 to vector<48x128xf32>
    %194 = arith.subf %193, %192 : vector<48x128xf32>
    %195 = arith.mulf %167, %194 : vector<48x128xf32>
    %cst_84 = arith.constant 1.000000e+00 : f32
    %196 = vector.broadcast %cst_84 : f32 to vector<48x128xf32>
    %197 = arith.addf %196, %195 : vector<48x128xf32>
    %198 = arith.mulf %160, %197 : vector<48x128xf32>
    %c0_85 = arith.constant 0 : index
    %c0_86 = arith.constant 0 : index
    %c0_87 = arith.constant 0 : index
    %199 = vector.load %arg11[%c0_85, %c0_86, %c0_87] : memref<2x128x32xf32, #tpu.memory_space<vmem>>, vector<1x128x32xf32>
    %200 = vector.shape_cast %199 : vector<1x128x32xf32> to vector<128x32xf32>
    %cst_88 = arith.constant dense<0.000000e+00> : vector<48x32xf32>
    %201 = tpu.matmul %198, %200, %cst_88 {dimension_numbers = #tpu.dot_dimension_numbers<[1], [0], [0], [1], [0, 0, 1, 1], [], []>} : vector<48x128xf32>, vector<128x32xf32>, vector<48x32xf32> -> vector<48x32xf32>
    %202 = arith.addf %125, %201 : vector<48x32xf32>
    %203 = vector.extract_strided_slice %7 {offsets = [5, 0], sizes = [1, 32], strides = [1, 1]} : vector<6x32xf32> to vector<1x32xf32>
    %204 = vector.broadcast %203 : vector<1x32xf32> to vector<48x32xf32>
    %205 = arith.addf %202, %204 : vector<48x32xf32>
    %c1_89 = arith.constant 1 : index
    %c0_90 = arith.constant 0 : index
    %c0_91 = arith.constant 0 : index
    %206 = vector.load %arg8[%c1_89, %c0_90, %c0_91] : memref<2x6x32xf32, #tpu.memory_space<vmem>>, vector<1x6x32xf32>
    %207 = vector.shape_cast %206 : vector<1x6x32xf32> to vector<6x32xf32>
    %208 = vector.extract_strided_slice %207 {offsets = [0, 0], sizes = [1, 32], strides = [1, 1]} : vector<6x32xf32> to vector<1x32xf32>
    %209 = vector.extract_strided_slice %207 {offsets = [1, 0], sizes = [1, 32], strides = [1, 1]} : vector<6x32xf32> to vector<1x32xf32>
    %cst_92 = arith.constant dense<0.000000e+00> : vector<48xf32>
    %210 = vector.multi_reduction <add>, %205, %cst_92 [1] : vector<48x32xf32> to vector<48xf32>
    %211 = vector.shape_cast %210 : vector<48xf32> to vector<48x1xf32>
    %cst_93 = arith.constant 3.200000e+01 : f32
    %212 = vector.broadcast %cst_93 : f32 to vector<48x1xf32>
    %213 = arith.divf %211, %212 : vector<48x1xf32>
    %214 = arith.mulf %205, %205 : vector<48x32xf32>
    %cst_94 = arith.constant dense<0.000000e+00> : vector<48xf32>
    %215 = vector.multi_reduction <add>, %214, %cst_94 [1] : vector<48x32xf32> to vector<48xf32>
    %216 = vector.shape_cast %215 : vector<48xf32> to vector<48x1xf32>
    %cst_95 = arith.constant 3.200000e+01 : f32
    %217 = vector.broadcast %cst_95 : f32 to vector<48x1xf32>
    %218 = arith.divf %216, %217 : vector<48x1xf32>
    %219 = arith.mulf %213, %213 : vector<48x1xf32>
    %220 = arith.subf %218, %219 : vector<48x1xf32>
    %cst_96 = arith.constant 0.000000e+00 : f32
    %221 = vector.broadcast %cst_96 : f32 to vector<48x1xf32>
    %222 = arith.maximumf %220, %221 : vector<48x1xf32>
    %223 = vector.broadcast %213 : vector<48x1xf32> to vector<48x32xf32>
    %224 = arith.subf %205, %223 : vector<48x32xf32>
    %cst_97 = arith.constant 9.99999997E-7 : f32
    %225 = vector.broadcast %cst_97 : f32 to vector<48x1xf32>
    %226 = arith.addf %222, %225 : vector<48x1xf32>
    %227 = math.rsqrt %226 : vector<48x1xf32>
    %228 = vector.broadcast %227 : vector<48x1xf32> to vector<48x32xf32>
    %229 = arith.mulf %224, %228 : vector<48x32xf32>
    %230 = vector.broadcast %208 : vector<1x32xf32> to vector<48x32xf32>
    %231 = arith.mulf %229, %230 : vector<48x32xf32>
    %232 = vector.broadcast %209 : vector<1x32xf32> to vector<48x32xf32>
    %233 = arith.addf %231, %232 : vector<48x32xf32>
    %c1_98 = arith.constant 1 : index
    %c0_99 = arith.constant 0 : index
    %c0_100 = arith.constant 0 : index
    %234 = vector.load %arg5[%c1_98, %c0_99, %c0_100] : memref<2x32x128xf32, #tpu.memory_space<vmem>>, vector<1x32x128xf32>
    %235 = vector.shape_cast %234 : vector<1x32x128xf32> to vector<32x128xf32>
    %cst_101 = arith.constant dense<0.000000e+00> : vector<48x128xf32>
    %236 = tpu.matmul %233, %235, %cst_101 {dimension_numbers = #tpu.dot_dimension_numbers<[1], [0], [0], [1], [0, 0, 1, 1], [], []>} : vector<48x32xf32>, vector<32x128xf32>, vector<48x128xf32> -> vector<48x128xf32>
    %c1_102 = arith.constant 1 : index
    %c0_103 = arith.constant 0 : index
    %c0_104 = arith.constant 0 : index
    %237 = vector.load %arg6[%c1_102, %c0_103, %c0_104] : memref<2x1x128xf32, #tpu.memory_space<vmem>>, vector<1x1x128xf32>
    %238 = vector.shape_cast %237 : vector<1x1x128xf32> to vector<1x128xf32>
    %239 = vector.broadcast %238 : vector<1x128xf32> to vector<48x128xf32>
    %240 = arith.addf %236, %239 : vector<48x128xf32>
    %cst_105 = arith.constant 0.000000e+00 : f32
    %241 = vector.broadcast %cst_105 : f32 to vector<48x32xf32>
    %242 = vector.extract_strided_slice %240 {offsets = [0, 0], sizes = [48, 8], strides = [1, 1]} : vector<48x128xf32> to vector<48x8xf32>
    %243 = vector.extract_strided_slice %240 {offsets = [0, 32], sizes = [48, 8], strides = [1, 1]} : vector<48x128xf32> to vector<48x8xf32>
    %244 = vector.extract_strided_slice %240 {offsets = [0, 64], sizes = [48, 8], strides = [1, 1]} : vector<48x128xf32> to vector<48x8xf32>
    %cst_106 = arith.constant dense<0.000000e+00> : vector<48x48xf32>
    %245 = tpu.matmul %242, %243, %cst_106 {dimension_numbers = #tpu.dot_dimension_numbers<[1], [1], [0], [0], [0, 0, 1, 0], [], []>} : vector<48x8xf32>, vector<48x8xf32>, vector<48x48xf32> -> vector<48x48xf32>
    %246 = arith.addf %245, %0 : vector<48x48xf32>
    %cst_107 = arith.constant dense<0xFF800000> : vector<48xf32>
    %247 = vector.multi_reduction <maximumf>, %246, %cst_107 [1] : vector<48x48xf32> to vector<48xf32>
    %248 = vector.shape_cast %247 : vector<48xf32> to vector<48x1xf32>
    %249 = vector.broadcast %248 : vector<48x1xf32> to vector<48x48xf32>
    %250 = arith.subf %246, %249 : vector<48x48xf32>
    %251 = math.exp %250 : vector<48x48xf32>
    %cst_108 = arith.constant dense<0.000000e+00> : vector<48xf32>
    %252 = vector.multi_reduction <add>, %251, %cst_108 [1] : vector<48x48xf32> to vector<48xf32>
    %253 = vector.shape_cast %252 : vector<48xf32> to vector<48x1xf32>
    %254 = tpu.reciprocal %253 {approx = true} : vector<48x1xf32> -> vector<48x1xf32>
    %255 = vector.broadcast %254 : vector<48x1xf32> to vector<48x48xf32>
    %256 = arith.mulf %251, %255 : vector<48x48xf32>
    %cst_109 = arith.constant dense<0.000000e+00> : vector<48x8xf32>
    %257 = tpu.matmul %256, %244, %cst_109 {dimension_numbers = #tpu.dot_dimension_numbers<[1], [0], [0], [1], [0, 0, 1, 1], [], []>} : vector<48x48xf32>, vector<48x8xf32>, vector<48x8xf32> -> vector<48x8xf32>
    %c1_110 = arith.constant 1 : index
    %c0_111 = arith.constant 0 : index
    %c0_112 = arith.constant 0 : index
    %c0_113 = arith.constant 0 : index
    %258 = vector.load %arg7[%c1_110, %c0_111, %c0_112, %c0_113] : memref<2x4x8x32xf32, #tpu.memory_space<vmem>>, vector<1x1x8x32xf32>
    %259 = vector.shape_cast %258 : vector<1x1x8x32xf32> to vector<8x32xf32>
    %cst_114 = arith.constant dense<0.000000e+00> : vector<48x32xf32>
    %260 = tpu.matmul %257, %259, %cst_114 {dimension_numbers = #tpu.dot_dimension_numbers<[1], [0], [0], [1], [0, 0, 1, 1], [], []>} : vector<48x8xf32>, vector<8x32xf32>, vector<48x32xf32> -> vector<48x32xf32>
    %261 = arith.addf %241, %260 : vector<48x32xf32>
    %262 = vector.extract_strided_slice %240 {offsets = [0, 8], sizes = [48, 8], strides = [1, 1]} : vector<48x128xf32> to vector<48x8xf32>
    %263 = vector.extract_strided_slice %240 {offsets = [0, 40], sizes = [48, 8], strides = [1, 1]} : vector<48x128xf32> to vector<48x8xf32>
    %264 = vector.extract_strided_slice %240 {offsets = [0, 72], sizes = [48, 8], strides = [1, 1]} : vector<48x128xf32> to vector<48x8xf32>
    %cst_115 = arith.constant dense<0.000000e+00> : vector<48x48xf32>
    %265 = tpu.matmul %262, %263, %cst_115 {dimension_numbers = #tpu.dot_dimension_numbers<[1], [1], [0], [0], [0, 0, 1, 0], [], []>} : vector<48x8xf32>, vector<48x8xf32>, vector<48x48xf32> -> vector<48x48xf32>
    %266 = arith.addf %265, %0 : vector<48x48xf32>
    %cst_116 = arith.constant dense<0xFF800000> : vector<48xf32>
    %267 = vector.multi_reduction <maximumf>, %266, %cst_116 [1] : vector<48x48xf32> to vector<48xf32>
    %268 = vector.shape_cast %267 : vector<48xf32> to vector<48x1xf32>
    %269 = vector.broadcast %268 : vector<48x1xf32> to vector<48x48xf32>
    %270 = arith.subf %266, %269 : vector<48x48xf32>
    %271 = math.exp %270 : vector<48x48xf32>
    %cst_117 = arith.constant dense<0.000000e+00> : vector<48xf32>
    %272 = vector.multi_reduction <add>, %271, %cst_117 [1] : vector<48x48xf32> to vector<48xf32>
    %273 = vector.shape_cast %272 : vector<48xf32> to vector<48x1xf32>
    %274 = tpu.reciprocal %273 {approx = true} : vector<48x1xf32> -> vector<48x1xf32>
    %275 = vector.broadcast %274 : vector<48x1xf32> to vector<48x48xf32>
    %276 = arith.mulf %271, %275 : vector<48x48xf32>
    %cst_118 = arith.constant dense<0.000000e+00> : vector<48x8xf32>
    %277 = tpu.matmul %276, %264, %cst_118 {dimension_numbers = #tpu.dot_dimension_numbers<[1], [0], [0], [1], [0, 0, 1, 1], [], []>} : vector<48x48xf32>, vector<48x8xf32>, vector<48x8xf32> -> vector<48x8xf32>
    %c1_119 = arith.constant 1 : index
    %c1_120 = arith.constant 1 : index
    %c0_121 = arith.constant 0 : index
    %c0_122 = arith.constant 0 : index
    %278 = vector.load %arg7[%c1_119, %c1_120, %c0_121, %c0_122] : memref<2x4x8x32xf32, #tpu.memory_space<vmem>>, vector<1x1x8x32xf32>
    %279 = vector.shape_cast %278 : vector<1x1x8x32xf32> to vector<8x32xf32>
    %cst_123 = arith.constant dense<0.000000e+00> : vector<48x32xf32>
    %280 = tpu.matmul %277, %279, %cst_123 {dimension_numbers = #tpu.dot_dimension_numbers<[1], [0], [0], [1], [0, 0, 1, 1], [], []>} : vector<48x8xf32>, vector<8x32xf32>, vector<48x32xf32> -> vector<48x32xf32>
    %281 = arith.addf %261, %280 : vector<48x32xf32>
    %282 = vector.extract_strided_slice %240 {offsets = [0, 16], sizes = [48, 8], strides = [1, 1]} : vector<48x128xf32> to vector<48x8xf32>
    %283 = vector.extract_strided_slice %240 {offsets = [0, 48], sizes = [48, 8], strides = [1, 1]} : vector<48x128xf32> to vector<48x8xf32>
    %284 = vector.extract_strided_slice %240 {offsets = [0, 80], sizes = [48, 8], strides = [1, 1]} : vector<48x128xf32> to vector<48x8xf32>
    %cst_124 = arith.constant dense<0.000000e+00> : vector<48x48xf32>
    %285 = tpu.matmul %282, %283, %cst_124 {dimension_numbers = #tpu.dot_dimension_numbers<[1], [1], [0], [0], [0, 0, 1, 0], [], []>} : vector<48x8xf32>, vector<48x8xf32>, vector<48x48xf32> -> vector<48x48xf32>
    %286 = arith.addf %285, %0 : vector<48x48xf32>
    %cst_125 = arith.constant dense<0xFF800000> : vector<48xf32>
    %287 = vector.multi_reduction <maximumf>, %286, %cst_125 [1] : vector<48x48xf32> to vector<48xf32>
    %288 = vector.shape_cast %287 : vector<48xf32> to vector<48x1xf32>
    %289 = vector.broadcast %288 : vector<48x1xf32> to vector<48x48xf32>
    %290 = arith.subf %286, %289 : vector<48x48xf32>
    %291 = math.exp %290 : vector<48x48xf32>
    %cst_126 = arith.constant dense<0.000000e+00> : vector<48xf32>
    %292 = vector.multi_reduction <add>, %291, %cst_126 [1] : vector<48x48xf32> to vector<48xf32>
    %293 = vector.shape_cast %292 : vector<48xf32> to vector<48x1xf32>
    %294 = tpu.reciprocal %293 {approx = true} : vector<48x1xf32> -> vector<48x1xf32>
    %295 = vector.broadcast %294 : vector<48x1xf32> to vector<48x48xf32>
    %296 = arith.mulf %291, %295 : vector<48x48xf32>
    %cst_127 = arith.constant dense<0.000000e+00> : vector<48x8xf32>
    %297 = tpu.matmul %296, %284, %cst_127 {dimension_numbers = #tpu.dot_dimension_numbers<[1], [0], [0], [1], [0, 0, 1, 1], [], []>} : vector<48x48xf32>, vector<48x8xf32>, vector<48x8xf32> -> vector<48x8xf32>
    %c1_128 = arith.constant 1 : index
    %c2_129 = arith.constant 2 : index
    %c0_130 = arith.constant 0 : index
    %c0_131 = arith.constant 0 : index
    %298 = vector.load %arg7[%c1_128, %c2_129, %c0_130, %c0_131] : memref<2x4x8x32xf32, #tpu.memory_space<vmem>>, vector<1x1x8x32xf32>
    %299 = vector.shape_cast %298 : vector<1x1x8x32xf32> to vector<8x32xf32>
    %cst_132 = arith.constant dense<0.000000e+00> : vector<48x32xf32>
    %300 = tpu.matmul %297, %299, %cst_132 {dimension_numbers = #tpu.dot_dimension_numbers<[1], [0], [0], [1], [0, 0, 1, 1], [], []>} : vector<48x8xf32>, vector<8x32xf32>, vector<48x32xf32> -> vector<48x32xf32>
    %301 = arith.addf %281, %300 : vector<48x32xf32>
    %302 = vector.extract_strided_slice %240 {offsets = [0, 24], sizes = [48, 8], strides = [1, 1]} : vector<48x128xf32> to vector<48x8xf32>
    %303 = vector.extract_strided_slice %240 {offsets = [0, 56], sizes = [48, 8], strides = [1, 1]} : vector<48x128xf32> to vector<48x8xf32>
    %304 = vector.extract_strided_slice %240 {offsets = [0, 88], sizes = [48, 8], strides = [1, 1]} : vector<48x128xf32> to vector<48x8xf32>
    %cst_133 = arith.constant dense<0.000000e+00> : vector<48x48xf32>
    %305 = tpu.matmul %302, %303, %cst_133 {dimension_numbers = #tpu.dot_dimension_numbers<[1], [1], [0], [0], [0, 0, 1, 0], [], []>} : vector<48x8xf32>, vector<48x8xf32>, vector<48x48xf32> -> vector<48x48xf32>
    %306 = arith.addf %305, %0 : vector<48x48xf32>
    %cst_134 = arith.constant dense<0xFF800000> : vector<48xf32>
    %307 = vector.multi_reduction <maximumf>, %306, %cst_134 [1] : vector<48x48xf32> to vector<48xf32>
    %308 = vector.shape_cast %307 : vector<48xf32> to vector<48x1xf32>
    %309 = vector.broadcast %308 : vector<48x1xf32> to vector<48x48xf32>
    %310 = arith.subf %306, %309 : vector<48x48xf32>
    %311 = math.exp %310 : vector<48x48xf32>
    %cst_135 = arith.constant dense<0.000000e+00> : vector<48xf32>
    %312 = vector.multi_reduction <add>, %311, %cst_135 [1] : vector<48x48xf32> to vector<48xf32>
    %313 = vector.shape_cast %312 : vector<48xf32> to vector<48x1xf32>
    %314 = tpu.reciprocal %313 {approx = true} : vector<48x1xf32> -> vector<48x1xf32>
    %315 = vector.broadcast %314 : vector<48x1xf32> to vector<48x48xf32>
    %316 = arith.mulf %311, %315 : vector<48x48xf32>
    %cst_136 = arith.constant dense<0.000000e+00> : vector<48x8xf32>
    %317 = tpu.matmul %316, %304, %cst_136 {dimension_numbers = #tpu.dot_dimension_numbers<[1], [0], [0], [1], [0, 0, 1, 1], [], []>} : vector<48x48xf32>, vector<48x8xf32>, vector<48x8xf32> -> vector<48x8xf32>
    %c1_137 = arith.constant 1 : index
    %c3_138 = arith.constant 3 : index
    %c0_139 = arith.constant 0 : index
    %c0_140 = arith.constant 0 : index
    %318 = vector.load %arg7[%c1_137, %c3_138, %c0_139, %c0_140] : memref<2x4x8x32xf32, #tpu.memory_space<vmem>>, vector<1x1x8x32xf32>
    %319 = vector.shape_cast %318 : vector<1x1x8x32xf32> to vector<8x32xf32>
    %cst_141 = arith.constant dense<0.000000e+00> : vector<48x32xf32>
    %320 = tpu.matmul %317, %319, %cst_141 {dimension_numbers = #tpu.dot_dimension_numbers<[1], [0], [0], [1], [0, 0, 1, 1], [], []>} : vector<48x8xf32>, vector<8x32xf32>, vector<48x32xf32> -> vector<48x32xf32>
    %321 = arith.addf %301, %320 : vector<48x32xf32>
    %322 = arith.addf %205, %321 : vector<48x32xf32>
    %323 = vector.extract_strided_slice %207 {offsets = [2, 0], sizes = [1, 32], strides = [1, 1]} : vector<6x32xf32> to vector<1x32xf32>
    %324 = vector.broadcast %323 : vector<1x32xf32> to vector<48x32xf32>
    %325 = arith.addf %322, %324 : vector<48x32xf32>
    %326 = vector.extract_strided_slice %207 {offsets = [3, 0], sizes = [1, 32], strides = [1, 1]} : vector<6x32xf32> to vector<1x32xf32>
    %327 = vector.extract_strided_slice %207 {offsets = [4, 0], sizes = [1, 32], strides = [1, 1]} : vector<6x32xf32> to vector<1x32xf32>
    %cst_142 = arith.constant dense<0.000000e+00> : vector<48xf32>
    %328 = vector.multi_reduction <add>, %325, %cst_142 [1] : vector<48x32xf32> to vector<48xf32>
    %329 = vector.shape_cast %328 : vector<48xf32> to vector<48x1xf32>
    %cst_143 = arith.constant 3.200000e+01 : f32
    %330 = vector.broadcast %cst_143 : f32 to vector<48x1xf32>
    %331 = arith.divf %329, %330 : vector<48x1xf32>
    %332 = arith.mulf %325, %325 : vector<48x32xf32>
    %cst_144 = arith.constant dense<0.000000e+00> : vector<48xf32>
    %333 = vector.multi_reduction <add>, %332, %cst_144 [1] : vector<48x32xf32> to vector<48xf32>
    %334 = vector.shape_cast %333 : vector<48xf32> to vector<48x1xf32>
    %cst_145 = arith.constant 3.200000e+01 : f32
    %335 = vector.broadcast %cst_145 : f32 to vector<48x1xf32>
    %336 = arith.divf %334, %335 : vector<48x1xf32>
    %337 = arith.mulf %331, %331 : vector<48x1xf32>
    %338 = arith.subf %336, %337 : vector<48x1xf32>
    %cst_146 = arith.constant 0.000000e+00 : f32
    %339 = vector.broadcast %cst_146 : f32 to vector<48x1xf32>
    %340 = arith.maximumf %338, %339 : vector<48x1xf32>
    %341 = vector.broadcast %331 : vector<48x1xf32> to vector<48x32xf32>
    %342 = arith.subf %325, %341 : vector<48x32xf32>
    %cst_147 = arith.constant 9.99999997E-7 : f32
    %343 = vector.broadcast %cst_147 : f32 to vector<48x1xf32>
    %344 = arith.addf %340, %343 : vector<48x1xf32>
    %345 = math.rsqrt %344 : vector<48x1xf32>
    %346 = vector.broadcast %345 : vector<48x1xf32> to vector<48x32xf32>
    %347 = arith.mulf %342, %346 : vector<48x32xf32>
    %348 = vector.broadcast %326 : vector<1x32xf32> to vector<48x32xf32>
    %349 = arith.mulf %347, %348 : vector<48x32xf32>
    %350 = vector.broadcast %327 : vector<1x32xf32> to vector<48x32xf32>
    %351 = arith.addf %349, %350 : vector<48x32xf32>
    %c1_148 = arith.constant 1 : index
    %c0_149 = arith.constant 0 : index
    %c0_150 = arith.constant 0 : index
    %352 = vector.load %arg9[%c1_148, %c0_149, %c0_150] : memref<2x32x128xf32, #tpu.memory_space<vmem>>, vector<1x32x128xf32>
    %353 = vector.shape_cast %352 : vector<1x32x128xf32> to vector<32x128xf32>
    %cst_151 = arith.constant dense<0.000000e+00> : vector<48x128xf32>
    %354 = tpu.matmul %351, %353, %cst_151 {dimension_numbers = #tpu.dot_dimension_numbers<[1], [0], [0], [1], [0, 0, 1, 1], [], []>} : vector<48x32xf32>, vector<32x128xf32>, vector<48x128xf32> -> vector<48x128xf32>
    %c1_152 = arith.constant 1 : index
    %c0_153 = arith.constant 0 : index
    %c0_154 = arith.constant 0 : index
    %355 = vector.load %arg10[%c1_152, %c0_153, %c0_154] : memref<2x1x128xf32, #tpu.memory_space<vmem>>, vector<1x1x128xf32>
    %356 = vector.shape_cast %355 : vector<1x1x128xf32> to vector<1x128xf32>
    %357 = vector.broadcast %356 : vector<1x128xf32> to vector<48x128xf32>
    %358 = arith.addf %354, %357 : vector<48x128xf32>
    %cst_155 = arith.constant 5.000000e-01 : f32
    %359 = vector.broadcast %cst_155 : f32 to vector<48x128xf32>
    %360 = arith.mulf %359, %358 : vector<48x128xf32>
    %cst_156 = arith.constant 0.707106769 : f32
    %361 = vector.broadcast %cst_156 : f32 to vector<48x128xf32>
    %362 = arith.mulf %358, %361 : vector<48x128xf32>
    %cst_157 = arith.constant 0.000000e+00 : f32
    %363 = vector.broadcast %cst_157 : f32 to vector<48x128xf32>
    %364 = arith.cmpf olt, %362, %363 : vector<48x128xf32>
    %cst_158 = arith.constant -1.000000e+00 : f32
    %cst_159 = arith.constant 1.000000e+00 : f32
    %365 = vector.broadcast %cst_158 : f32 to vector<48x128xf32>
    %366 = vector.broadcast %cst_159 : f32 to vector<48x128xf32>
    %367 = arith.select %364, %365, %366 : vector<48x128xi1>, vector<48x128xf32>
    %368 = math.absf %362 : vector<48x128xf32>
    %cst_160 = arith.constant 0.327591091 : f32
    %369 = vector.broadcast %cst_160 : f32 to vector<48x128xf32>
    %370 = arith.mulf %369, %368 : vector<48x128xf32>
    %cst_161 = arith.constant 1.000000e+00 : f32
    %371 = vector.broadcast %cst_161 : f32 to vector<48x128xf32>
    %372 = arith.addf %371, %370 : vector<48x128xf32>
    %373 = tpu.reciprocal %372 {approx = true} : vector<48x128xf32> -> vector<48x128xf32>
    %cst_162 = arith.constant 1.06140542 : f32
    %374 = vector.broadcast %cst_162 : f32 to vector<48x128xf32>
    %375 = arith.mulf %373, %374 : vector<48x128xf32>
    %cst_163 = arith.constant -1.45315206 : f32
    %376 = vector.broadcast %cst_163 : f32 to vector<48x128xf32>
    %377 = arith.addf %376, %375 : vector<48x128xf32>
    %378 = arith.mulf %373, %377 : vector<48x128xf32>
    %cst_164 = arith.constant 1.42141378 : f32
    %379 = vector.broadcast %cst_164 : f32 to vector<48x128xf32>
    %380 = arith.addf %379, %378 : vector<48x128xf32>
    %381 = arith.mulf %373, %380 : vector<48x128xf32>
    %cst_165 = arith.constant -0.284496725 : f32
    %382 = vector.broadcast %cst_165 : f32 to vector<48x128xf32>
    %383 = arith.addf %382, %381 : vector<48x128xf32>
    %384 = arith.mulf %373, %383 : vector<48x128xf32>
    %cst_166 = arith.constant 0.254829586 : f32
    %385 = vector.broadcast %cst_166 : f32 to vector<48x128xf32>
    %386 = arith.addf %385, %384 : vector<48x128xf32>
    %387 = arith.mulf %373, %386 : vector<48x128xf32>
    %cst_167 = arith.constant 0.000000e+00 : f32
    %388 = vector.broadcast %cst_167 : f32 to vector<48x128xf32>
    %389 = arith.subf %388, %368 : vector<48x128xf32>
    %390 = arith.mulf %389, %368 : vector<48x128xf32>
    %391 = math.exp %390 : vector<48x128xf32>
    %392 = arith.mulf %387, %391 : vector<48x128xf32>
    %cst_168 = arith.constant 1.000000e+00 : f32
    %393 = vector.broadcast %cst_168 : f32 to vector<48x128xf32>
    %394 = arith.subf %393, %392 : vector<48x128xf32>
    %395 = arith.mulf %367, %394 : vector<48x128xf32>
    %cst_169 = arith.constant 1.000000e+00 : f32
    %396 = vector.broadcast %cst_169 : f32 to vector<48x128xf32>
    %397 = arith.addf %396, %395 : vector<48x128xf32>
    %398 = arith.mulf %360, %397 : vector<48x128xf32>
    %c1_170 = arith.constant 1 : index
    %c0_171 = arith.constant 0 : index
    %c0_172 = arith.constant 0 : index
    %399 = vector.load %arg11[%c1_170, %c0_171, %c0_172] : memref<2x128x32xf32, #tpu.memory_space<vmem>>, vector<1x128x32xf32>
    %400 = vector.shape_cast %399 : vector<1x128x32xf32> to vector<128x32xf32>
    %cst_173 = arith.constant dense<0.000000e+00> : vector<48x32xf32>
    %401 = tpu.matmul %398, %400, %cst_173 {dimension_numbers = #tpu.dot_dimension_numbers<[1], [0], [0], [1], [0, 0, 1, 1], [], []>} : vector<48x128xf32>, vector<128x32xf32>, vector<48x32xf32> -> vector<48x32xf32>
    %402 = arith.addf %325, %401 : vector<48x32xf32>
    %403 = vector.extract_strided_slice %207 {offsets = [5, 0], sizes = [1, 32], strides = [1, 1]} : vector<6x32xf32> to vector<1x32xf32>
    %404 = vector.broadcast %403 : vector<1x32xf32> to vector<48x32xf32>
    %405 = arith.addf %402, %404 : vector<48x32xf32>
    %406 = vector.extract_strided_slice %405 {offsets = [0, 0], sizes = [1, 32], strides = [1, 1]} : vector<48x32xf32> to vector<1x32xf32>
    %407 = vector.extract_strided_slice %405 {offsets = [24, 0], sizes = [1, 32], strides = [1, 1]} : vector<48x32xf32> to vector<1x32xf32>
    %408 = tpu.concatenate %406, %407 in 0 : vector<1x32xf32>, vector<1x32xf32> -> vector<2x32xf32>
    %c0_174 = arith.constant 0 : index
    %c0_175 = arith.constant 0 : index
    %409 = vector.load %arg12[%c0_174, %c0_175] : memref<2x32xf32, #tpu.memory_space<vmem>>, vector<2x32xf32>
    %410 = vector.extract_strided_slice %409 {offsets = [0, 0], sizes = [1, 32], strides = [1, 1]} : vector<2x32xf32> to vector<1x32xf32>
    %411 = vector.extract_strided_slice %409 {offsets = [1, 0], sizes = [1, 32], strides = [1, 1]} : vector<2x32xf32> to vector<1x32xf32>
    %cst_176 = arith.constant dense<0.000000e+00> : vector<2xf32>
    %412 = vector.multi_reduction <add>, %408, %cst_176 [1] : vector<2x32xf32> to vector<2xf32>
    %413 = vector.shape_cast %412 : vector<2xf32> to vector<2x1xf32>
    %cst_177 = arith.constant 3.200000e+01 : f32
    %414 = vector.broadcast %cst_177 : f32 to vector<2x1xf32>
    %415 = arith.divf %413, %414 : vector<2x1xf32>
    %416 = arith.mulf %408, %408 : vector<2x32xf32>
    %cst_178 = arith.constant dense<0.000000e+00> : vector<2xf32>
    %417 = vector.multi_reduction <add>, %416, %cst_178 [1] : vector<2x32xf32> to vector<2xf32>
    %418 = vector.shape_cast %417 : vector<2xf32> to vector<2x1xf32>
    %cst_179 = arith.constant 3.200000e+01 : f32
    %419 = vector.broadcast %cst_179 : f32 to vector<2x1xf32>
    %420 = arith.divf %418, %419 : vector<2x1xf32>
    %421 = arith.mulf %415, %415 : vector<2x1xf32>
    %422 = arith.subf %420, %421 : vector<2x1xf32>
    %cst_180 = arith.constant 0.000000e+00 : f32
    %423 = vector.broadcast %cst_180 : f32 to vector<2x1xf32>
    %424 = arith.maximumf %422, %423 : vector<2x1xf32>
    %425 = vector.broadcast %415 : vector<2x1xf32> to vector<2x32xf32>
    %426 = arith.subf %408, %425 : vector<2x32xf32>
    %cst_181 = arith.constant 9.99999997E-7 : f32
    %427 = vector.broadcast %cst_181 : f32 to vector<2x1xf32>
    %428 = arith.addf %424, %427 : vector<2x1xf32>
    %429 = math.rsqrt %428 : vector<2x1xf32>
    %430 = vector.broadcast %429 : vector<2x1xf32> to vector<2x32xf32>
    %431 = arith.mulf %426, %430 : vector<2x32xf32>
    %432 = vector.broadcast %410 : vector<1x32xf32> to vector<2x32xf32>
    %433 = arith.mulf %431, %432 : vector<2x32xf32>
    %434 = vector.broadcast %411 : vector<1x32xf32> to vector<2x32xf32>
    %435 = arith.addf %433, %434 : vector<2x32xf32>
    %c0_182 = arith.constant 0 : index
    %c0_183 = arith.constant 0 : index
    %436 = vector.load %arg13[%c0_182, %c0_183] : memref<32x128xf32, #tpu.memory_space<vmem>>, vector<32x128xf32>
    %cst_184 = arith.constant dense<0.000000e+00> : vector<2x128xf32>
    %437 = tpu.matmul %435, %436, %cst_184 {dimension_numbers = #tpu.dot_dimension_numbers<[1], [0], [0], [1], [0, 0, 1, 1], [], []>} : vector<2x32xf32>, vector<32x128xf32>, vector<2x128xf32> -> vector<2x128xf32>
    %c0_185 = arith.constant 0 : index
    %c0_186 = arith.constant 0 : index
    %438 = vector.load %arg14[%c0_185, %c0_186] : memref<1x128xf32, #tpu.memory_space<vmem>>, vector<1x128xf32>
    %439 = vector.broadcast %438 : vector<1x128xf32> to vector<2x128xf32>
    %440 = arith.addf %437, %439 : vector<2x128xf32>
    %c0_187 = arith.constant 0 : index
    %c0_188 = arith.constant 0 : index
    %441 = vector.load %arg15[%c0_187, %c0_188] : memref<2x128xf32, #tpu.memory_space<vmem>>, vector<2x128xf32>
    tpu.vector_store %arg15[%c0_187, %c0_188], %440 {strides = array<i32>} : memref<2x128xf32, #tpu.memory_space<vmem>>, vector<2x128xf32>,
    return
  }
  func.func @transform_0(%arg0: i32) -> (i32, i32) {
    %c0_i32 = arith.constant 0 : i32
    %c0_i32_0 = arith.constant 0 : i32
    %c0_i32_1 = arith.constant 0 : i32
    return %c0_i32, %c0_i32_0 : i32, i32
  }
  func.func @transform_1(%arg0: i32) -> (i32, i32) {
    %c0_i32 = arith.constant 0 : i32
    %c0_i32_0 = arith.constant 0 : i32
    %c0_i32_1 = arith.constant 0 : i32
    return %c0_i32, %c0_i32_0 : i32, i32
  }
  func.func @transform_2(%arg0: i32) -> (i32, i32) {
    %c0_i32 = arith.constant 0 : i32
    %c0_i32_0 = arith.constant 0 : i32
    %c0_i32_1 = arith.constant 0 : i32
    return %c0_i32, %c0_i32_0 : i32, i32
  }
  func.func @transform_3(%arg0: i32) -> (i32, i32) {
    %c0_i32 = arith.constant 0 : i32
    %c0_i32_0 = arith.constant 0 : i32
    %c0_i32_1 = arith.constant 0 : i32
    return %c0_i32, %c0_i32_0 : i32, i32
  }
  func.func @transform_4(%arg0: i32) -> (i32, i32, i32) {
    %c0_i32 = arith.constant 0 : i32
    %c0_i32_0 = arith.constant 0 : i32
    %c0_i32_1 = arith.constant 0 : i32
    %c0_i32_2 = arith.constant 0 : i32
    return %c0_i32, %c0_i32_0, %c0_i32_1 : i32, i32, i32
  }
  func.func @transform_5(%arg0: i32) -> (i32, i32, i32) {
    %c0_i32 = arith.constant 0 : i32
    %c0_i32_0 = arith.constant 0 : i32
    %c0_i32_1 = arith.constant 0 : i32
    %c0_i32_2 = arith.constant 0 : i32
    return %c0_i32, %c0_i32_0, %c0_i32_1 : i32, i32, i32
  }
  func.func @transform_6(%arg0: i32) -> (i32, i32, i32, i32) {
    %c0_i32 = arith.constant 0 : i32
    %c0_i32_0 = arith.constant 0 : i32
    %c0_i32_1 = arith.constant 0 : i32
    %c0_i32_2 = arith.constant 0 : i32
    %c0_i32_3 = arith.constant 0 : i32
    return %c0_i32, %c0_i32_0, %c0_i32_1, %c0_i32_2 : i32, i32, i32, i32
  }
  func.func @transform_7(%arg0: i32) -> (i32, i32, i32) {
    %c0_i32 = arith.constant 0 : i32
    %c0_i32_0 = arith.constant 0 : i32
    %c0_i32_1 = arith.constant 0 : i32
    %c0_i32_2 = arith.constant 0 : i32
    return %c0_i32, %c0_i32_0, %c0_i32_1 : i32, i32, i32
  }
  func.func @transform_8(%arg0: i32) -> (i32, i32, i32) {
    %c0_i32 = arith.constant 0 : i32
    %c0_i32_0 = arith.constant 0 : i32
    %c0_i32_1 = arith.constant 0 : i32
    %c0_i32_2 = arith.constant 0 : i32
    return %c0_i32, %c0_i32_0, %c0_i32_1 : i32, i32, i32
  }
  func.func @transform_9(%arg0: i32) -> (i32, i32, i32) {
    %c0_i32 = arith.constant 0 : i32
    %c0_i32_0 = arith.constant 0 : i32
    %c0_i32_1 = arith.constant 0 : i32
    %c0_i32_2 = arith.constant 0 : i32
    return %c0_i32, %c0_i32_0, %c0_i32_1 : i32, i32, i32
  }
  func.func @transform_10(%arg0: i32) -> (i32, i32, i32) {
    %c0_i32 = arith.constant 0 : i32
    %c0_i32_0 = arith.constant 0 : i32
    %c0_i32_1 = arith.constant 0 : i32
    %c0_i32_2 = arith.constant 0 : i32
    return %c0_i32, %c0_i32_0, %c0_i32_1 : i32, i32, i32
  }
  func.func @transform_11(%arg0: i32) -> (i32, i32) {
    %c0_i32 = arith.constant 0 : i32
    %c0_i32_0 = arith.constant 0 : i32
    %c0_i32_1 = arith.constant 0 : i32
    return %c0_i32, %c0_i32_0 : i32, i32
  }
  func.func @transform_12(%arg0: i32) -> (i32, i32) {
    %c0_i32 = arith.constant 0 : i32
    %c0_i32_0 = arith.constant 0 : i32
    %c0_i32_1 = arith.constant 0 : i32
    return %c0_i32, %c0_i32_0 : i32, i32
  }
  func.func @transform_13(%arg0: i32) -> (i32, i32) {
    %c0_i32 = arith.constant 0 : i32
    %c0_i32_0 = arith.constant 0 : i32
    %c0_i32_1 = arith.constant 0 : i32
    return %c0_i32, %c0_i32_0 : i32, i32
  }
  func.func @transform_14(%arg0: i32) -> (i32, i32) {
    %c0_i32 = arith.constant 0 : i32
    %c0_i32_0 = arith.constant 0 : i32
    %c0_i32_1 = arith.constant 0 : i32
    return %c0_i32, %c0_i32_0 : i32, i32
  }
}

</mosaic_0001>

<bundles_post_ra>
// kernel: vit_forward.1
= control target key start
LH: loop header
LB: loop body
LE: loop exit
PB: predicated region body
PF: predicated region fallthrough
CT: control target
= control target key end

     0   :  { %vm72_vm0 = vcmask 392192   ;;  %s8887_s0 = inlined_call_operand.vmem [shape: f32[48,48], index: 0, kind: input, shape index: {}]   ;;  %s8888_s1 = inlined_call_operand.vmem [shape: f32[48,48], index: 1, kind: input, shape index: {}]   ;;  %s8889_s2 = inlined_call_operand.vmem [shape: f32[48,32], index: 2, kind: input, shape index: {}]   ;;  %s8890_s3 = inlined_call_operand.vmem [shape: f32[48,32], index: 3, kind: input, shape index: {}]   ;;  %s8891_s4 = inlined_call_operand.vmem [shape: f32[2,32,128], index: 4, kind: input, shape index: {}]   ;;  %s8892_s5 = inlined_call_operand.vmem [shape: f32[2,1,128], index: 5, kind: input, shape index: {}]   ;;  %s8893_s6 = inlined_call_operand.vmem [shape: f32[2,4,8,32], index: 6, kind: input, shape index: {}]   ;;  %s8894_s7 = inlined_call_operand.vmem [shape: f32[2,6,32], index: 7, kind: input, shape index: {}]   ;;  %s8895_s8 = inlined_call_operand.vmem [shape: f32[2,32,128], index: 8, kind: input, shape index: {}]   ;;  %s8896_s9 = inlined_call_operand.vmem [shape: f32[2,1,128], index: 9, kind: input, shape index: {}]   ;;  %s8897_s10 = inlined_call_operand.vmem [shape: f32[2,128,32], index: 10, kind: input, shape index: {}]   ;;  %s8898_s11 = inlined_call_operand.vmem [shape: f32[2,32], index: 11, kind: input, shape index: {}]   ;;  %s8899_s12 = inlined_call_operand.vmem [shape: f32[32,128], index: 12, kind: input, shape index: {}]   ;;  %s8900_s13 = inlined_call_operand.vmem [shape: f32[1,128], index: 13, kind: input, shape index: {}]   ;;  %s8901_s14 = inlined_call_operand.hbm [shape: f32[2,128], index: 14, kind: output, shape index: {}]  }
   0x1   :  { %v65_v0 = vld [vmem:[%s8889_s2 + $0x28] sm:$0xff]  ;;  %v64_v1 = vld [vmem:[%s8889_s2 + $0x20] sm:$0xff]  ;;  %v63_v2 = vld [vmem:[%s8889_s2 + $0x18] sm:$0xff] }
   0x2   :  { %6137 = vmatprep.subr.mxu1 %v65_v0  ;;  %v54_v3 = vld [vmem:[%s8887_s0] sm:$0xff]  ;;  %v62_v4 = vld [vmem:[%s8889_s2 + $0x10] sm:$0xff] }
   0x3   :  { %6138 = vmatpush3.msra.mxu1 %v65_v0  ;;  %6149 = vmatprep.mubr.msk.f32.mxu1 %vm72_vm0, %v54_v3 }
   0x4   :  { %6139 = vmatprep.subr.mxu1 %v64_v1 }
   0x5   :  { %6140 = vmatpush3.msra.mxu1 %v64_v1 }
   0x6   :  { %19 = vsyncpa [#allocation3], 0  ;;  %6141 = vmatprep.subr.mxu1 %v63_v2  ;;  %v61_v5 = vld [vmem:[%s8889_s2 + $0x8] sm:$0xff]  ;;  %v60_v6 = vld [vmem:[%s8889_s2] sm:$0xff]  ;;  %vm187_vm1 = vcmask 261120   ;;  %vm447_vm2 = vcmask 64512  }
   0x7   :  { %6142 = vmatpush3.msra.mxu1 %v63_v2  ;;  %v55_v7 = vld [vmem:[%s8887_s0 + $0x8] sm:$0xff]  ;;  %v56_v8 = vld [vmem:[%s8887_s0 + $0x10] sm:$0xff]  ;;  %v57_v9 = vld [vmem:[%s8887_s0 + $0x18] sm:$0xff]  ;;  %s7080_s24 = smov 96   ;;  %s7081_s25 = smov 64   ;;  %vm5397_vm15 = vcmask 1040384  }
   0x8   :  { %6143 = vmatprep.subr.mxu1 %v62_v4  ;;  %v58_v10 = vld [vmem:[%s8887_s0 + $0x20] sm:$0xff]  ;;  %v59_v11 = vld [vmem:[%s8887_s0 + $0x28] sm:$0xff]  ;;  %v68_v21 = vld [vmem:[%s8890_s3 + $0x10] sm:$0xff]  ;;  %s7082_s26 = smov 88   ;;  %s7083_s21 = smov 120  }
   0x9   :  { %6144 = vmatpush3.msra.mxu1 %v62_v4  ;;  %v67_v12 = vld [vmem:[%s8890_s3 + $0x8] sm:$0xff]  ;;  %v66_v14 = vld [vmem:[%s8890_s3] sm:$0xff]  ;;  %v69_v24 = vld [vmem:[%s8890_s3 + $0x18] sm:$0xff]  ;;  %s7084_s0 = smov 56   ;;  %s7085_s27 = smov 80  }
   0xa   :  { %6145 = vmatprep.subr.mxu1 %v61_v5  ;;  %v70_v33 = vld [vmem:[%s8890_s3 + $0x20] sm:$0xff]  ;;  %v71_v38 = vld [vmem:[%s8890_s3 + $0x28] sm:$0xff]  ;;  %v308_v48 = vld [vmem:[%s8891_s4 + $0x18] sm:$0xff]  ;;  %s7086_s28 = smov 112   ;;  %s7087_s29 = smov 72  }
   0xb   :  { %6146 = vmatpush3.msra.mxu1 %v61_v5  ;;  %v307_v49 = vld [vmem:[%s8891_s4 + $0x10] sm:$0xff]  ;;  %v306_v50 = vld [vmem:[%s8891_s4 + $0x8] sm:$0xff]  ;;  %v305_v51 = vld [vmem:[%s8891_s4] sm:$0xff]  ;;  %s7088_s30 = smov 104   ;;  %s7089_s16 = smov 48  }
   0xc   :  { %6147 = vmatprep.subr.mxu1 %v60_v6  ;;  %s7090_s2 = smov 40   ;;  %s7094_s20 = smov [#allocation2]  }
   0xd   :  { %6148 = vmatpush3.msra.mxu1 %v60_v6  ;;  %s5518_s22 = sshll.u32 %s7094_s20, 4  ;;  %s5519_s22 = int_to_ptr.vmem [resolvable:$true] %s5518_s22 }
   0xe   :  { %6150 = vmatmul.mubr.msk.f32.vlgmr.msra.gmra.mxu1 %vm72_vm0, %v55_v7  ;;  %6158 = vmatprep.subr.mxu1 %v308_v48  ;;  %p7063_p1 = scmp.lt.s32.totalorder %s5519_s22, %s5519_s22 }
   0xf   :  { %6152 = vmatprep.mubr.msk.f32.mxu1 %vm72_vm0, %v56_v8  ;;  %6159 = vmatpush3.msra.mxu1 %v308_v48 }
  0x10   :  { %6160 = vmatprep.subr.mxu1 %v307_v49 }
  0x11   :  { %6161 = vmatpush3.msra.mxu1 %v307_v49 }
  0x12   :  { %6153 = vmatmul.mubr.msk.f32.gmra.mxu1 %vm72_vm0, %v57_v9  ;;  %6162 = vmatprep.subr.mxu1 %v306_v50 }
  0x13   :  { %6155 = vmatprep.mubr.msk.f32.mxu1 %vm72_vm0, %v58_v10  ;;  %6163 = vmatpush3.msra.mxu1 %v306_v50 }
  0x14   :  { %6164 = vmatprep.subr.mxu1 %v305_v51 }
  0x15   :  { %6165 = vmatpush3.msra.mxu1 %v305_v51 }
  0x16   :  { %6156 = vmatmul.mubr.msk.f32.gmra.mxu1 %vm72_vm0, %v59_v11 }
  0xce   :  { %v6151_v13 = vpop.f32.mrf.mxu1 }
  0xcf   :  { %v7218_v15 = vadd.f32 %v6151_v13, %v67_v12  ;;  %v285_v12 = vlaneseq }
  0xd0   :  { %v157_v16 = vpop.f32.mrf.mxu1 }
  0xd1   :  { %v7220_v17 = vadd.f32 %v157_v16, %v66_v14  ;;  %v191_v18 = vsel %vm187_vm1, %v7218_v15, 0.0  ;;  %v214_v19 = vmul.f32 %v7218_v15, %v7218_v15 }
  0xd2   :  { %192 = vadd.xlane.f32.xlu0 %v191_v18  ;;  %v6154_v20 = vpop.f32.mrf.mxu1 }
  0xd3   :  { %v222_v22 = vsel %vm187_vm1, %v214_v19, 0.0  ;;  %v213_v23 = vmul.f32 %v7220_v17, %v7220_v17  ;;  %v188_v27 = vsel %vm187_vm1, %v7220_v17, 0.0  ;;  %v7239_v29 = vadd.f32 %v6154_v20, %v69_v24 }
  0xd4   :  { %223 = vadd.xlane.f32.xlu1 %v222_v22  ;;  %v167_v25 = vpop.f32.mrf.mxu1 }
  0xd5   :  { %v7235_v26 = vadd.f32 %v167_v25, %v68_v21  ;;  %v219_v30 = vsel %vm187_vm1, %v213_v23, 0.0  ;;  %v197_v35 = vsel %vm187_vm1, %v7239_v29, 0.0  ;;  %v216_v37 = vmul.f32 %v7239_v29, %v7239_v29 }
  0xd6   :  { %189 = vadd.xlane.f32.xlu0 %v188_v27  ;;  %v6157_v28 = vpop.f32.mrf.mxu1  ;;  %v7284_v23 = vshrl.u32 %v285_v12, 7 }
  0xd7   :  { %v194_v31 = vsel %vm187_vm1, %v7235_v26, 0.0  ;;  %v215_v34 = vmul.f32 %v7235_v26, %v7235_v26  ;;  %v7259_v40 = vadd.f32 %v6157_v28, %v71_v38  ;;  %v228_v41 = vsel %vm187_vm1, %v216_v37, 0.0 }
  0xd8   :  { %220 = vadd.xlane.f32.xlu1 %v219_v30  ;;  %v177_v32 = vpop.f32.mrf.mxu1 }
  0xd9   :  { %v7251_v36 = vadd.f32 %v177_v32, %v70_v33  ;;  %v225_v39 = vsel %vm187_vm1, %v215_v34, 0.0  ;;  %v203_v44 = vsel %vm187_vm1, %v7259_v40, 0.0  ;;  %v218_v45 = vmul.f32 %v7259_v40, %v7259_v40 }
  0xda   :  { %195 = vadd.xlane.f32.xlu0 %v194_v31  ;;  %v7287_v34 = vsub.s32 0, %v7284_v23 }
  0xdb   :  { %v200_v42 = vsel %vm187_vm1, %v7251_v36, 0.0  ;;  %v217_v43 = vmul.f32 %v7251_v36, %v7251_v36  ;;  %v234_v47 = vsel %vm187_vm1, %v218_v45, 0.0 }
  0xdc   :  { %198 = vadd.xlane.f32.xlu1 %v197_v35 }
  0xdd   :  { %v231_v46 = vsel %vm187_vm1, %v217_v43, 0.0 }
  0xde   :  { %226 = vadd.xlane.f32.xlu0 %v225_v39  ;;  %v186_v39 = vld [vmem:[%s8894_s7] sm:$0x3f] }
  0xe0   :  { %229 = vadd.xlane.f32.xlu1 %v228_v41 }
  0xe2   :  { %201 = vadd.xlane.f32.xlu0 %v200_v42 }
  0xe4   :  { %204 = vadd.xlane.f32.xlu1 %v203_v44 }
  0xe6   :  { %232 = vadd.xlane.f32.xlu0 %v231_v46  ;;  %v288_v46 = vrot.slane %v186_v39, %v7287_v34 }
  0xe8   :  { %235 = vadd.xlane.f32.xlu1 %v234_v47  ;;  %v7295_v47 = vsub.s32 1, %v7284_v23 }
 0x15b   :  { %v193_v52 = vpop.xlane.xlu0 %192 }
 0x15c   :  { %v208_v53 = vmul.f32 0.03125, %v193_v52 }
 0x15d   :  { %v224_v54 = vpop.xlane.xlu1 %223 }
 0x15e   :  { %v244_v55 = vmul.f32 %v208_v53, %v208_v53  ;;  %v238_v56 = vmul.f32 0.03125, %v224_v54  ;;  %v262_v42 = vsub.f32 %v7218_v15, %v208_v53 }
 0x15f   :  { %v190_v57 = vpop.xlane.xlu0 %189 }
 0x160   :  { %v250_v58 = vsub.f32 %v238_v56, %v244_v55  ;;  %v207_v59 = vmul.f32 0.03125, %v190_v57  ;;  %v298_v55 = vrot.slane %v186_v39, %v7295_v47 }
 0x161   :  { %v221_v60 = vpop.xlane.xlu1 %220 }
 0x162   :  { %v256_v61 = vmax.f32 %v250_v58, 0.0  ;;  %v243_v62 = vmul.f32 %v207_v59, %v207_v59  ;;  %v237_v63 = vmul.f32 0.03125, %v221_v60  ;;  %v261_v48 = vsub.f32 %v7220_v17, %v207_v59 }
 0x163   :  { %v196_v0 = vpop.xlane.xlu0 %195 }
 0x164   :  { %v268_v1 = vadd.f32 1e-06, %v256_v61  ;;  %v249_v2 = vsub.f32 %v237_v63, %v243_v62  ;;  %v209_v3 = vmul.f32 0.03125, %v196_v0 }
 0x165   :  { %v199_v4 = vpop.xlane.xlu1 %198 }
 0x166   :  { %6758 = vrsqrt.f32 %v268_v1  ;;  %v255_v5 = vmax.f32 %v249_v2, 0.0  ;;  %v210_v6 = vmul.f32 0.03125, %v199_v4  ;;  %v245_v9 = vmul.f32 %v209_v3, %v209_v3 }
 0x167   :  { %v227_v7 = vpop.xlane.xlu0 %226  ;;  %v263_v57 = vsub.f32 %v7235_v26, %v209_v3 }
 0x168   :  { %v267_v8 = vadd.f32 1e-06, %v255_v5  ;;  %v239_v10 = vmul.f32 0.03125, %v227_v7  ;;  %v246_v13 = vmul.f32 %v210_v6, %v210_v6  ;;  %v264_v62 = vsub.f32 %v7239_v29, %v210_v6 }
 0x169   :  { %v230_v11 = vpop.xlane.xlu1 %229 }
 0x16a   :  { %6760 = vrsqrt.f32 %v267_v8  ;;  %v251_v14 = vsub.f32 %v239_v10, %v245_v9  ;;  %v240_v16 = vmul.f32 0.03125, %v230_v11 }
 0x16b   :  { %v202_v18 = vpop.xlane.xlu0 %201 }
 0x16c   :  { %v257_v19 = vmax.f32 %v251_v14, 0.0  ;;  %v252_v20 = vsub.f32 %v240_v16, %v246_v13  ;;  %v211_v21 = vmul.f32 0.03125, %v202_v18  ;;  %v5532_v18 = vld [vmem:[%s8892_s5] ss:$0 sm:$0xff] }
 0x16d   :  { %v205_v22 = vpop.xlane.xlu1 %204 }
 0x16e   :  { %v269_v24 = vadd.f32 1e-06, %v257_v19  ;;  %v258_v25 = vmax.f32 %v252_v20, 0.0  ;;  %v212_v27 = vmul.f32 0.03125, %v205_v22  ;;  %v247_v31 = vmul.f32 %v211_v21, %v211_v21 }
 0x16f   :  { %v233_v28 = vpop.xlane.xlu0 %232  ;;  %v265_v5 = vsub.f32 %v7251_v36, %v211_v21 }
 0x170   :  { %6762 = vrsqrt.f32 %v269_v24  ;;  %v270_v30 = vadd.f32 1e-06, %v258_v25  ;;  %v241_v32 = vmul.f32 0.03125, %v233_v28  ;;  %v248_v35 = vmul.f32 %v212_v27, %v212_v27 }
 0x171   :  { %v236_v33 = vpop.xlane.xlu1 %235  ;;  %v266_v8 = vsub.f32 %v7259_v40, %v212_v27 }
 0x172   :  { %6764 = vrsqrt.f32 %v270_v30  ;;  %v253_v37 = vsub.f32 %v241_v32, %v247_v31  ;;  %v242_v38 = vmul.f32 0.03125, %v236_v33 }
 0x173   :  { %v6759_v41 = vpop.eup %6758 }
 0x174   :  { %v259_v43 = vmax.f32 %v253_v37, 0.0  ;;  %v254_v44 = vsub.f32 %v242_v38, %v248_v35  ;;  %v280_v45 = vmul.f32 %v6759_v41, %v262_v42 }
 0x176   :  { %v271_v49 = vadd.f32 1e-06, %v259_v43  ;;  %v260_v50 = vmax.f32 %v254_v44, 0.0  ;;  %v290_v56 = vmul.f32 %v288_v46, %v280_v45 }
 0x177   :  { %v6761_v51 = vpop.eup %6760 }
 0x178   :  { %6766 = vrsqrt.f32 %v271_v49  ;;  %v272_v52 = vadd.f32 1e-06, %v260_v50  ;;  %v279_v54 = vmul.f32 %v6761_v51, %v261_v48  ;;  %v300_v61 = vadd.f32 %v298_v55, %v290_v56  ;;  %v7383_v50 = vld [vmem:[%s8888_s1 + $0x8] sm:$0xff]  ;;  %v7394_v56 = vld [vmem:[%s8888_s1 + $0x18] sm:$0xff] }
 0x17a   :  { %6768 = vrsqrt.f32 %v272_v52  ;;  %v289_v53 = vmul.f32 %v288_v46, %v279_v54  ;;  %v7388_v52 = vld [vmem:[%s8888_s1] sm:$0xff] }
 0x17c   :  { %v299_v58 = vadd.f32 %v298_v55, %v289_v53 }
 0x17d   :  { %v6763_v60 = vpop.eup %6762 }
 0x17e   :  { %6166 = vmatprep.mubr.msk.f32.mxu1 %vm187_vm1, %v299_v58  ;;  %v281_v59 = vmul.f32 %v6763_v60, %v263_v57 }
 0x17f   :  { %v6765_v63 = vpop.eup %6764  ;;  %6167 = vmatmul.mubr.msk.f32.vlgmr.msra.gmra.mxu1 %vm187_vm1, %v300_v61 }
 0x180   :  { %v291_v0 = vmul.f32 %v288_v46, %v281_v59  ;;  %v282_v1 = vmul.f32 %v6765_v63, %v264_v62  ;;  %v7403_v59 = vld [vmem:[%s8888_s1 + $0x10] sm:$0xff]  ;;  %v7408_v63 = vld [vmem:[%s8888_s1 + $0x28] sm:$0xff] }
 0x182   :  { %v301_v2 = vadd.f32 %v298_v55, %v291_v0  ;;  %v292_v4 = vmul.f32 %v288_v46, %v282_v1 }
 0x184   :  { %6169 = vmatprep.mubr.msk.f32.mxu1 %vm187_vm1, %v301_v2  ;;  %v302_v3 = vadd.f32 %v298_v55, %v292_v4 }
 0x185   :  { %v6767_v7 = vpop.eup %6766 }
 0x186   :  { %6170 = vmatmul.mubr.msk.f32.gmra.mxu1 %vm187_vm1, %v302_v3  ;;  %v283_v6 = vmul.f32 %v6767_v7, %v265_v5  ;;  %v7416_v3 = vld [vmem:[%s8888_s1 + $0x20] sm:$0xff] }
 0x187   :  { %v6769_v9 = vpop.eup %6768 }
 0x188   :  { %v293_v10 = vmul.f32 %v288_v46, %v283_v6  ;;  %v284_v11 = vmul.f32 %v6769_v9, %v266_v8 }
 0x18a   :  { %v303_v12 = vadd.f32 %v298_v55, %v293_v10  ;;  %v294_v13 = vmul.f32 %v288_v46, %v284_v11 }
 0x18c   :  { %6172 = vmatprep.mubr.msk.f32.mxu1 %vm187_vm1, %v303_v12  ;;  %v304_v14 = vadd.f32 %v298_v55, %v294_v13 }
 0x18e   :  { %6173 = vmatmul.mubr.msk.f32.gmra.mxu1 %vm187_vm1, %v304_v14 }
 0x23f   :  { %v6168_v16 = vpop.f32.mrf.mxu1 }
 0x240   :  { %v7322_v30 = vadd.f32 %v6168_v16, %v5532_v18 }
 0x241   :  { %v400_v19 = vpop.f32.mrf.mxu1 }
 0x242   :  { %v7312_v20 = vadd.f32 %v5532_v18, %v400_v19 }
 0x244   :  { %6187 = vmatprep.mubr.msk.f32.mxu1 %vm447_vm2, %v7312_v20 }
 0x246   :  { %v6171_v21 = vpop.f32.mrf.mxu1 }
 0x247   :  { %v7326_v31 = vadd.f32 %v6171_v21, %v5532_v18 }
 0x248   :  { %v410_v22 = vpop.f32.mrf.mxu1 }
 0x249   :  { %v7332_v32 = vadd.f32 %v5532_v18, %v410_v22 }
 0x24e   :  { %v6174_v24 = vpop.f32.mrf.mxu1 }
 0x24f   :  { %v7316_v25 = vadd.f32 %v6174_v24, %v5532_v18 }
 0x250   :  { %v420_v27 = vpop.f32.mrf.mxu1 }
 0x251   :  { %v7318_v28 = vadd.f32 %v5532_v18, %v420_v27  ;;  %445 = vrot.lane.b32.xlu0 %v7316_v25, %s7080_s24 }
 0x253   :  { %443 = vrot.lane.b32.xlu1 %v7318_v28, %s7080_s24 }
 0x255   :  { %437 = vrot.lane.b32.xlu0 %v7322_v30, %s7080_s24 }
 0x257   :  { %441 = vrot.lane.b32.xlu1 %v7326_v31, %s7080_s24 }
 0x259   :  { %643 = vrot.lane.b32.xlu0 %v7316_v25, %s7081_s25 }
 0x25b   :  { %439 = vrot.lane.b32.xlu1 %v7332_v32, %s7080_s24 }
 0x25d   :  { %639 = vrot.lane.b32.xlu0 %v7326_v31, %s7081_s25 }
 0x25f   :  { %435 = vrot.lane.b32.xlu1 %v7312_v20, %s7080_s24 }
 0x261   :  { %787 = vrot.lane.b32.xlu0 %v7316_v25, %s7082_s26 }
 0x263   :  { %637 = vrot.lane.b32.xlu1 %v7332_v32, %s7081_s25 }
 0x267   :  { %635 = vrot.lane.b32.xlu1 %v7322_v30, %s7081_s25 }
 0x26b   :  { %633 = vrot.lane.b32.xlu1 %v7312_v20, %s7081_s25 }
 0x26f   :  { %641 = vrot.lane.b32.xlu1 %v7318_v28, %s7081_s25 }
 0x273   :  { %785 = vrot.lane.b32.xlu1 %v7318_v28, %s7082_s26 }
 0x2c3   :  { %v446_v33 = vpop.permute.xlu0 %445 }
 0x2c4   :  { %6175 = vmatprep.subr.msk.mxu1 %vm447_vm2, %v446_v33 }
 0x2c5   :  { %6176 = vmatpush3.xpose.msk.msra.mxu1 %vm447_vm2, %v446_v33  ;;  %v444_v35 = vpop.permute.xlu1 %443 }
 0x2c6   :  { %6177 = vmatprep.subr.msk.mxu1 %vm447_vm2, %v444_v35 }
 0x2c7   :  { %v438_v37 = vpop.permute.xlu0 %437 }
 0x2c9   :  { %6178 = vmatpush3.xpose.msk.msra.mxu1 %vm447_vm2, %v444_v35  ;;  %v442_v38 = vpop.permute.xlu1 %441 }
 0x2ca   :  { %6179 = vmatprep.subr.msk.mxu1 %vm447_vm2, %v442_v38 }
 0x2cb   :  { %v644_v39 = vpop.permute.xlu0 %643 }
 0x2cc   :  { %6196 = vmatprep.subr.mxu0 %v644_v39 }
 0x2cd   :  { %6180 = vmatpush3.xpose.msk.msra.mxu1 %vm447_vm2, %v442_v38  ;;  %6197 = vmatpush3.msra.mxu0 %v644_v39  ;;  %v440_v41 = vpop.permute.xlu1 %439 }
 0x2ce   :  { %6181 = vmatprep.subr.msk.mxu1 %vm447_vm2, %v440_v41 }
 0x2cf   :  { %v640_v48 = vpop.permute.xlu0 %639 }
 0x2d1   :  { %6182 = vmatpush3.xpose.msk.msra.mxu1 %vm447_vm2, %v440_v41  ;;  %v436_v42 = vpop.permute.xlu1 %435 }
 0x2d2   :  { %6183 = vmatprep.subr.msk.mxu1 %vm447_vm2, %v438_v37 }
 0x2d3   :  { %v7376_v49 = vpop.permute.xlu0 %787 }
 0x2d5   :  { %6184 = vmatpush3.xpose.msk.msra.mxu1 %vm447_vm2, %v438_v37  ;;  %v638_v43 = vpop.permute.xlu1 %637 }
 0x2d6   :  { %6185 = vmatprep.subr.msk.mxu1 %vm447_vm2, %v436_v42 }
 0x2d9   :  { %6186 = vmatpush3.xpose.msk.msra.mxu1 %vm447_vm2, %v436_v42  ;;  %v636_v44 = vpop.permute.xlu1 %635 }
 0x2dc   :  { %6188 = vmatmul.mubr.msk.f32.vlgmr.msra.gmra.mxu1 %vm447_vm2, %v7322_v30 }
 0x2dd   :  { %6190 = vmatprep.mubr.msk.f32.mxu1 %vm447_vm2, %v7332_v32  ;;  %v634_v45 = vpop.permute.xlu1 %633 }
 0x2e0   :  { %6191 = vmatmul.mubr.msk.f32.gmra.mxu1 %vm447_vm2, %v7326_v31 }
 0x2e1   :  { %6193 = vmatprep.mubr.msk.f32.mxu1 %vm447_vm2, %v7318_v28  ;;  %v642_v46 = vpop.permute.xlu1 %641 }
 0x2e2   :  { %6198 = vmatprep.subr.mxu0 %v642_v46 }
 0x2e3   :  { %6199 = vmatpush3.msra.mxu0 %v642_v46 }
 0x2e4   :  { %6194 = vmatmul.mubr.msk.f32.gmra.mxu1 %vm447_vm2, %v7316_v25  ;;  %6200 = vmatprep.subr.mxu0 %v640_v48 }
 0x2e5   :  { %6201 = vmatpush3.msra.mxu0 %v640_v48  ;;  %v7426_v10 = vpop.permute.xlu1 %785 }
 0x2e6   :  { %6202 = vmatprep.subr.mxu0 %v638_v43 }
 0x2e7   :  { %6203 = vmatpush3.msra.mxu0 %v638_v43 }
 0x2e8   :  { %6204 = vmatprep.subr.mxu0 %v636_v44 }
 0x2e9   :  { %6205 = vmatpush3.msra.mxu0 %v636_v44 }
 0x2ea   :  { %6206 = vmatprep.subr.mxu0 %v634_v45 }
 0x2eb   :  { %6207 = vmatpush3.msra.mxu0 %v634_v45 }
 0x2ec   :  { %6217 = vmatprep.subr.msk.mxu0 %vm447_vm2, %v7376_v49 }
 0x39c   :  { %v6189_v51 = vpop.f32.mrf.mxu1 }
 0x39d   :  { %v544_v54 = vadd.f32 %v6189_v51, %v7383_v50 }
 0x39e   :  { %v538_v55 = vpop.f32.mrf.mxu1 }
 0x39f   :  { %v539_v53 = vadd.f32 %v538_v55, %v7388_v52  ;;  %v570_v57 = vsel %vm72_vm0, %v544_v54, -inf }
 0x3a0   :  { %v6192_v58 = vpop.f32.mrf.mxu1  ;;  %571 = vmax.xlane.f32.xlu1 %v570_v57 }
 0x3a1   :  { %v554_v60 = vadd.f32 %v6192_v58, %v7394_v56  ;;  %v567_v61 = vsel %vm72_vm0, %v539_v53, -inf }
 0x3a2   :  { %v548_v62 = vpop.f32.mrf.mxu1  ;;  %568 = vmax.xlane.f32.xlu0 %v567_v61 }
 0x3a3   :  { %v549_v1 = vadd.f32 %v548_v62, %v7403_v59  ;;  %v576_v4 = vsel %vm72_vm0, %v554_v60, -inf }
 0x3a4   :  { %v6195_v0 = vpop.f32.mrf.mxu1 }
 0x3a5   :  { %v564_v2 = vadd.f32 %v6195_v0, %v7408_v63  ;;  %v573_v6 = vsel %vm72_vm0, %v549_v1, -inf }
 0x3a6   :  { %v558_v5 = vpop.f32.mrf.mxu1  ;;  %577 = vmax.xlane.f32.xlu0 %v576_v4 }
 0x3a7   :  { %v582_v7 = vsel %vm72_vm0, %v564_v2, -inf  ;;  %v559_v8 = vadd.f32 %v558_v5, %v7416_v3 }
 0x3a8   :  { %583 = vmax.xlane.f32.xlu1 %v582_v7 }
 0x3a9   :  { %v579_v9 = vsel %vm72_vm0, %v559_v8, -inf }
 0x3aa   :  { %574 = vmax.xlane.f32.xlu0 %v573_v6 }
 0x3ae   :  { %580 = vmax.xlane.f32.xlu0 %v579_v9 }
 0x3b9   :  { %781 = vrot.lane.b32.xlu1 %v7332_v32, %s7082_s26 }
 0x3c4   :  { %783 = vrot.lane.b32.xlu0 %v7326_v31, %s7082_s26 }
 0x429   :  { %v572_v11 = vpop.xlane.xlu1 %571 }
 0x42a   :  { %v586_v12 = vsub.f32 %v544_v54, %v572_v11 }
 0x42b   :  { %v569_v13 = vpop.xlane.xlu0 %568 }
 0x42c   :  { %v593_v14 = vmul.f32 1.442695, %v586_v12  ;;  %v585_v16 = vsub.f32 %v539_v53, %v569_v13 }
 0x42e   :  { %6770 = vpow2.f32 %v593_v14  ;;  %v591_v18 = vmul.f32 1.442695, %v585_v16 }
 0x42f   :  { %v578_v19 = vpop.xlane.xlu0 %577 }
 0x430   :  { %6772 = vpow2.f32 %v591_v18  ;;  %v588_v21 = vsub.f32 %v554_v60, %v578_v19 }
 0x431   :  { %v584_v48 = vpop.xlane.xlu1 %583 }
 0x432   :  { %v597_v22 = vmul.f32 1.442695, %v588_v21  ;;  %v590_v51 = vsub.f32 %v564_v2, %v584_v48 }
 0x433   :  { %v575_v24 = vpop.xlane.xlu0 %574 }
 0x434   :  { %6774 = vpow2.f32 %v597_v22  ;;  %v587_v27 = vsub.f32 %v549_v1, %v575_v24  ;;  %v601_v55 = vmul.f32 1.442695, %v590_v51 }
 0x435   :  { %v782_v61 = vpop.permute.xlu1 %781 }
 0x436   :  { %v595_v33 = vmul.f32 1.442695, %v587_v27 }
 0x437   :  { %v581_v45 = vpop.xlane.xlu0 %580 }
 0x438   :  { %6776 = vpow2.f32 %v595_v33  ;;  %v589_v46 = vsub.f32 %v559_v8, %v581_v45 }
 0x43a   :  { %v599_v54 = vmul.f32 1.442695, %v589_v46 }
 0x43b   :  { %v6771_v35 = vpop.eup %6770  ;;  %v784_v62 = vpop.permute.xlu0 %783 }
 0x43c   :  { %v606_v37 = vsel %vm72_vm0, %v6771_v35, 0.0  ;;  %6778 = vpow2.f32 %v599_v54 }
 0x43d   :  { %v6773_v38 = vpop.eup %6772  ;;  %607 = vadd.xlane.f32.xlu1 %v606_v37  ;;  %6780 = vpow2.f32 %v601_v55  ;;  %v764_v37 = vld [vmem:[%s8893_s6] sm:$0xff] }
 0x43e   :  { %v603_v39 = vsel %vm72_vm0, %v6773_v38, 0.0 }
 0x43f   :  { %604 = vadd.xlane.f32.xlu0 %v603_v39 }
 0x441   :  { %v6775_v41 = vpop.eup %6774 }
 0x442   :  { %v612_v42 = vsel %vm72_vm0, %v6775_v41, 0.0 }
 0x443   :  { %613 = vadd.xlane.f32.xlu1 %v612_v42 }
 0x445   :  { %v6777_v43 = vpop.eup %6776 }
 0x446   :  { %v609_v44 = vsel %vm72_vm0, %v6777_v43, 0.0 }
 0x447   :  { %610 = vadd.xlane.f32.xlu0 %v609_v44 }
 0x449   :  { %v6779_v53 = vpop.eup %6778 }
 0x44a   :  { %v615_v57 = vsel %vm72_vm0, %v6779_v53, 0.0  ;;  %v6781_v58 = vpop.eup %6780 }
 0x44b   :  { %v618_v60 = vsel %vm72_vm0, %v6781_v58, 0.0 }
 0x454   :  { %777 = vrot.lane.b32.xlu1 %v7312_v20, %s7082_s26 }
 0x45d   :  { %779 = vrot.lane.b32.xlu0 %v7322_v30, %s7082_s26 }
 0x478   :  { %616 = vadd.xlane.f32.xlu1 %v615_v57 }
 0x47c   :  { %619 = vadd.xlane.f32.xlu0 %v618_v60 }
 0x489   :  { %767 = vrot.lane.b32.xlu1 %v7322_v30, %s7083_s21 }
 0x48d   :  { %771 = vrot.lane.b32.xlu1 %v7326_v31, %s7083_s21 }
 0x491   :  { %775 = vrot.lane.b32.xlu1 %v7316_v25, %s7083_s21 }
 0x492   :  { %765 = vrot.lane.b32.xlu0 %v7312_v20, %s7083_s21 }
 0x496   :  { %769 = vrot.lane.b32.xlu0 %v7332_v32, %s7083_s21 }
 0x49a   :  { %773 = vrot.lane.b32.xlu0 %v7318_v28, %s7083_s21 }
 0x4c6   :  { %v608_v0 = vpop.xlane.xlu1 %607 }
 0x4c7   :  { %6782 = vrcp.f32 %v608_v0 }
 0x4c8   :  { %v605_v1 = vpop.xlane.xlu0 %604 }
 0x4c9   :  { %6784 = vrcp.f32 %v605_v1 }
 0x4cc   :  { %v614_v2 = vpop.xlane.xlu1 %613 }
 0x4cd   :  { %6786 = vrcp.f32 %v614_v2 }
 0x4d0   :  { %v611_v4 = vpop.xlane.xlu0 %610  ;;  %v778_v14 = vpop.permute.xlu1 %777 }
 0x4d1   :  { %6788 = vrcp.f32 %v611_v4 }
 0x4d4   :  { %v6783_v5 = vpop.eup %6782 }
 0x4d5   :  { %v628_v6 = vmul.f32 %v6783_v5, %v6771_v35 }
 0x4d6   :  { %v6785_v7 = vpop.eup %6784 }
 0x4d7   :  { %v627_v8 = vmul.f32 %v6785_v7, %v6773_v38 }
 0x4d9   :  { %6208 = vmatprep.mubr.msk.f32.mxu0 %vm72_vm0, %v627_v8 }
 0x4da   :  { %6209 = vmatmul.mubr.msk.f32.vlgmr.msra.gmra.mxu0 %vm72_vm0, %v628_v6  ;;  %v6787_v9 = vpop.eup %6786 }
 0x4db   :  { %6218 = vmatpush3.xpose.msk.msra.mxu0 %vm447_vm2, %v7376_v49  ;;  %v630_v13 = vmul.f32 %v6787_v9, %v6775_v41  ;;  %v780_v49 = vpop.permute.xlu0 %779 }
 0x4dc   :  { %6219 = vmatprep.subr.msk.mxu0 %vm447_vm2, %v7426_v10 }
 0x4de   :  { %v6789_v11 = vpop.eup %6788 }
 0x4df   :  { %6220 = vmatpush3.xpose.msk.msra.mxu0 %vm447_vm2, %v7426_v10  ;;  %v629_v12 = vmul.f32 %v6789_v11, %v6777_v43 }
 0x4e0   :  { %6221 = vmatprep.subr.msk.mxu0 %vm447_vm2, %v784_v62 }
 0x4e1   :  { %6211 = vmatprep.mubr.msk.f32.mxu0 %vm72_vm0, %v629_v12 }
 0x4e2   :  { %6212 = vmatmul.mubr.msk.f32.gmra.mxu0 %vm72_vm0, %v630_v13 }
 0x4e3   :  { %6222 = vmatpush3.xpose.msk.msra.mxu0 %vm447_vm2, %v784_v62 }
 0x4e4   :  { %6223 = vmatprep.subr.msk.mxu0 %vm447_vm2, %v782_v61 }
 0x4e7   :  { %6224 = vmatpush3.xpose.msk.msra.mxu0 %vm447_vm2, %v782_v61 }
 0x4e8   :  { %6225 = vmatprep.subr.msk.mxu0 %vm447_vm2, %v780_v49 }
 0x4eb   :  { %6226 = vmatpush3.xpose.msk.msra.mxu0 %vm447_vm2, %v780_v49 }
 0x4ec   :  { %6227 = vmatprep.subr.msk.mxu0 %vm447_vm2, %v778_v14 }
 0x4ef   :  { %6228 = vmatpush3.xpose.msk.msra.mxu0 %vm447_vm2, %v778_v14 }
 0x4f0   :  { %6270 = vmatprep.subr.mxu0 %v764_v37 }
 0x501   :  { %v617_v10 = vpop.xlane.xlu1 %616 }
 0x502   :  { %6790 = vrcp.f32 %v617_v10 }
 0x505   :  { %v620_v16 = vpop.xlane.xlu0 %619  ;;  %v768_v27 = vpop.permute.xlu1 %767 }
 0x506   :  { %6792 = vrcp.f32 %v620_v16 }
 0x509   :  { %v766_v21 = vpop.permute.xlu0 %765  ;;  %v772_v35 = vpop.permute.xlu1 %771 }
 0x50d   :  { %v770_v33 = vpop.permute.xlu0 %769  ;;  %v776_v39 = vpop.permute.xlu1 %775 }
 0x50f   :  { %v6791_v18 = vpop.eup %6790 }
 0x510   :  { %v631_v19 = vmul.f32 %v6791_v18, %v6779_v53 }
 0x511   :  { %v774_v38 = vpop.permute.xlu0 %773 }
 0x512   :  { %6214 = vmatprep.mubr.msk.f32.mxu0 %vm72_vm0, %v631_v19 }
 0x513   :  { %v6793_v22 = vpop.eup %6792 }
 0x514   :  { %v632_v24 = vmul.f32 %v6793_v22, %v6781_v58 }
 0x516   :  { %6215 = vmatmul.mubr.msk.f32.gmra.mxu0 %vm72_vm0, %v632_v24 }
 0x517   :  { %6229 = vmatprep.mubr.msk.f32.mxu0 %vm447_vm2, %v766_v21 }
 0x51a   :  { %6230 = vmatmul.mubr.msk.f32.vlgmr.msra.gmra.mxu0 %vm447_vm2, %v768_v27 }
 0x51b   :  { %6232 = vmatprep.mubr.msk.f32.mxu0 %vm447_vm2, %v770_v33  ;;  %6271 = vmatpush3.msra.mxu0 %v764_v37 }
 0x51e   :  { %6233 = vmatmul.mubr.msk.f32.gmra.mxu0 %vm447_vm2, %v772_v35 }
 0x51f   :  { %6235 = vmatprep.mubr.msk.f32.mxu0 %vm447_vm2, %v774_v38 }
 0x522   :  { %6236 = vmatmul.mubr.msk.f32.gmra.mxu0 %vm447_vm2, %v776_v39 }
 0x59a   :  { %v6210_v41 = vpop.f32.mrf.mxu0 }
 0x59c   :  { %v735_v42 = vpop.f32.mrf.mxu0 }
 0x59d   :  { %6272 = vmatprep.mubr.msk.f32.mxu0 %vm447_vm2, %v735_v42 }
 0x59e   :  { %6273 = vmatmul.mubr.msk.f32.vlgmr.msra.gmra.mxu0 %vm447_vm2, %v6210_v41 }
 0x5a2   :  { %v6213_v43 = vpop.f32.mrf.mxu0 }
 0x5a4   :  { %v745_v44 = vpop.f32.mrf.mxu0 }
 0x5a5   :  { %6275 = vmatprep.mubr.msk.f32.mxu0 %vm447_vm2, %v745_v44 }
 0x5a6   :  { %6276 = vmatmul.mubr.msk.f32.gmra.mxu0 %vm447_vm2, %v6213_v43 }
 0x5d6   :  { %v6216_v45 = vpop.f32.mrf.mxu0 }
 0x5d8   :  { %v755_v46 = vpop.f32.mrf.mxu0 }
 0x5d9   :  { %6278 = vmatprep.mubr.msk.f32.mxu0 %vm447_vm2, %v755_v46 }
 0x5da   :  { %v6231_v48 = vpop.f32.mrf.mxu0  ;;  %6279 = vmatmul.mubr.msk.f32.gmra.mxu0 %vm447_vm2, %v6216_v45 }
 0x5db   :  { %v885_v51 = vadd.f32 %v6231_v48, %v7383_v50 }
 0x5dc   :  { %v879_v54 = vpop.f32.mrf.mxu0 }
 0x5dd   :  { %v880_v55 = vadd.f32 %v879_v54, %v7388_v52  ;;  %v911_v53 = vsel %vm72_vm0, %v885_v51, -inf }
 0x5de   :  { %912 = vmax.xlane.f32.xlu1 %v911_v53  ;;  %v6234_v57 = vpop.f32.mrf.mxu0 }
 0x5df   :  { %v895_v58 = vadd.f32 %v6234_v57, %v7394_v56  ;;  %v908_v60 = vsel %vm72_vm0, %v880_v55, -inf }
 0x5e0   :  { %909 = vmax.xlane.f32.xlu0 %v908_v60  ;;  %v889_v61 = vpop.f32.mrf.mxu0 }
 0x5e1   :  { %v890_v0 = vadd.f32 %v889_v61, %v7403_v59  ;;  %v917_v2 = vsel %vm72_vm0, %v895_v58, -inf }
 0x5e2   :  { %v6237_v62 = vpop.f32.mrf.mxu0 }
 0x5e3   :  { %v905_v1 = vadd.f32 %v6237_v62, %v7408_v63  ;;  %v914_v8 = vsel %vm72_vm0, %v890_v0, -inf }
 0x5e4   :  { %918 = vmax.xlane.f32.xlu0 %v917_v2  ;;  %v899_v4 = vpop.f32.mrf.mxu0 }
 0x5e5   :  { %v923_v5 = vsel %vm72_vm0, %v905_v1, -inf  ;;  %v900_v7 = vadd.f32 %v899_v4, %v7416_v3 }
 0x5e6   :  { %924 = vmax.xlane.f32.xlu1 %v923_v5 }
 0x5e7   :  { %v920_v6 = vsel %vm72_vm0, %v900_v7, -inf }
 0x5e8   :  { %915 = vmax.xlane.f32.xlu0 %v914_v8 }
 0x5ec   :  { %921 = vmax.xlane.f32.xlu0 %v920_v6 }
 0x602   :  { %984 = vrot.lane.b32.xlu0 %v7316_v25, %s7084_s0 }
 0x667   :  { %v913_v9 = vpop.xlane.xlu1 %912 }
 0x668   :  { %v927_v11 = vsub.f32 %v885_v51, %v913_v9  ;;  %v5575_v9 = vld [vmem:[%s8893_s6 + $0x8] sm:$0xff] }
 0x669   :  { %v910_v12 = vpop.xlane.xlu0 %909 }
 0x66a   :  { %v934_v13 = vmul.f32 1.442695, %v927_v11  ;;  %v926_v49 = vsub.f32 %v880_v55, %v910_v12 }
 0x66c   :  { %6794 = vpow2.f32 %v934_v13  ;;  %v932_v14 = vmul.f32 1.442695, %v926_v49 }
 0x66d   :  { %v919_v10 = vpop.xlane.xlu0 %918 }
 0x66e   :  { %6796 = vpow2.f32 %v932_v14  ;;  %v929_v39 = vsub.f32 %v895_v58, %v919_v10 }
 0x66f   :  { %v925_v43 = vpop.xlane.xlu1 %924 }
 0x670   :  { %v938_v41 = vmul.f32 1.442695, %v929_v39  ;;  %v931_v44 = vsub.f32 %v905_v1, %v925_v43 }
 0x671   :  { %v916_v16 = vpop.xlane.xlu0 %915 }
 0x672   :  { %v928_v18 = vsub.f32 %v890_v0, %v916_v16  ;;  %v942_v46 = vmul.f32 1.442695, %v931_v44 }
 0x674   :  { %v936_v19 = vmul.f32 1.442695, %v928_v18 }
 0x675   :  { %v922_v21 = vpop.xlane.xlu0 %921 }
 0x676   :  { %6798 = vpow2.f32 %v936_v19  ;;  %v930_v42 = vsub.f32 %v900_v7, %v922_v21 }
 0x677   :  { %6800 = vpow2.f32 %v938_v41 }
 0x678   :  { %v940_v45 = vmul.f32 1.442695, %v930_v42 }
 0x679   :  { %v7499_v22 = vpop.eup %6794  ;;  %v985_v24 = vpop.permute.xlu0 %984 }
 0x67a   :  { %6238 = vmatprep.subr.mxu1 %v985_v24  ;;  %v947_v27 = vsel %vm72_vm0, %v7499_v22, 0.0  ;;  %6802 = vpow2.f32 %v940_v45 }
 0x67b   :  { %v7503_v33 = vpop.eup %6796  ;;  %6239 = vmatpush3.msra.mxu1 %v985_v24  ;;  %948 = vadd.xlane.f32.xlu1 %v947_v27  ;;  %6804 = vpow2.f32 %v942_v46 }
 0x67c   :  { %v944_v35 = vsel %vm72_vm0, %v7503_v33, 0.0 }
 0x67d   :  { %945 = vadd.xlane.f32.xlu0 %v944_v35 }
 0x683   :  { %v7507_v37 = vpop.eup %6798 }
 0x684   :  { %v950_v38 = vsel %vm72_vm0, %v7507_v37, 0.0  ;;  %v7523_v48 = vpop.eup %6800 }
 0x685   :  { %951 = vadd.xlane.f32.xlu0 %v950_v38  ;;  %v953_v51 = vsel %vm72_vm0, %v7523_v48, 0.0 }
 0x687   :  { %v7529_v54 = vpop.eup %6802 }
 0x688   :  { %v956_v55 = vsel %vm72_vm0, %v7529_v54, 0.0  ;;  %v7535_v53 = vpop.eup %6804 }
 0x689   :  { %v959_v57 = vsel %vm72_vm0, %v7535_v53, 0.0 }
 0x68c   :  { %982 = vrot.lane.b32.xlu1 %v7318_v28, %s7084_s0 }
 0x69b   :  { %980 = vrot.lane.b32.xlu0 %v7326_v31, %s7084_s0 }
 0x69f   :  { %978 = vrot.lane.b32.xlu0 %v7332_v32, %s7084_s0 }
 0x6a3   :  { %976 = vrot.lane.b32.xlu0 %v7322_v30, %s7084_s0 }
 0x6a7   :  { %974 = vrot.lane.b32.xlu0 %v7312_v20, %s7084_s0 }
 0x6ab   :  { %1355 = vrot.lane.b32.xlu0 %v7316_v25, %s7085_s27 }
 0x6af   :  { %1353 = vrot.lane.b32.xlu0 %v7318_v28, %s7085_s27 }
 0x6b0   :  { %954 = vadd.xlane.f32.xlu1 %v953_v51 }
 0x6b3   :  { %1351 = vrot.lane.b32.xlu0 %v7326_v31, %s7085_s27 }
 0x6b4   :  { %957 = vadd.xlane.f32.xlu1 %v956_v55 }
 0x6b7   :  { %1349 = vrot.lane.b32.xlu0 %v7332_v32, %s7085_s27 }
 0x6b8   :  { %960 = vadd.xlane.f32.xlu1 %v959_v57 }
 0x6bb   :  { %1347 = vrot.lane.b32.xlu0 %v7322_v30, %s7085_s27 }
 0x6bf   :  { %1333 = vrot.lane.b32.xlu0 %v7312_v20, %s7086_s28 }
 0x6c3   :  { %1335 = vrot.lane.b32.xlu0 %v7322_v30, %s7086_s28 }
 0x6c7   :  { %1337 = vrot.lane.b32.xlu0 %v7332_v32, %s7086_s28 }
 0x6c9   :  { %1345 = vrot.lane.b32.xlu1 %v7312_v20, %s7085_s27 }
 0x6cb   :  { %1339 = vrot.lane.b32.xlu0 %v7326_v31, %s7086_s28 }
 0x6cd   :  { %1343 = vrot.lane.b32.xlu1 %v7316_v25, %s7086_s28 }
 0x6cf   :  { %1341 = vrot.lane.b32.xlu0 %v7318_v28, %s7086_s28 }
 0x6d1   :  { %1814 = vrot.lane.b32.xlu1 %v7318_v28, %s7087_s29 }
 0x6d3   :  { %1816 = vrot.lane.b32.xlu0 %v7316_v25, %s7087_s29 }
 0x6d5   :  { %1810 = vrot.lane.b32.xlu1 %v7332_v32, %s7087_s29 }
 0x6d7   :  { %1812 = vrot.lane.b32.xlu0 %v7326_v31, %s7087_s29 }
 0x6d9   :  { %1806 = vrot.lane.b32.xlu1 %v7312_v20, %s7087_s29 }
 0x6db   :  { %1808 = vrot.lane.b32.xlu0 %v7322_v30, %s7087_s29 }
 0x6dd   :  { %1796 = vrot.lane.b32.xlu1 %v7322_v30, %s7088_s30 }
 0x6df   :  { %1794 = vrot.lane.b32.xlu0 %v7312_v20, %s7088_s30 }
 0x6e1   :  { %1800 = vrot.lane.b32.xlu1 %v7326_v31, %s7088_s30 }
 0x6e3   :  { %1798 = vrot.lane.b32.xlu0 %v7332_v32, %s7088_s30 }
 0x6e5   :  { %1804 = vrot.lane.b32.xlu1 %v7316_v25, %s7088_s30 }
 0x6e7   :  { %1802 = vrot.lane.b32.xlu0 %v7318_v28, %s7088_s30 }
 0x704   :  { %v949_v58 = vpop.xlane.xlu1 %948 }
 0x706   :  { %v946_v60 = vpop.xlane.xlu0 %945 }
 0x707   :  { %6806 = vrcp.f32 %v946_v60 }
 0x708   :  { %v983_v61 = vpop.permute.xlu1 %982  ;;  %6808 = vrcp.f32 %v949_v58 }
 0x709   :  { %6240 = vmatprep.subr.mxu1 %v983_v61 }
 0x70a   :  { %6241 = vmatpush3.msra.mxu1 %v983_v61 }
 0x70e   :  { %v952_v62 = vpop.xlane.xlu0 %951 }
 0x70f   :  { %6810 = vrcp.f32 %v952_v62 }
 0x712   :  { %v981_v0 = vpop.permute.xlu0 %980 }
 0x713   :  { %6242 = vmatprep.subr.mxu1 %v981_v0 }
 0x714   :  { %v6807_v1 = vpop.eup %6806  ;;  %6243 = vmatpush3.msra.mxu1 %v981_v0 }
 0x715   :  { %v968_v2 = vmul.f32 %v6807_v1, %v7503_v33  ;;  %v6809_v7 = vpop.eup %6808 }
 0x716   :  { %v979_v4 = vpop.permute.xlu0 %978  ;;  %v969_v11 = vmul.f32 %v6809_v7, %v7499_v22 }
 0x717   :  { %6244 = vmatprep.subr.mxu1 %v979_v4  ;;  %6250 = vmatprep.mubr.msk.f32.mxu1 %vm72_vm0, %v968_v2 }
 0x718   :  { %6245 = vmatpush3.msra.mxu1 %v979_v4 }
 0x71a   :  { %v977_v5 = vpop.permute.xlu0 %976 }
 0x71b   :  { %6246 = vmatprep.subr.mxu1 %v977_v5 }
 0x71c   :  { %6247 = vmatpush3.msra.mxu1 %v977_v5  ;;  %v6811_v8 = vpop.eup %6810 }
 0x71d   :  { %v970_v12 = vmul.f32 %v6811_v8, %v7507_v37 }
 0x71e   :  { %v975_v6 = vpop.permute.xlu0 %974 }
 0x71f   :  { %6248 = vmatprep.subr.mxu1 %v975_v6 }
 0x720   :  { %6249 = vmatpush3.msra.mxu1 %v975_v6 }
 0x721   :  { %6251 = vmatmul.mubr.msk.f32.vlgmr.msra.gmra.mxu1 %vm72_vm0, %v969_v11  ;;  %6259 = vmatprep.subr.mxu1 %v5575_v9 }
 0x722   :  { %v1356_v13 = vpop.permute.xlu0 %1355  ;;  %6253 = vmatprep.mubr.msk.f32.mxu1 %vm72_vm0, %v970_v12  ;;  %6260 = vmatpush3.msra.mxu1 %v5575_v9 }
 0x723   :  { %6281 = vmatprep.subr.msk.mxu1 %vm447_vm2, %v1356_v13 }
 0x726   :  { %v1354_v27 = vpop.permute.xlu0 %1353 }
 0x72a   :  { %v1352_v33 = vpop.permute.xlu0 %1351 }
 0x72e   :  { %v1350_v35 = vpop.permute.xlu0 %1349 }
 0x732   :  { %v1348_v37 = vpop.permute.xlu0 %1347 }
 0x736   :  { %v1334_v38 = vpop.permute.xlu0 %1333 }
 0x739   :  { %v955_v49 = vpop.xlane.xlu1 %954 }
 0x73a   :  { %6812 = vrcp.f32 %v955_v49  ;;  %v1336_v41 = vpop.permute.xlu0 %1335 }
 0x73d   :  { %v958_v14 = vpop.xlane.xlu1 %957 }
 0x73e   :  { %6814 = vrcp.f32 %v958_v14  ;;  %v1338_v43 = vpop.permute.xlu0 %1337 }
 0x741   :  { %v961_v10 = vpop.xlane.xlu1 %960 }
 0x742   :  { %6816 = vrcp.f32 %v961_v10  ;;  %v1340_v44 = vpop.permute.xlu0 %1339 }
 0x745   :  { %v1346_v46 = vpop.permute.xlu1 %1345 }
 0x746   :  { %v1342_v45 = vpop.permute.xlu0 %1341 }
 0x747   :  { %v6813_v16 = vpop.eup %6812 }
 0x748   :  { %v971_v18 = vmul.f32 %v6813_v16, %v7523_v48 }
 0x749   :  { %v1344_v57 = vpop.permute.xlu1 %1343 }
 0x74a   :  { %6254 = vmatmul.mubr.msk.f32.gmra.mxu1 %vm72_vm0, %v971_v18  ;;  %v1817_v48 = vpop.permute.xlu0 %1816 }
 0x74b   :  { %v6815_v19 = vpop.eup %6814 }
 0x74c   :  { %v972_v21 = vmul.f32 %v6815_v19, %v7529_v54 }
 0x74d   :  { %v1815_v60 = vpop.permute.xlu1 %1814 }
 0x74e   :  { %6256 = vmatprep.mubr.msk.f32.mxu1 %vm72_vm0, %v972_v21  ;;  %v1813_v58 = vpop.permute.xlu0 %1812 }
 0x74f   :  { %v6817_v22 = vpop.eup %6816 }
 0x750   :  { %v973_v24 = vmul.f32 %v6817_v22, %v7535_v53 }
 0x751   :  { %v1811_v62 = vpop.permute.xlu1 %1810 }
 0x752   :  { %6257 = vmatmul.mubr.msk.f32.gmra.mxu1 %vm72_vm0, %v973_v24  ;;  %v1809_v61 = vpop.permute.xlu0 %1808 }
 0x755   :  { %v1807_v1 = vpop.permute.xlu1 %1806 }
 0x756   :  { %v1795_v0 = vpop.permute.xlu0 %1794 }
 0x759   :  { %v1797_v2 = vpop.permute.xlu1 %1796 }
 0x75a   :  { %v1799_v4 = vpop.permute.xlu0 %1798 }
 0x75d   :  { %v1801_v5 = vpop.permute.xlu1 %1800 }
 0x75e   :  { %v1803_v7 = vpop.permute.xlu0 %1802 }
 0x761   :  { %v1805_v8 = vpop.permute.xlu1 %1804 }
 0x7e1   :  { %v6252_v39 = vpop.f32.mrf.mxu1 }
 0x7e3   :  { %v1076_v42 = vpop.f32.mrf.mxu1 }
 0x7e4   :  { %6261 = vmatprep.mubr.msk.f32.mxu1 %vm447_vm2, %v1076_v42 }
 0x7e5   :  { %6262 = vmatmul.mubr.msk.f32.vlgmr.msra.gmra.mxu1 %vm447_vm2, %v6252_v39 }
 0x7e6   :  { %6282 = vmatpush3.xpose.msk.msra.mxu1 %vm447_vm2, %v1356_v13 }
 0x7e7   :  { %6283 = vmatprep.subr.msk.mxu1 %vm447_vm2, %v1354_v27 }
 0x7ea   :  { %6284 = vmatpush3.xpose.msk.msra.mxu1 %vm447_vm2, %v1354_v27 }
 0x7eb   :  { %6285 = vmatprep.subr.msk.mxu1 %vm447_vm2, %v1352_v33 }
 0x7ee   :  { %6286 = vmatpush3.xpose.msk.msra.mxu1 %vm447_vm2, %v1352_v33 }
 0x7ef   :  { %6287 = vmatprep.subr.msk.mxu1 %vm447_vm2, %v1350_v35 }
 0x7f2   :  { %6288 = vmatpush3.xpose.msk.msra.mxu1 %vm447_vm2, %v1350_v35 }
 0x7f3   :  { %6289 = vmatprep.subr.msk.mxu1 %vm447_vm2, %v1348_v37 }
 0x7f6   :  { %6290 = vmatpush3.xpose.msk.msra.mxu1 %vm447_vm2, %v1348_v37 }
 0x7f7   :  { %6291 = vmatprep.subr.msk.mxu1 %vm447_vm2, %v1346_v46 }
 0x7fa   :  { %6292 = vmatpush3.xpose.msk.msra.mxu1 %vm447_vm2, %v1346_v46 }
 0x7fb   :  { %6334 = vmatprep.subr.msk.mxu1 %vm447_vm2, %v1817_v48 }
 0x80a   :  { %v6255_v51 = vpop.f32.mrf.mxu1 }
 0x80c   :  { %v1086_v54 = vpop.f32.mrf.mxu1 }
 0x80d   :  { %6264 = vmatprep.mubr.msk.f32.mxu1 %vm447_vm2, %v1086_v54 }
 0x80e   :  { %6265 = vmatmul.mubr.msk.f32.gmra.mxu1 %vm447_vm2, %v6255_v51 }
 0x812   :  { %v6258_v55 = vpop.f32.mrf.mxu1 }
 0x814   :  { %v1096_v53 = vpop.f32.mrf.mxu1 }
 0x815   :  { %6267 = vmatprep.mubr.msk.f32.mxu1 %vm447_vm2, %v1096_v53 }
 0x816   :  { %6268 = vmatmul.mubr.msk.f32.gmra.mxu1 %vm447_vm2, %v6258_v55 }
 0x817   :  { %6293 = vmatprep.mubr.msk.f32.mxu1 %vm447_vm2, %v1334_v38 }
 0x81a   :  { %6294 = vmatmul.mubr.msk.f32.vlgmr.msra.gmra.mxu1 %vm447_vm2, %v1336_v41 }
 0x81b   :  { %6335 = vmatpush3.xpose.msk.msra.mxu1 %vm447_vm2, %v1817_v48  ;;  %6296 = vmatprep.mubr.msk.f32.mxu1 %vm447_vm2, %v1338_v43 }
 0x81c   :  { %6336 = vmatprep.subr.msk.mxu1 %vm447_vm2, %v1815_v60 }
 0x81e   :  { %6297 = vmatmul.mubr.msk.f32.gmra.mxu1 %vm447_vm2, %v1340_v44 }
 0x81f   :  { %6337 = vmatpush3.xpose.msk.msra.mxu1 %vm447_vm2, %v1815_v60  ;;  %6299 = vmatprep.mubr.msk.f32.mxu1 %vm447_vm2, %v1342_v45 }
 0x820   :  { %6338 = vmatprep.subr.msk.mxu1 %vm447_vm2, %v1813_v58 }
 0x822   :  { %6300 = vmatmul.mubr.msk.f32.gmra.mxu1 %vm447_vm2, %v1344_v57 }
 0x823   :  { %6339 = vmatpush3.xpose.msk.msra.mxu1 %vm447_vm2, %v1813_v58  ;;  %6346 = vmatprep.mubr.msk.f32.mxu1 %vm447_vm2, %v1795_v0 }
 0x824   :  { %6340 = vmatprep.subr.msk.mxu1 %vm447_vm2, %v1811_v62 }
 0x827   :  { %6341 = vmatpush3.xpose.msk.msra.mxu1 %vm447_vm2, %v1811_v62 }
 0x828   :  { %6342 = vmatprep.subr.msk.mxu1 %vm447_vm2, %v1809_v61 }
 0x82b   :  { %6343 = vmatpush3.xpose.msk.msra.mxu1 %vm447_vm2, %v1809_v61 }
 0x82c   :  { %6344 = vmatprep.subr.msk.mxu1 %vm447_vm2, %v1807_v1 }
 0x82f   :  { %6345 = vmatpush3.xpose.msk.msra.mxu1 %vm447_vm2, %v1807_v1 }
 0x832   :  { %6347 = vmatmul.mubr.msk.f32.vlgmr.msra.gmra.mxu1 %vm447_vm2, %v1797_v2 }
 0x833   :  { %6349 = vmatprep.mubr.msk.f32.mxu1 %vm447_vm2, %v1799_v4 }
 0x836   :  { %6350 = vmatmul.mubr.msk.f32.gmra.mxu1 %vm447_vm2, %v1801_v5 }
 0x837   :  { %6352 = vmatprep.mubr.msk.f32.mxu1 %vm447_vm2, %v1803_v7 }
 0x83a   :  { %6353 = vmatmul.mubr.msk.f32.gmra.mxu1 %vm447_vm2, %v1805_v8 }
 0x8a5   :  { %v7638_v6 = vpop.f32.mrf.mxu1 }
 0x8a7   :  { %v7640_v9 = vpop.f32.mrf.mxu1 }
 0x8ce   :  { %v7642_v11 = vpop.f32.mrf.mxu1 }
 0x8d0   :  { %v7644_v12 = vpop.f32.mrf.mxu1 }
 0x8d6   :  { %v7646_v13 = vpop.f32.mrf.mxu1 }
 0x8d8   :  { %v7648_v49 = vpop.f32.mrf.mxu1 }
 0x8da   :  { %v6295_v14 = vpop.f32.mrf.mxu1 }
 0x8db   :  { %v1453_v10 = vadd.f32 %v6295_v14, %v7383_v50 }
 0x8dc   :  { %v1447_v16 = vpop.f32.mrf.mxu1 }
 0x8dd   :  { %v1448_v18 = vadd.f32 %v1447_v16, %v7388_v52  ;;  %v1479_v19 = vsel %vm72_vm0, %v1453_v10, -inf }
 0x8de   :  { %1480 = vmax.xlane.f32.xlu1 %v1479_v19  ;;  %v6298_v21 = vpop.f32.mrf.mxu1 }
 0x8df   :  { %v1476_v22 = vsel %vm72_vm0, %v1448_v18, -inf  ;;  %v1463_v35 = vadd.f32 %v6298_v21, %v7394_v56 }
 0x8e0   :  { %v1457_v24 = vpop.f32.mrf.mxu1  ;;  %1477 = vmax.xlane.f32.xlu0 %v1476_v22 }
 0x8e1   :  { %v1458_v27 = vadd.f32 %v1457_v24, %v7403_v59  ;;  %v1485_v42 = vsel %vm72_vm0, %v1463_v35, -inf }
 0x8e2   :  { %v6301_v33 = vpop.f32.mrf.mxu1 }
 0x8e3   :  { %v1482_v37 = vsel %vm72_vm0, %v1458_v27, -inf  ;;  %v1473_v41 = vadd.f32 %v6301_v33, %v7408_v63 }
 0x8e4   :  { %1483 = vmax.xlane.f32.xlu0 %v1482_v37  ;;  %v1467_v38 = vpop.f32.mrf.mxu1 }
 0x8e5   :  { %v1468_v39 = vadd.f32 %v1467_v38, %v7416_v3  ;;  %v1491_v44 = vsel %vm72_vm0, %v1473_v41, -inf }
 0x8e7   :  { %v1488_v43 = vsel %vm72_vm0, %v1468_v39, -inf }
 0x8e8   :  { %1486 = vmax.xlane.f32.xlu0 %v1485_v42  ;;  %1489 = vmax.xlane.f32.xlu1 %v1488_v43 }
 0x8ec   :  { %1492 = vmax.xlane.f32.xlu0 %v1491_v44 }
 0x8f2   :  { %v6348_v42 = vpop.f32.mrf.mxu1 }
 0x8f4   :  { %v1908_v43 = vpop.f32.mrf.mxu1 }
 0x8f6   :  { %v6351_v44 = vpop.f32.mrf.mxu1 }
 0x8f9   :  { %1552 = vrot.lane.b32.xlu1 %v7316_v25, %s7089_s16 }
 0x8fd   :  { %1548 = vrot.lane.b32.xlu1 %v7326_v31, %s7089_s16 }
 0x901   :  { %1546 = vrot.lane.b32.xlu1 %v7332_v32, %s7089_s16 }
 0x902   :  { %1550 = vrot.lane.b32.xlu0 %v7318_v28, %s7089_s16 }
 0x967   :  { %v1481_v45 = vpop.xlane.xlu1 %1480 }
 0x968   :  { %v1495_v46 = vsub.f32 %v1453_v10, %v1481_v45  ;;  %v1918_v45 = vpop.f32.mrf.mxu1 }
 0x969   :  { %v1478_v48 = vpop.xlane.xlu0 %1477 }
 0x96a   :  { %v1502_v51 = vmul.f32 1.442695, %v1495_v46  ;;  %v1494_v54 = vsub.f32 %v1448_v18, %v1478_v48  ;;  %v6354_v46 = vpop.f32.mrf.mxu1  ;;  %v7699_v48 = vadd.f32 %v6348_v42, %v7383_v50 }
 0x96c   :  { %6818 = vpow2.f32 %v1502_v51  ;;  %v1500_v55 = vmul.f32 1.442695, %v1494_v54  ;;  %v1928_v51 = vpop.f32.mrf.mxu1  ;;  %v7702_v54 = vadd.f32 %v1908_v43, %v7388_v52  ;;  %v7717_v52 = vadd.f32 %v6351_v44, %v7394_v56 }
 0x96d   :  { %v1484_v53 = vpop.xlane.xlu0 %1483 }
 0x96e   :  { %6820 = vpow2.f32 %v1500_v55  ;;  %v1496_v57 = vsub.f32 %v1458_v27, %v1484_v53  ;;  %v7705_v55 = vadd.f32 %v1928_v51, %v7416_v3  ;;  %v1940_v53 = vsel %vm72_vm0, %v7699_v48, -inf }
 0x970   :  { %v1504_v58 = vmul.f32 1.442695, %v1496_v57  ;;  %v7710_v57 = vadd.f32 %v1918_v45, %v7403_v59  ;;  %v1949_v50 = vsel %vm72_vm0, %v7705_v55, -inf  ;;  %v1946_v59 = vsel %vm72_vm0, %v7717_v52, -inf }
 0x971   :  { %v1487_v60 = vpop.xlane.xlu0 %1486  ;;  %v1490_v61 = vpop.xlane.xlu1 %1489 }
 0x972   :  { %6822 = vpow2.f32 %v1504_v58  ;;  %v1497_v62 = vsub.f32 %v1463_v35, %v1487_v60  ;;  %v1498_v0 = vsub.f32 %v1468_v39, %v1490_v61  ;;  %v1937_v58 = vsel %vm72_vm0, %v7702_v54, -inf }
 0x973   :  { %v1943_v3 = vsel %vm72_vm0, %v7710_v57, -inf  ;;  %v7722_v60 = vadd.f32 %v6354_v46, %v7408_v63 }
 0x974   :  { %v1506_v1 = vmul.f32 1.442695, %v1497_v62  ;;  %v1508_v2 = vmul.f32 1.442695, %v1498_v0 }
 0x975   :  { %v1493_v4 = vpop.xlane.xlu0 %1492  ;;  %v1553_v5 = vpop.permute.xlu1 %1552  ;;  %v1952_v61 = vsel %vm72_vm0, %v7722_v60, -inf }
 0x976   :  { %6824 = vpow2.f32 %v1506_v1  ;;  %v1499_v7 = vsub.f32 %v1473_v41, %v1493_v4  ;;  %6302 = vmatprep.subr.mxu0 %v1553_v5 }
 0x977   :  { %6826 = vpow2.f32 %v1508_v2  ;;  %6303 = vmatpush3.msra.mxu0 %v1553_v5 }
 0x978   :  { %v1510_v8 = vmul.f32 1.442695, %v1499_v7  ;;  %v5606_v7 = vld [vmem:[%s8893_s6 + $0x10] sm:$0xff] }
 0x979   :  { %v7670_v14 = vpop.eup %6818  ;;  %v1551_v10 = vpop.permute.xlu0 %1550 }
 0x97a   :  { %v1549_v16 = vpop.permute.xlu1 %1548  ;;  %6828 = vpow2.f32 %v1510_v8  ;;  %6304 = vmatprep.subr.mxu0 %v1551_v10  ;;  %v1515_v18 = vsel %vm72_vm0, %v7670_v14, 0.0 }
 0x97b   :  { %v7674_v19 = vpop.eup %6820  ;;  %1516 = vadd.xlane.f32.xlu0 %v1515_v18  ;;  %6305 = vmatpush3.msra.mxu0 %v1551_v10 }
 0x97c   :  { %6306 = vmatprep.subr.mxu0 %v1549_v16  ;;  %v1512_v21 = vsel %vm72_vm0, %v7674_v19, 0.0 }
 0x97d   :  { %1513 = vadd.xlane.f32.xlu1 %v1512_v21  ;;  %6307 = vmatpush3.msra.mxu0 %v1549_v16 }
 0x97e   :  { %v1547_v22 = vpop.permute.xlu1 %1546 }
 0x97f   :  { %6308 = vmatprep.subr.mxu0 %v1547_v22  ;;  %v7678_v24 = vpop.eup %6822 }
 0x980   :  { %6309 = vmatpush3.msra.mxu0 %v1547_v22  ;;  %v1518_v27 = vsel %vm72_vm0, %v7678_v24, 0.0 }
 0x981   :  { %1519 = vadd.xlane.f32.xlu1 %v1518_v27 }
 0x983   :  { %v7682_v33 = vpop.eup %6824 }
 0x984   :  { %v7684_v35 = vpop.eup %6826  ;;  %v1521_v37 = vsel %vm72_vm0, %v7682_v33, 0.0 }
 0x985   :  { %1522 = vadd.xlane.f32.xlu0 %v1521_v37  ;;  %v1524_v38 = vsel %vm72_vm0, %v7684_v35, 0.0 }
 0x986   :  { %1525 = vadd.xlane.f32.xlu1 %v1524_v38 }
 0x987   :  { %v7690_v39 = vpop.eup %6828 }
 0x988   :  { %v1527_v41 = vsel %vm72_vm0, %v7690_v39, 0.0 }
 0x989   :  { %1528 = vadd.xlane.f32.xlu0 %v1527_v41 }
 0x997   :  { %1542 = vrot.lane.b32.xlu1 %v7312_v20, %s7089_s16 }
 0x99f   :  { %1544 = vrot.lane.b32.xlu0 %v7322_v30, %s7089_s16 }
 0x9bb   :  { %1941 = vmax.xlane.f32.xlu1 %v1940_v53 }
 0x9be   :  { %1938 = vmax.xlane.f32.xlu0 %v1937_v58 }
 0x9bf   :  { %1950 = vmax.xlane.f32.xlu1 %v1949_v50 }
 0x9c2   :  { %1944 = vmax.xlane.f32.xlu0 %v1943_v3 }
 0x9c6   :  { %1947 = vmax.xlane.f32.xlu0 %v1946_v59 }
 0x9ca   :  { %1953 = vmax.xlane.f32.xlu0 %v1952_v61 }
 0x9d0   :  { %2013 = vrot.lane.b32.xlu1 %v7316_v25, %s7090_s2 }
 0x9d4   :  { %2009 = vrot.lane.b32.xlu1 %v7326_v31, %s7090_s2 }
 0x9d8   :  { %2007 = vrot.lane.b32.xlu1 %v7332_v32, %s7090_s2 }
 0x9e0   :  { %2011 = vrot.lane.b32.xlu0 %v7318_v28, %s7090_s2 }
 0xa04   :  { %v1517_v56 = vpop.xlane.xlu0 %1516 }
 0xa06   :  { %v1514_v63 = vpop.xlane.xlu1 %1513 }
 0xa07   :  { %6830 = vrcp.f32 %v1514_v63 }
 0xa08   :  { %6832 = vrcp.f32 %v1517_v56 }
 0xa0a   :  { %v1520_v62 = vpop.xlane.xlu1 %1519 }
 0xa0b   :  { %6834 = vrcp.f32 %v1520_v62 }
 0xa0e   :  { %v1523_v0 = vpop.xlane.xlu0 %1522 }
 0xa0f   :  { %6836 = vrcp.f32 %v1523_v0  ;;  %v1526_v1 = vpop.xlane.xlu1 %1525 }
 0xa10   :  { %6838 = vrcp.f32 %v1526_v1 }
 0xa12   :  { %v1529_v25 = vpop.xlane.xlu0 %1528 }
 0xa13   :  { %6840 = vrcp.f32 %v1529_v25  ;;  %v1543_v5 = vpop.permute.xlu1 %1542  ;;  %v7782_v25 = vpop.f32.mrf.mxu0 }
 0xa14   :  { %v6831_v2 = vpop.eup %6830 }
 0xa15   :  { %v1536_v31 = vmul.f32 %v6831_v2, %v7674_v19  ;;  %v6833_v4 = vpop.eup %6832  ;;  %v7784_v2 = vpop.f32.mrf.mxu0 }
 0xa16   :  { %v1545_v32 = vpop.permute.xlu0 %1544  ;;  %v1537_v8 = vmul.f32 %v6833_v4, %v7670_v14 }
 0xa17   :  { %6310 = vmatprep.subr.mxu0 %v1545_v32  ;;  %6314 = vmatprep.mubr.msk.f32.mxu0 %vm72_vm0, %v1536_v31  ;;  %v7786_v31 = vpop.f32.mrf.mxu0 }
 0xa18   :  { %v6835_v28 = vpop.eup %6834  ;;  %6311 = vmatpush3.msra.mxu0 %v1545_v32 }
 0xa19   :  { %6312 = vmatprep.subr.mxu0 %v1543_v5  ;;  %v1538_v10 = vmul.f32 %v6835_v28, %v7678_v24  ;;  %v7788_v4 = vpop.f32.mrf.mxu0 }
 0xa1a   :  { %6313 = vmatpush3.msra.mxu0 %v1543_v5 }
 0xa1b   :  { %6315 = vmatmul.mubr.msk.f32.vlgmr.msra.gmra.mxu0 %vm72_vm0, %v1537_v8  ;;  %6323 = vmatprep.subr.mxu0 %v5606_v7  ;;  %v7790_v32 = vpop.f32.mrf.mxu0 }
 0xa1c   :  { %v6837_v16 = vpop.eup %6836  ;;  %6317 = vmatprep.mubr.msk.f32.mxu0 %vm72_vm0, %v1538_v10  ;;  %6324 = vmatpush3.msra.mxu0 %v5606_v7 }
 0xa1d   :  { %v6839_v18 = vpop.eup %6838  ;;  %v1539_v19 = vmul.f32 %v6837_v16, %v7682_v33  ;;  %v7792_v28 = vpop.f32.mrf.mxu0 }
 0xa1e   :  { %v1540_v21 = vmul.f32 %v6839_v18, %v7684_v35 }
 0xa1f   :  { %6318 = vmatmul.mubr.msk.f32.gmra.mxu0 %vm72_vm0, %v1539_v19 }
 0xa20   :  { %v6841_v22 = vpop.eup %6840  ;;  %6320 = vmatprep.mubr.msk.f32.mxu0 %vm72_vm0, %v1540_v21 }
 0xa21   :  { %v1541_v14 = vmul.f32 %v6841_v22, %v7690_v39 }
 0xa23   :  { %6321 = vmatmul.mubr.msk.f32.gmra.mxu0 %vm72_vm0, %v1541_v14 }
 0xa44   :  { %v1942_v24 = vpop.xlane.xlu1 %1941 }
 0xa45   :  { %v1956_v27 = vsub.f32 %v7699_v48, %v1942_v24 }
 0xa47   :  { %v1963_v37 = vmul.f32 1.442695, %v1956_v27  ;;  %v1939_v38 = vpop.xlane.xlu0 %1938 }
 0xa48   :  { %v1955_v41 = vsub.f32 %v7702_v54, %v1939_v38  ;;  %v1951_v42 = vpop.xlane.xlu1 %1950 }
 0xa49   :  { %6842 = vpow2.f32 %v1963_v37  ;;  %v1959_v35 = vsub.f32 %v7705_v55, %v1951_v42 }
 0xa4a   :  { %v1961_v33 = vmul.f32 1.442695, %v1955_v41 }
 0xa4b   :  { %v1945_v43 = vpop.xlane.xlu0 %1944  ;;  %v1969_v39 = vmul.f32 1.442695, %v1959_v35 }
 0xa4c   :  { %6844 = vpow2.f32 %v1961_v33  ;;  %v1957_v44 = vsub.f32 %v7710_v57, %v1945_v43  ;;  %v2014_v45 = vpop.permute.xlu1 %2013 }
 0xa4d   :  { %6355 = vmatprep.subr.mxu0 %v2014_v45 }
 0xa4e   :  { %v1965_v46 = vmul.f32 1.442695, %v1957_v44 }
 0xa4f   :  { %v1948_v51 = vpop.xlane.xlu0 %1947 }
 0xa50   :  { %6846 = vpow2.f32 %v1965_v46  ;;  %v1958_v48 = vsub.f32 %v7717_v52, %v1948_v51  ;;  %v2010_v5 = vpop.permute.xlu1 %2009 }
 0xa51   :  { %6848 = vpow2.f32 %v1969_v39 }
 0xa52   :  { %v1967_v53 = vmul.f32 1.442695, %v1958_v48 }
 0xa53   :  { %v1954_v54 = vpop.xlane.xlu0 %1953 }
 0xa54   :  { %6850 = vpow2.f32 %v1967_v53  ;;  %v1960_v58 = vsub.f32 %v7722_v60, %v1954_v54 }
 0xa56   :  { %v7757_v50 = vpop.eup %6842  ;;  %v1971_v55 = vmul.f32 1.442695, %v1960_v58  ;;  %v5631_v58 = vld [vmem:[%s8893_s6 + $0x18] sm:$0xff] }
 0xa57   :  { %v1976_v57 = vsel %vm72_vm0, %v7757_v50, 0.0  ;;  %v2012_v10 = vpop.permute.xlu0 %2011 }
 0xa58   :  { %6852 = vpow2.f32 %v1971_v55  ;;  %1977 = vadd.xlane.f32.xlu0 %v1976_v57  ;;  %v1305_v57 = vadd.f32 %v7784_v2, %v7640_v9  ;;  %v1325_v9 = vadd.f32 %v7792_v28, %v7648_v49  ;;  %v2263_v49 = vsub.s32 2, %v7284_v23 }
 0xa59   :  { %v6845_v3 = vpop.eup %6844 }
 0xa5a   :  { %v1973_v59 = vsel %vm72_vm0, %v6845_v3, 0.0 }
 0xa5b   :  { %1974 = vadd.xlane.f32.xlu1 %v1973_v59 }
 0xa5d   :  { %v7762_v61 = vpop.eup %6846 }
 0xa5e   :  { %v1979_v52 = vsel %vm72_vm0, %v7762_v61, 0.0  ;;  %v7766_v56 = vpop.eup %6848 }
 0xa5f   :  { %1980 = vadd.xlane.f32.xlu1 %v1979_v52  ;;  %v1985_v62 = vsel %vm72_vm0, %v7766_v56, 0.0 }
 0xa61   :  { %v7768_v60 = vpop.eup %6850 }
 0xa62   :  { %v1982_v63 = vsel %vm72_vm0, %v7768_v60, 0.0 }
 0xa63   :  { %1983 = vadd.xlane.f32.xlu0 %v1982_v63  ;;  %1986 = vadd.xlane.f32.xlu1 %v1985_v62 }
 0xa65   :  { %v7774_v0 = vpop.eup %6852 }
 0xa66   :  { %v1988_v1 = vsel %vm72_vm0, %v7774_v0, 0.0 }
 0xa67   :  { %1989 = vadd.xlane.f32.xlu0 %v1988_v1 }
 0xa74   :  { %2003 = vrot.lane.b32.xlu1 %v7312_v20, %s7090_s2 }
 0xa7d   :  { %2005 = vrot.lane.b32.xlu0 %v7322_v30, %s7090_s2  ;;  %v2008_v30 = vpop.permute.xlu1 %2007 }
 0xadb   :  { %v6316_v7 = vpop.f32.mrf.mxu0 }
 0xadd   :  { %v1644_v8 = vpop.f32.mrf.mxu0 }
 0xade   :  { %6325 = vmatprep.mubr.msk.f32.mxu0 %vm447_vm2, %v1644_v8  ;;  %v7836_v8 = vld [vmem:[%s8894_s7] sm:$0x3f] }
 0xadf   :  { %v6319_v20 = vpop.f32.mrf.mxu0  ;;  %6326 = vmatmul.mubr.msk.f32.vlgmr.msra.gmra.mxu0 %vm447_vm2, %v6316_v7 }
 0xae0   :  { %6356 = vmatpush3.msra.mxu0 %v2014_v45 }
 0xae1   :  { %6357 = vmatprep.subr.mxu0 %v2012_v10  ;;  %v1654_v16 = vpop.f32.mrf.mxu0  ;;  %v1978_v19 = vpop.xlane.xlu0 %1977 }
 0xae2   :  { %6358 = vmatpush3.msra.mxu0 %v2012_v10  ;;  %6328 = vmatprep.mubr.msk.f32.mxu0 %vm447_vm2, %v1654_v16 }
 0xae3   :  { %6359 = vmatprep.subr.mxu0 %v2010_v5  ;;  %v6322_v18 = vpop.f32.mrf.mxu0  ;;  %6329 = vmatmul.mubr.msk.f32.gmra.mxu0 %vm447_vm2, %v6319_v20  ;;  %v2264_v20 = vrot.slane %v7836_v8, %v2263_v49 }
 0xae4   :  { %6360 = vmatpush3.msra.mxu0 %v2010_v5  ;;  %v1975_v21 = vpop.xlane.xlu1 %1974 }
 0xae5   :  { %6361 = vmatprep.subr.mxu0 %v2008_v30  ;;  %6854 = vrcp.f32 %v1975_v21  ;;  %v1664_v22 = vpop.f32.mrf.mxu0 }
 0xae6   :  { %6362 = vmatpush3.msra.mxu0 %v2008_v30  ;;  %6331 = vmatprep.mubr.msk.f32.mxu0 %vm447_vm2, %v1664_v22  ;;  %6856 = vrcp.f32 %v1978_v19 }
 0xae7   :  { %6332 = vmatmul.mubr.msk.f32.gmra.mxu0 %vm447_vm2, %v6322_v18 }
 0xae8   :  { %v1981_v14 = vpop.xlane.xlu1 %1980 }
 0xae9   :  { %6858 = vrcp.f32 %v1981_v14 }
 0xaec   :  { %v1984_v24 = vpop.xlane.xlu0 %1983  ;;  %v1987_v27 = vpop.xlane.xlu1 %1986 }
 0xaed   :  { %6860 = vrcp.f32 %v1984_v24 }
 0xaee   :  { %6862 = vrcp.f32 %v1987_v27 }
 0xaf0   :  { %v1990_v37 = vpop.xlane.xlu0 %1989  ;;  %v2004_v43 = vpop.permute.xlu1 %2003 }
 0xaf1   :  { %6864 = vrcp.f32 %v1990_v37 }
 0xaf2   :  { %v6855_v38 = vpop.eup %6854 }
 0xaf3   :  { %v1997_v41 = vmul.f32 %v6855_v38, %v6845_v3  ;;  %v6857_v42 = vpop.eup %6856 }
 0xaf4   :  { %v2006_v33 = vpop.permute.xlu0 %2005  ;;  %v1998_v44 = vmul.f32 %v6857_v42, %v7757_v50  ;;  %v1310_v50 = vadd.f32 %v7782_v25, %v7638_v6 }
 0xaf5   :  { %6363 = vmatprep.subr.mxu0 %v2006_v33  ;;  %6367 = vmatprep.mubr.msk.f32.mxu0 %vm72_vm0, %v1997_v41 }
 0xaf6   :  { %v6859_v35 = vpop.eup %6858  ;;  %6364 = vmatpush3.msra.mxu0 %v2006_v33 }
 0xaf7   :  { %6365 = vmatprep.subr.mxu0 %v2004_v43  ;;  %v1999_v45 = vmul.f32 %v6859_v35, %v7762_v61  ;;  %v1320_v61 = vadd.f32 %v7786_v31, %v7642_v11 }
 0xaf8   :  { %6366 = vmatpush3.msra.mxu0 %v2004_v43 }
 0xaf9   :  { %6368 = vmatmul.mubr.msk.f32.vlgmr.msra.gmra.mxu0 %vm72_vm0, %v1998_v44  ;;  %6376 = vmatprep.subr.mxu0 %v5631_v58 }
 0xafa   :  { %v6861_v39 = vpop.eup %6860  ;;  %6370 = vmatprep.mubr.msk.f32.mxu0 %vm72_vm0, %v1999_v45  ;;  %6377 = vmatpush3.msra.mxu0 %v5631_v58 }
 0xafb   :  { %v6863_v46 = vpop.eup %6862  ;;  %v2000_v51 = vmul.f32 %v6861_v39, %v7768_v60  ;;  %v1315_v60 = vadd.f32 %v7788_v4, %v7644_v12 }
 0xafc   :  { %v2001_v48 = vmul.f32 %v6863_v46, %v7766_v56 }
 0xafd   :  { %6371 = vmatmul.mubr.msk.f32.gmra.mxu0 %vm72_vm0, %v2000_v51 }
 0xafe   :  { %v6865_v53 = vpop.eup %6864  ;;  %6373 = vmatprep.mubr.msk.f32.mxu0 %vm72_vm0, %v2001_v48 }
 0xaff   :  { %v2002_v54 = vmul.f32 %v6865_v53, %v7774_v0  ;;  %v1330_v0 = vadd.f32 %v7790_v32, %v7646_v13 }
 0xb01   :  { %6374 = vmatmul.mubr.msk.f32.gmra.mxu0 %vm72_vm0, %v2002_v54 }
 0xb9f   :  { %v6327_v55 = vpop.f32.mrf.mxu0 }
 0xba0   :  { %v1789_v3 = vadd.f32 %v6327_v55, %v1310_v50 }
 0xba1   :  { %v1759_v59 = vpop.f32.mrf.mxu0 }
 0xba2   :  { %v1788_v52 = vadd.f32 %v1759_v59, %v1305_v57 }
 0xba3   :  { %v6330_v56 = vpop.f32.mrf.mxu0 }
 0xba4   :  { %v1791_v63 = vadd.f32 %v6330_v56, %v1320_v61 }
 0xba5   :  { %v1769_v62 = vpop.f32.mrf.mxu0 }
 0xba6   :  { %v1790_v6 = vadd.f32 %v1769_v62, %v1315_v60  ;;  %v2390_v60 = vld [vmem:[%s8895_s8 + $0x18] sm:$0xff]  ;;  %v2388_v62 = vld [vmem:[%s8895_s8 + $0x8] sm:$0xff] }
 0xba7   :  { %v6333_v1 = vpop.f32.mrf.mxu0  ;;  %6387 = vmatprep.subr.mxu1 %v2390_v60 }
 0xba8   :  { %v1793_v25 = vadd.f32 %v6333_v1, %v1330_v0  ;;  %6388 = vmatpush3.msra.mxu1 %v2390_v60  ;;  %v2387_v0 = vld [vmem:[%s8895_s8] sm:$0xff] }
 0xba9   :  { %v1779_v2 = vpop.f32.mrf.mxu0 }
 0xbaa   :  { %v1792_v5 = vadd.f32 %v1779_v2, %v1325_v9 }
 0xbb9   :  { %v6369_v7 = vpop.f32.mrf.mxu0 }
 0xbbb   :  { %v2105_v11 = vpop.f32.mrf.mxu0 }
 0xbbc   :  { %6378 = vmatprep.mubr.msk.f32.mxu0 %vm447_vm2, %v2105_v11 }
 0xbbd   :  { %v6372_v31 = vpop.f32.mrf.mxu0  ;;  %6379 = vmatmul.mubr.msk.f32.vlgmr.msra.gmra.mxu0 %vm447_vm2, %v6369_v7 }
 0xbbf   :  { %v2115_v12 = vpop.f32.mrf.mxu0 }
 0xbc0   :  { %6381 = vmatprep.mubr.msk.f32.mxu0 %vm447_vm2, %v2115_v12 }
 0xbc1   :  { %v6375_v4 = vpop.f32.mrf.mxu0  ;;  %6382 = vmatmul.mubr.msk.f32.gmra.mxu0 %vm447_vm2, %v6372_v31 }
 0xbc3   :  { %v2125_v13 = vpop.f32.mrf.mxu0 }
 0xbc4   :  { %6384 = vmatprep.mubr.msk.f32.mxu0 %vm447_vm2, %v2125_v13 }
 0xbc5   :  { %6385 = vmatmul.mubr.msk.f32.gmra.mxu0 %vm447_vm2, %v6375_v4 }
 0xc7d   :  { %v6380_v32 = vpop.f32.mrf.mxu0 }
 0xc7e   :  { %v2250_v28 = vadd.f32 %v6380_v32, %v1789_v3 }
 0xc7f   :  { %v2220_v30 = vpop.f32.mrf.mxu0 }
 0xc80   :  { %v2256_v10 = vadd.f32 %v2250_v28, %v7218_v15  ;;  %v2249_v16 = vadd.f32 %v2220_v30, %v1788_v52 }
 0xc81   :  { %v6383_v18 = vpop.f32.mrf.mxu0 }
 0xc82   :  { %v7842_v19 = vadd.f32 %v2264_v20, %v2256_v10  ;;  %v2255_v21 = vadd.f32 %v2249_v16, %v7220_v17  ;;  %v2252_v37 = vadd.f32 %v6383_v18, %v1791_v63  ;;  %v2389_v63 = vld [vmem:[%s8895_s8 + $0x10] sm:$0xff] }
 0xc83   :  { %v2230_v22 = vpop.f32.mrf.mxu0  ;;  %6389 = vmatprep.subr.mxu1 %v2389_v63 }
 0xc84   :  { %v7845_v14 = vadd.f32 %v2264_v20, %v2255_v21  ;;  %v2251_v24 = vadd.f32 %v2230_v22, %v1790_v6  ;;  %v2274_v27 = vsel %vm187_vm1, %v7842_v19, 0.0  ;;  %v2296_v41 = vmul.f32 %v7842_v19, %v7842_v19  ;;  %6390 = vmatpush3.msra.mxu1 %v2389_v63 }
 0xc85   :  { %2275 = vadd.xlane.f32.xlu1 %v2274_v27  ;;  %v6386_v38 = vpop.f32.mrf.mxu0  ;;  %v2258_v43 = vadd.f32 %v2252_v37, %v7239_v29  ;;  %6391 = vmatprep.subr.mxu1 %v2388_v62 }
 0xc86   :  { %v2257_v15 = vadd.f32 %v2251_v24, %v7235_v26  ;;  %v2271_v42 = vsel %vm187_vm1, %v7845_v14, 0.0  ;;  %v2304_v44 = vsel %vm187_vm1, %v2296_v41, 0.0  ;;  %v2295_v26 = vmul.f32 %v7845_v14, %v7845_v14  ;;  %6392 = vmatpush3.msra.mxu1 %v2388_v62 }
 0xc87   :  { %2272 = vadd.xlane.f32.xlu0 %v2271_v42  ;;  %v2240_v17 = vpop.f32.mrf.mxu0  ;;  %v2254_v51 = vadd.f32 %v6386_v38, %v1793_v25  ;;  %v7865_v48 = vadd.f32 %v2264_v20, %v2258_v43  ;;  %6393 = vmatprep.subr.mxu1 %v2387_v0  ;;  %v2379_v62 = vsub.s32 4, %v7284_v23 }
 0xc88   :  { %v7854_v33 = vadd.f32 %v2264_v20, %v2257_v15  ;;  %v2253_v35 = vadd.f32 %v2240_v17, %v1792_v5  ;;  %v2301_v29 = vsel %vm187_vm1, %v2295_v26, 0.0  ;;  %6394 = vmatpush3.msra.mxu1 %v2387_v0 }
 0xc89   :  { %v2260_v54 = vadd.f32 %v2254_v51, %v7259_v40  ;;  %v2280_v58 = vsel %vm187_vm1, %v7865_v48, 0.0  ;;  %v2298_v55 = vmul.f32 %v7865_v48, %v7865_v48 }
 0xc8a   :  { %v2259_v45 = vadd.f32 %v2253_v35, %v7251_v36  ;;  %v2277_v39 = vsel %vm187_vm1, %v7854_v33, 0.0  ;;  %v2297_v46 = vmul.f32 %v7854_v33, %v7854_v33 }
 0xc8b   :  { %2305 = vadd.xlane.f32.xlu0 %v2304_v44  ;;  %2278 = vadd.xlane.f32.xlu1 %v2277_v39  ;;  %v7880_v3 = vadd.f32 %v2264_v20, %v2260_v54  ;;  %v2310_v59 = vsel %vm187_vm1, %v2298_v55, 0.0 }
 0xc8c   :  { %v7867_v53 = vadd.f32 %v2264_v20, %v2259_v45  ;;  %v2307_v36 = vsel %vm187_vm1, %v2297_v46, 0.0 }
 0xc8d   :  { %v2286_v61 = vsel %vm187_vm1, %v7880_v3, 0.0  ;;  %v2300_v52 = vmul.f32 %v7880_v3, %v7880_v3 }
 0xc8e   :  { %v2283_v50 = vsel %vm187_vm1, %v7867_v53, 0.0  ;;  %v2299_v57 = vmul.f32 %v7867_v53, %v7867_v53 }
 0xc8f   :  { %2302 = vadd.xlane.f32.xlu0 %v2301_v29  ;;  %2308 = vadd.xlane.f32.xlu1 %v2307_v36  ;;  %v2316_v56 = vsel %vm187_vm1, %v2300_v52, 0.0 }
 0xc90   :  { %v2313_v40 = vsel %vm187_vm1, %v2299_v57, 0.0  ;;  %v2369_v57 = vsub.s32 3, %v7284_v23 }
 0xc92   :  { %v2370_v63 = vrot.slane %v7836_v8, %v2369_v57 }
 0xc93   :  { %2281 = vadd.xlane.f32.xlu0 %v2280_v58  ;;  %2284 = vadd.xlane.f32.xlu1 %v2283_v50 }
 0xc97   :  { %2311 = vadd.xlane.f32.xlu0 %v2310_v59  ;;  %2314 = vadd.xlane.f32.xlu1 %v2313_v40 }
 0xc9b   :  { %2287 = vadd.xlane.f32.xlu0 %v2286_v61 }
 0xc9f   :  { %2317 = vadd.xlane.f32.xlu0 %v2316_v56 }
 0xd0e   :  { %v2276_v6 = vpop.xlane.xlu1 %2275 }
 0xd0f   :  { %v2290_v9 = vmul.f32 0.03125, %v2276_v6 }
 0xd10   :  { %v2273_v1 = vpop.xlane.xlu0 %2272 }
 0xd11   :  { %v2289_v25 = vmul.f32 0.03125, %v2273_v1  ;;  %v2326_v7 = vmul.f32 %v2290_v9, %v2290_v9  ;;  %v2344_v52 = vsub.f32 %v7842_v19, %v2290_v9  ;;  %v2380_v9 = vrot.slane %v7836_v8, %v2379_v62 }
 0xd13   :  { %v2325_v4 = vmul.f32 %v2289_v25, %v2289_v25  ;;  %v2343_v0 = vsub.f32 %v7845_v14, %v2289_v25 }
 0xd14   :  { %v2306_v2 = vpop.xlane.xlu0 %2305  ;;  %v2279_v5 = vpop.xlane.xlu1 %2278 }
 0xd15   :  { %v2320_v11 = vmul.f32 0.03125, %v2306_v2  ;;  %v2291_v31 = vmul.f32 0.03125, %v2279_v5 }
 0xd17   :  { %v2332_v12 = vsub.f32 %v2320_v11, %v2326_v7  ;;  %v2327_v20 = vmul.f32 %v2291_v31, %v2291_v31  ;;  %v2345_v2 = vsub.f32 %v7854_v33, %v2291_v31 }
 0xd18   :  { %v2303_v13 = vpop.xlane.xlu0 %2302  ;;  %v2309_v32 = vpop.xlane.xlu1 %2308 }
 0xd19   :  { %v2338_v28 = vmax.f32 %v2332_v12, 0.0  ;;  %v2319_v30 = vmul.f32 0.03125, %v2303_v13  ;;  %v2321_v10 = vmul.f32 0.03125, %v2309_v32 }
 0xd1b   :  { %v2350_v16 = vadd.f32 1e-06, %v2338_v28  ;;  %v2331_v18 = vsub.f32 %v2319_v30, %v2325_v4  ;;  %v2333_v21 = vsub.f32 %v2321_v10, %v2327_v20 }
 0xd1c   :  { %v2282_v22 = vpop.xlane.xlu0 %2281  ;;  %v2285_v24 = vpop.xlane.xlu1 %2284 }
 0xd1d   :  { %6866 = vrsqrt.f32 %v2350_v16  ;;  %v2337_v27 = vmax.f32 %v2331_v18, 0.0  ;;  %v2339_v37 = vmax.f32 %v2333_v21, 0.0  ;;  %v2292_v38 = vmul.f32 0.03125, %v2282_v22 }
 0xd1e   :  { %v2293_v41 = vmul.f32 0.03125, %v2285_v24 }
 0xd1f   :  { %v2349_v15 = vadd.f32 1e-06, %v2337_v27  ;;  %v2351_v42 = vadd.f32 1e-06, %v2339_v37  ;;  %v2328_v17 = vmul.f32 %v2292_v38, %v2292_v38  ;;  %v2346_v25 = vsub.f32 %v7865_v48, %v2292_v38 }
 0xd20   :  { %v2312_v35 = vpop.xlane.xlu0 %2311  ;;  %v2315_v43 = vpop.xlane.xlu1 %2314  ;;  %v2329_v44 = vmul.f32 %v2293_v41, %v2293_v41  ;;  %v2347_v10 = vsub.f32 %v7867_v53, %v2293_v41 }
 0xd21   :  { %6868 = vrsqrt.f32 %v2349_v15  ;;  %v2322_v45 = vmul.f32 0.03125, %v2312_v35  ;;  %v2323_v39 = vmul.f32 0.03125, %v2315_v43  ;;  %v2682_v35 = vld [vmem:[%s8897_s10 + $0x78] sm:$0xff]  ;;  %v2681_v43 = vld [vmem:[%s8897_s10 + $0x70] sm:$0xff] }
 0xd22   :  { %6870 = vrsqrt.f32 %v2351_v42  ;;  %6404 = vmatprep.subr.mxu0 %v2682_v35 }
 0xd23   :  { %v2334_v26 = vsub.f32 %v2322_v45, %v2328_v17  ;;  %v2335_v46 = vsub.f32 %v2323_v39, %v2329_v44  ;;  %6405 = vmatpush3.msra.mxu0 %v2682_v35  ;;  %v2680_v44 = vld [vmem:[%s8897_s10 + $0x68] sm:$0xff]  ;;  %v2679_v45 = vld [vmem:[%s8897_s10 + $0x60] sm:$0xff]  ;;  %v2678_v39 = vld [vmem:[%s8897_s10 + $0x58] sm:$0xff] }
 0xd24   :  { %v2288_v51 = vpop.xlane.xlu0 %2287  ;;  %6406 = vmatprep.subr.mxu0 %v2681_v43 }
 0xd25   :  { %v2340_v29 = vmax.f32 %v2334_v26, 0.0  ;;  %v2341_v36 = vmax.f32 %v2335_v46, 0.0  ;;  %v2294_v54 = vmul.f32 0.03125, %v2288_v51  ;;  %6407 = vmatpush3.msra.mxu0 %v2681_v43  ;;  %v2677_v26 = vld [vmem:[%s8897_s10 + $0x50] sm:$0xff]  ;;  %v2676_v46 = vld [vmem:[%s8897_s10 + $0x48] sm:$0xff]  ;;  %v2675_v51 = vld [vmem:[%s8897_s10 + $0x40] sm:$0xff] }
 0xd26   :  { %6408 = vmatprep.subr.mxu0 %v2680_v44 }
 0xd27   :  { %v2352_v58 = vadd.f32 1e-06, %v2340_v29  ;;  %v2353_v50 = vadd.f32 1e-06, %v2341_v36  ;;  %v2330_v59 = vmul.f32 %v2294_v54, %v2294_v54  ;;  %v2348_v15 = vsub.f32 %v7880_v3, %v2294_v54  ;;  %6409 = vmatpush3.msra.mxu0 %v2680_v44  ;;  %v2674_v29 = vld [vmem:[%s8897_s10 + $0x38] sm:$0xff]  ;;  %v2673_v36 = vld [vmem:[%s8897_s10 + $0x30] sm:$0xff] }
 0xd28   :  { %v2318_v55 = vpop.xlane.xlu0 %2317  ;;  %6410 = vmatprep.subr.mxu0 %v2679_v45  ;;  %v2672_v54 = vld [vmem:[%s8897_s10 + $0x28] sm:$0xff] }
 0xd29   :  { %6872 = vrsqrt.f32 %v2352_v58  ;;  %v2324_v40 = vmul.f32 0.03125, %v2318_v55  ;;  %6411 = vmatpush3.msra.mxu0 %v2679_v45  ;;  %v2671_v58 = vld [vmem:[%s8897_s10 + $0x20] sm:$0xff]  ;;  %v2669_v55 = vld [vmem:[%s8897_s10 + $0x10] sm:$0xff] }
 0xd2a   :  { %v6867_v61 = vpop.eup %6866  ;;  %6874 = vrsqrt.f32 %v2353_v50  ;;  %6412 = vmatprep.subr.mxu0 %v2678_v39  ;;  %v2670_v50 = vld [vmem:[%s8897_s10 + $0x18] sm:$0xff] }
 0xd2b   :  { %v2336_v56 = vsub.f32 %v2324_v40, %v2330_v59  ;;  %v2362_v60 = vmul.f32 %v6867_v61, %v2344_v52  ;;  %6413 = vmatpush3.msra.mxu0 %v2678_v39  ;;  %v2668_v59 = vld [vmem:[%s8897_s10 + $0x8] sm:$0xff]  ;;  %v2667_v40 = vld [vmem:[%s8897_s10] sm:$0xff] }
 0xd2c   :  { %6414 = vmatprep.subr.mxu0 %v2677_v26  ;;  %v5638_v61 = vld [vmem:[%s8896_s9] ss:$0 sm:$0xff] }
 0xd2d   :  { %v2342_v6 = vmax.f32 %v2336_v56, 0.0  ;;  %v2372_v12 = vmul.f32 %v2370_v63, %v2362_v60  ;;  %6415 = vmatpush3.msra.mxu0 %v2677_v26 }
 0xd2e   :  { %v6869_v1 = vpop.eup %6868  ;;  %6416 = vmatprep.subr.mxu0 %v2676_v46 }
 0xd2f   :  { %v6871_v5 = vpop.eup %6870  ;;  %v2354_v7 = vadd.f32 1e-06, %v2342_v6  ;;  %v2361_v11 = vmul.f32 %v6869_v1, %v2343_v0  ;;  %v2382_v20 = vadd.f32 %v2380_v9, %v2372_v12  ;;  %6417 = vmatpush3.msra.mxu0 %v2676_v46 }
 0xd30   :  { %v2363_v4 = vmul.f32 %v6871_v5, %v2345_v2  ;;  %6418 = vmatprep.subr.mxu0 %v2675_v51 }
 0xd31   :  { %6876 = vrsqrt.f32 %v2354_v7  ;;  %v2371_v13 = vmul.f32 %v2370_v63, %v2361_v11  ;;  %6419 = vmatpush3.msra.mxu0 %v2675_v51 }
 0xd32   :  { %v2373_v32 = vmul.f32 %v2370_v63, %v2363_v4  ;;  %6420 = vmatprep.subr.mxu0 %v2674_v29 }
 0xd33   :  { %v2381_v28 = vadd.f32 %v2380_v9, %v2371_v13  ;;  %6421 = vmatpush3.msra.mxu0 %v2674_v29 }
 0xd34   :  { %v2383_v30 = vadd.f32 %v2380_v9, %v2373_v32  ;;  %6422 = vmatprep.subr.mxu0 %v2673_v36 }
 0xd35   :  { %6395 = vmatprep.mubr.msk.f32.mxu1 %vm187_vm1, %v2381_v28  ;;  %6423 = vmatpush3.msra.mxu0 %v2673_v36 }
 0xd36   :  { %v6873_v31 = vpop.eup %6872  ;;  %6396 = vmatmul.mubr.msk.f32.vlgmr.msra.gmra.mxu1 %vm187_vm1, %v2382_v20  ;;  %6424 = vmatprep.subr.mxu0 %v2672_v54 }
 0xd37   :  { %v6875_v16 = vpop.eup %6874  ;;  %6398 = vmatprep.mubr.msk.f32.mxu1 %vm187_vm1, %v2383_v30  ;;  %v2364_v18 = vmul.f32 %v6873_v31, %v2346_v25  ;;  %6425 = vmatpush3.msra.mxu0 %v2672_v54 }
 0xd38   :  { %v2365_v21 = vmul.f32 %v6875_v16, %v2347_v10  ;;  %6426 = vmatprep.subr.mxu0 %v2671_v58 }
 0xd39   :  { %v2374_v22 = vmul.f32 %v2370_v63, %v2364_v18  ;;  %6427 = vmatpush3.msra.mxu0 %v2671_v58 }
 0xd3a   :  { %v2375_v24 = vmul.f32 %v2370_v63, %v2365_v21  ;;  %6428 = vmatprep.subr.mxu0 %v2670_v50 }
 0xd3b   :  { %v2384_v27 = vadd.f32 %v2380_v9, %v2374_v22  ;;  %6429 = vmatpush3.msra.mxu0 %v2670_v50 }
 0xd3c   :  { %v2385_v37 = vadd.f32 %v2380_v9, %v2375_v24  ;;  %6430 = vmatprep.subr.mxu0 %v2669_v55 }
 0xd3d   :  { %6399 = vmatmul.mubr.msk.f32.gmra.mxu1 %vm187_vm1, %v2384_v27  ;;  %6431 = vmatpush3.msra.mxu0 %v2669_v55 }
 0xd3e   :  { %v6877_v38 = vpop.eup %6876  ;;  %6401 = vmatprep.mubr.msk.f32.mxu1 %vm187_vm1, %v2385_v37  ;;  %6432 = vmatprep.subr.mxu0 %v2668_v59 }
 0xd3f   :  { %v2366_v42 = vmul.f32 %v6877_v38, %v2348_v15  ;;  %6433 = vmatpush3.msra.mxu0 %v2668_v59 }
 0xd40   :  { %6434 = vmatprep.subr.mxu0 %v2667_v40 }
 0xd41   :  { %v2376_v41 = vmul.f32 %v2370_v63, %v2366_v42  ;;  %6435 = vmatpush3.msra.mxu0 %v2667_v40 }
 0xd43   :  { %v2386_v17 = vadd.f32 %v2380_v9, %v2376_v41 }
 0xd45   :  { %6402 = vmatmul.mubr.msk.f32.gmra.mxu1 %vm187_vm1, %v2386_v17 }
 0xdf6   :  { %v6397_v52 = vpop.f32.mrf.mxu1 }
 0xdf7   :  { %v7972_v56 = vadd.f32 %v6397_v52, %v5638_v61 }
 0xdf8   :  { %v2482_v60 = vpop.f32.mrf.mxu1 }
 0xdf9   :  { %v7975_v63 = vmul.f32 0.70710677, %v7972_v56  ;;  %v7977_v0 = vadd.f32 %v5638_v61, %v2482_v60 }
 0xdfb   :  { %v2536_v6 = vand.u32 2147483647, %v7975_v63  ;;  %v7981_v1 = vmul.f32 0.70710677, %v7977_v0  ;;  %vm2524_vm3 = vcmp.lt.f32.partialorder %v7975_v63, 0.0 }
 0xdfd   :  { %v2542_v2 = vmul.f32 0.3275911, %v2536_v6  ;;  %v2535_v5 = vand.u32 2147483647, %v7981_v1  ;;  %v6400_v7 = vpop.f32.mrf.mxu1  ;;  %v2614_v21 = vsub.f32 0.0, %v2536_v6  ;;  %vm2523_vm4 = vcmp.lt.f32.partialorder %v7981_v1, 0.0 }
 0xdfe   :  { %v7984_v11 = vadd.f32 %v6400_v7, %v5638_v61 }
 0xdff   :  { %v2548_v9 = vadd.f32 1.0, %v2542_v2  ;;  %v2541_v12 = vmul.f32 0.3275911, %v2535_v5  ;;  %v2492_v4 = vpop.f32.mrf.mxu1  ;;  %v2613_v38 = vsub.f32 0.0, %v2535_v5  ;;  %v2620_v41 = vmul.f32 %v2614_v21, %v2536_v6 }
 0xe00   :  { %v7987_v13 = vmul.f32 0.70710677, %v7984_v11  ;;  %v7989_v32 = vadd.f32 %v5638_v61, %v2492_v4 }
 0xe01   :  { %6878 = vrcp.f32 %v2548_v9  ;;  %v2547_v28 = vadd.f32 1.0, %v2541_v12  ;;  %v2619_v44 = vmul.f32 %v2613_v38, %v2535_v5  ;;  %v2627_v51 = vmul.f32 1.442695, %v2620_v41 }
 0xe02   :  { %v2538_v20 = vand.u32 2147483647, %v7987_v13  ;;  %v7993_v25 = vmul.f32 0.70710677, %v7989_v32  ;;  %vm2526_vm5 = vcmp.lt.f32.partialorder %v7987_v13, 0.0 }
 0xe03   :  { %6880 = vrcp.f32 %v2547_v28  ;;  %v2625_v50 = vmul.f32 1.442695, %v2619_v44 }
 0xe04   :  { %v2544_v30 = vmul.f32 0.3275911, %v2538_v20  ;;  %v2537_v31 = vand.u32 2147483647, %v7993_v25  ;;  %v2616_v45 = vsub.f32 0.0, %v2538_v20  ;;  %vm2525_vm6 = vcmp.lt.f32.partialorder %v7993_v25, 0.0 }
 0xe05   :  { %v6403_v10 = vpop.f32.mrf.mxu1 }
 0xe06   :  { %v2550_v16 = vadd.f32 1.0, %v2544_v30  ;;  %v7996_v18 = vadd.f32 %v6403_v10, %v5638_v61  ;;  %v2543_v22 = vmul.f32 0.3275911, %v2537_v31  ;;  %v2615_v29 = vsub.f32 0.0, %v2537_v31 }
 0xe07   :  { %v2502_v24 = vpop.f32.mrf.mxu1  ;;  %v2622_v55 = vmul.f32 %v2616_v45, %v2538_v20 }
 0xe08   :  { %6882 = vrcp.f32 %v2550_v16  ;;  %v7999_v27 = vmul.f32 0.70710677, %v7996_v18  ;;  %v2549_v37 = vadd.f32 1.0, %v2543_v22  ;;  %v8001_v15 = vadd.f32 %v5638_v61, %v2502_v24 }
 0xe09   :  { %v2621_v52 = vmul.f32 %v2615_v29, %v2537_v31  ;;  %v2631_v7 = vmul.f32 1.442695, %v2622_v55 }
 0xe0a   :  { %v2540_v42 = vand.u32 2147483647, %v7999_v27  ;;  %6884 = vrcp.f32 %v2549_v37  ;;  %v8005_v35 = vmul.f32 0.70710677, %v8001_v15  ;;  %vm2528_vm7 = vcmp.lt.f32.partialorder %v7999_v27, 0.0 }
 0xe0b   :  { %v2629_v30 = vmul.f32 1.442695, %v2621_v52 }
 0xe0c   :  { %v2546_v17 = vmul.f32 0.3275911, %v2540_v42  ;;  %v2539_v26 = vand.u32 2147483647, %v8005_v35  ;;  %v2618_v5 = vsub.f32 0.0, %v2540_v42  ;;  %vm2527_vm8 = vcmp.lt.f32.partialorder %v8005_v35, 0.0 }
 0xe0d   :  { %v2786_v35 = vsub.s32 5, %v7284_v23  ;;  %v5430_v23 = vld [vmem:[%s8899_s12 + $0x18] sm:$0xff] }
 0xe0e   :  { %v6879_v43 = vpop.eup %6878  ;;  %v2552_v39 = vadd.f32 1.0, %v2546_v17  ;;  %v2545_v36 = vmul.f32 0.3275911, %v2539_v26  ;;  %v2624_v21 = vmul.f32 %v2618_v5, %v2540_v42  ;;  %v2617_v22 = vsub.f32 0.0, %v2539_v26 }
 0xe0f   :  { %v2560_v46 = vmul.f32 1.0614054, %v6879_v43 }
 0xe10   :  { %6886 = vrcp.f32 %v2552_v39  ;;  %v6881_v54 = vpop.eup %6880  ;;  %v2551_v59 = vadd.f32 1.0, %v2545_v36 }
 0xe11   :  { %v2566_v58 = vadd.f32 -1.4531521, %v2560_v46  ;;  %v2559_v40 = vmul.f32 1.0614054, %v6881_v54  ;;  %6888 = vpow2.f32 %v2627_v51  ;;  %v2635_v46 = vmul.f32 1.442695, %v2624_v21 }
 0xe12   :  { %6890 = vrcp.f32 %v2551_v59  ;;  %v2623_v51 = vmul.f32 %v2617_v22, %v2539_v26 }
 0xe13   :  { %v2572_v61 = vmul.f32 %v6879_v43, %v2566_v58  ;;  %v2565_v60 = vadd.f32 -1.4531521, %v2559_v40  ;;  %6892 = vpow2.f32 %v2625_v50 }
 0xe14   :  { %6894 = vpow2.f32 %v2631_v7  ;;  %v2633_v5 = vmul.f32 1.442695, %v2623_v51 }
 0xe15   :  { %v6883_v6 = vpop.eup %6882  ;;  %v2578_v2 = vadd.f32 1.4214138, %v2572_v61  ;;  %v2571_v9 = vmul.f32 %v6881_v54, %v2565_v60  ;;  %6896 = vpow2.f32 %v2629_v30 }
 0xe16   :  { %v2562_v12 = vmul.f32 1.0614054, %v6883_v6  ;;  %6898 = vpow2.f32 %v2635_v46 }
 0xe17   :  { %v2584_v4 = vmul.f32 %v6879_v43, %v2578_v2  ;;  %v8008_v28 = vpop.eup %6884  ;;  %v2577_v10 = vadd.f32 1.4214138, %v2571_v9  ;;  %6900 = vpow2.f32 %v2633_v5 }
 0xe18   :  { %v2568_v20 = vadd.f32 -1.4531521, %v2562_v12  ;;  %v2561_v31 = vmul.f32 1.0614054, %v8008_v28 }
 0xe19   :  { %v2590_v16 = vadd.f32 -0.28449672, %v2584_v4  ;;  %v2583_v24 = vmul.f32 %v6881_v54, %v2577_v10 }
 0xe1a   :  { %v2574_v37 = vmul.f32 %v6883_v6, %v2568_v20  ;;  %v2567_v41 = vadd.f32 -1.4531521, %v2561_v31 }
 0xe1b   :  { %v2596_v38 = vmul.f32 %v6879_v43, %v2590_v16  ;;  %v2589_v17 = vadd.f32 -0.28449672, %v2583_v24 }
 0xe1c   :  { %v2580_v44 = vadd.f32 1.4214138, %v2574_v37  ;;  %v2573_v29 = vmul.f32 %v8008_v28, %v2567_v41 }
 0xe1d   :  { %v8011_v45 = vpop.eup %6886  ;;  %v2602_v39 = vadd.f32 0.2548296, %v2596_v38  ;;  %v2595_v36 = vmul.f32 %v6881_v54, %v2589_v17 }
 0xe1e   :  { %v2586_v42 = vmul.f32 %v6883_v6, %v2580_v44  ;;  %v2564_v58 = vmul.f32 1.0614054, %v8011_v45  ;;  %v2579_v55 = vadd.f32 1.4214138, %v2573_v29  ;;  %v6889_v59 = vpop.eup %6888 }
 0xe1f   :  { %v2608_v50 = vmul.f32 %v6879_v43, %v2602_v39  ;;  %v2601_v40 = vadd.f32 0.2548296, %v2595_v36  ;;  %v8016_v60 = vpop.eup %6890  ;;  %v7091_v43 = vmov 1.0  }
 0xe20   :  { %v2592_v61 = vadd.f32 -0.28449672, %v2586_v42  ;;  %v2570_v52 = vadd.f32 -1.4531521, %v2564_v58  ;;  %v2585_v26 = vmul.f32 %v8008_v28, %v2579_v55  ;;  %v2563_v12 = vmul.f32 1.0614054, %v8016_v60  ;;  %v6893_v30 = vpop.eup %6892 }
 0xe21   :  { %v2638_v2 = vmul.f32 %v6889_v59, %v2608_v50  ;;  %v2607_v7 = vmul.f32 %v6881_v54, %v2601_v40  ;;  %v2530_v10 = vsel %vm2524_vm3, -1.0, %v7091_v43  ;;  %v6895_v63 = vpop.eup %6894  ;;  %v2529_v39 = vsel %vm2523_vm4, -1.0, %v7091_v43 }
 0xe22   :  { %v2598_v9 = vmul.f32 %v6883_v6, %v2592_v61  ;;  %v2576_v4 = vmul.f32 %v8011_v45, %v2570_v52  ;;  %v2591_v16 = vadd.f32 -0.28449672, %v2585_v26  ;;  %v2569_v31 = vadd.f32 -1.4531521, %v2563_v12  ;;  %v6897_v42 = vpop.eup %6896 }
 0xe23   :  { %v2644_v20 = vsub.f32 1.0, %v2638_v2  ;;  %v2637_v21 = vmul.f32 %v6893_v30, %v2607_v7  ;;  %v2511_v50 = vmul.f32 0.5, %v7977_v0  ;;  %v2512_v52 = vmul.f32 0.5, %v7972_v56 }
 0xe24   :  { %v2604_v22 = vadd.f32 0.2548296, %v2598_v9  ;;  %v2582_v24 = vadd.f32 1.4214138, %v2576_v4  ;;  %v2597_v37 = vmul.f32 %v8008_v28, %v2591_v16  ;;  %v2575_v17 = vmul.f32 %v8016_v60, %v2569_v31 }
 0xe25   :  { %v2650_v54 = vmul.f32 %v2644_v20, %v2530_v10  ;;  %v2643_v38 = vsub.f32 1.0, %v2637_v21  ;;  %v2532_v13 = vsel %vm2526_vm5, -1.0, %v7091_v43  ;;  %v2531_v4 = vsel %vm2525_vm6, -1.0, %v7091_v43 }
 0xe26   :  { %v2610_v41 = vmul.f32 %v6883_v6, %v2604_v22  ;;  %v2588_v44 = vmul.f32 %v8011_v45, %v2582_v24  ;;  %v2603_v1 = vadd.f32 0.2548296, %v2597_v37  ;;  %v2581_v29 = vadd.f32 1.4214138, %v2575_v17 }
 0xe27   :  { %v2649_v46 = vmul.f32 %v2643_v38, %v2529_v39  ;;  %v2656_v58 = vadd.f32 1.0, %v2650_v54  ;;  %v2513_v21 = vmul.f32 0.5, %v7989_v32  ;;  %v2514_v24 = vmul.f32 0.5, %v7984_v11 }
 0xe28   :  { %v2640_v51 = vmul.f32 %v6895_v63, %v2610_v41  ;;  %v2594_v36 = vadd.f32 -0.28449672, %v2588_v44  ;;  %v2609_v6 = vmul.f32 %v8008_v28, %v2603_v1  ;;  %v2587_v40 = vmul.f32 %v8016_v60, %v2581_v29  ;;  %v6899_v28 = vpop.eup %6898 }
 0xe29   :  { %v2655_v55 = vadd.f32 1.0, %v2649_v46  ;;  %v2662_v0 = vmul.f32 %v2656_v58, %v2512_v52  ;;  %v6901_v31 = vpop.eup %6900  ;;  %v2534_v41 = vsel %vm2528_vm7, -1.0, %v7091_v43  ;;  %v2533_v27 = vsel %vm2527_vm8, -1.0, %v7091_v43 }
 0xe2a   :  { %v2646_v59 = vsub.f32 1.0, %v2640_v51  ;;  %v2600_v61 = vmul.f32 %v8011_v45, %v2594_v36  ;;  %v2639_v2 = vmul.f32 %v6897_v42, %v2609_v6  ;;  %v2593_v7 = vadd.f32 -0.28449672, %v2587_v40 }
 0xe2b   :  { %v2661_v5 = vmul.f32 %v2655_v55, %v2511_v50  ;;  %v2515_v11 = vmul.f32 0.5, %v8001_v15  ;;  %v2787_v29 = vrot.slane %v7836_v8, %v2786_v35 }
 0xe2c   :  { %v2652_v26 = vmul.f32 %v2646_v59, %v2532_v13  ;;  %v2606_v9 = vadd.f32 0.2548296, %v2600_v61  ;;  %v2645_v12 = vsub.f32 1.0, %v2639_v2  ;;  %v2599_v30 = vmul.f32 %v8016_v60, %v2593_v7 }
 0xe2d   :  { %6436 = vmatprep.mubr.f32.mxu0 %v2661_v5 }
 0xe2e   :  { %v2612_v10 = vmul.f32 %v8011_v45, %v2606_v9  ;;  %6437 = vmatmul.mubr.f32.vlgmr.msra.gmra.mxu0 %v2662_v0  ;;  %v2651_v56 = vmul.f32 %v2645_v12, %v2531_v4  ;;  %v2658_v20 = vadd.f32 1.0, %v2652_v26  ;;  %v2605_v16 = vadd.f32 0.2548296, %v2599_v30 }
 0xe30   :  { %v2642_v25 = vmul.f32 %v6899_v28, %v2612_v10  ;;  %v2657_v22 = vadd.f32 1.0, %v2651_v56  ;;  %v2611_v54 = vmul.f32 %v8016_v60, %v2605_v16  ;;  %v2664_v45 = vmul.f32 %v2658_v20, %v2514_v24  ;;  %v5647_v24 = vld [vmem:[%s8891_s4 + $0x28] sm:$0xff] }
 0xe31   :  { %v2516_v60 = vmul.f32 0.5, %v7996_v18 }
 0xe32   :  { %v2648_v37 = vsub.f32 1.0, %v2642_v25  ;;  %v2663_v38 = vmul.f32 %v2657_v22, %v2513_v21  ;;  %v2641_v17 = vmul.f32 %v6901_v31, %v2611_v54  ;;  %v5649_v22 = vld [vmem:[%s8891_s4 + $0x38] sm:$0xff]  ;;  %v5648_v31 = vld [vmem:[%s8891_s4 + $0x30] sm:$0xff]  ;;  %v5646_v54 = vld [vmem:[%s8891_s4 + $0x20] sm:$0xff] }
 0xe33   :  { %6445 = vmatprep.subr.mxu1 %v5649_v22 }
 0xe34   :  { %6439 = vmatprep.mubr.f32.mxu0 %v2663_v38  ;;  %v2654_v44 = vmul.f32 %v2648_v37, %v2534_v41  ;;  %v2647_v32 = vsub.f32 1.0, %v2641_v17  ;;  %6446 = vmatpush3.msra.mxu1 %v5649_v22 }
 0xe35   :  { %6440 = vmatmul.mubr.f32.gmra.mxu0 %v2664_v45  ;;  %6447 = vmatprep.subr.mxu1 %v5648_v31 }
 0xe36   :  { %v2653_v63 = vmul.f32 %v2647_v32, %v2533_v27  ;;  %v2660_v39 = vadd.f32 1.0, %v2654_v44  ;;  %6448 = vmatpush3.msra.mxu1 %v5648_v31 }
 0xe37   :  { %6449 = vmatprep.subr.mxu1 %v5647_v24 }
 0xe38   :  { %v2659_v1 = vadd.f32 1.0, %v2653_v63  ;;  %v2666_v51 = vmul.f32 %v2660_v39, %v2516_v60  ;;  %6450 = vmatpush3.msra.mxu1 %v5647_v24 }
 0xe39   :  { %6451 = vmatprep.subr.mxu1 %v5646_v54 }
 0xe3a   :  { %v2665_v46 = vmul.f32 %v2659_v1, %v2515_v11  ;;  %6452 = vmatpush3.msra.mxu1 %v5646_v54 }
 0xe3c   :  { %6442 = vmatprep.mubr.f32.mxu0 %v2665_v46 }
 0xe3d   :  { %6443 = vmatmul.mubr.f32.gmra.mxu0 %v2666_v51 }
 0xeee   :  { %v6438_v36 = vpop.f32.mrf.mxu0 }
 0xeef   :  { %v2779_v42 = vadd.f32 %v6438_v36, %v7842_v19 }
 0xef0   :  { %v2749_v58 = vpop.f32.mrf.mxu0 }
 0xef1   :  { %v8054_v50 = vadd.f32 %v2787_v29, %v2779_v42  ;;  %v2778_v15 = vadd.f32 %v2749_v58, %v7845_v14 }
 0xef3   :  { %v8057_v6 = vadd.f32 %v2787_v29, %v2778_v15  ;;  %v2799_v18 = vsel %vm187_vm1, %v8054_v50, 0.0  ;;  %v2821_v55 = vmul.f32 %v8054_v50, %v8054_v50 }
 0xef4   :  { %2800 = vadd.xlane.f32.xlu0 %v2799_v18 }
 0xef5   :  { %v6441_v59 = vpop.f32.mrf.mxu0  ;;  %v2796_v8 = vsel %vm187_vm1, %v8057_v6, 0.0  ;;  %v2820_v19 = vmul.f32 %v8057_v6, %v8057_v6  ;;  %v2829_v61 = vsel %vm187_vm1, %v2821_v55, 0.0 }
 0xef6   :  { %v2781_v40 = vadd.f32 %v6441_v59, %v7865_v48  ;;  %2797 = vadd.xlane.f32.xlu1 %v2796_v8 }
 0xef7   :  { %v2759_v14 = vpop.f32.mrf.mxu0  ;;  %v2826_v2 = vsel %vm187_vm1, %v2820_v19, 0.0 }
 0xef8   :  { %v8069_v52 = vadd.f32 %v2787_v29, %v2781_v40  ;;  %v2780_v13 = vadd.f32 %v2759_v14, %v7854_v33  ;;  %2830 = vadd.xlane.f32.xlu0 %v2829_v61 }
 0xefa   :  { %v8073_v5 = vadd.f32 %v2787_v29, %v2780_v13  ;;  %2827 = vadd.xlane.f32.xlu1 %v2826_v2  ;;  %v2805_v26 = vsel %vm187_vm1, %v8069_v52, 0.0  ;;  %v2823_v48 = vmul.f32 %v8069_v52, %v8069_v52 }
 0xefc   :  { %2806 = vadd.xlane.f32.xlu0 %v2805_v26  ;;  %v2802_v7 = vsel %vm187_vm1, %v8073_v5, 0.0  ;;  %v2822_v9 = vmul.f32 %v8073_v5, %v8073_v5  ;;  %v2835_v12 = vsel %vm187_vm1, %v2823_v48, 0.0 }
 0xefd   :  { %v6444_v33 = vpop.f32.mrf.mxu0 }
 0xefe   :  { %2803 = vadd.xlane.f32.xlu1 %v2802_v7  ;;  %v2783_v0 = vadd.f32 %v6444_v33, %v7880_v3  ;;  %v2832_v10 = vsel %vm187_vm1, %v2822_v9, 0.0 }
 0xeff   :  { %v2769_v28 = vpop.f32.mrf.mxu0 }
 0xf00   :  { %2836 = vadd.xlane.f32.xlu0 %v2835_v12  ;;  %v8085_v4 = vadd.f32 %v2787_v29, %v2783_v0  ;;  %v2782_v30 = vadd.f32 %v2769_v28, %v7867_v53 }
 0xf02   :  { %2833 = vadd.xlane.f32.xlu1 %v2832_v10  ;;  %v8089_v56 = vadd.f32 %v2787_v29, %v2782_v30  ;;  %v2811_v20 = vsel %vm187_vm1, %v8085_v4, 0.0  ;;  %v2825_v16 = vmul.f32 %v8085_v4, %v8085_v4 }
 0xf04   :  { %2812 = vadd.xlane.f32.xlu0 %v2811_v20  ;;  %v2808_v3 = vsel %vm187_vm1, %v8089_v56, 0.0  ;;  %v2824_v25 = vmul.f32 %v8089_v56, %v8089_v56  ;;  %v2841_v53 = vsel %vm187_vm1, %v2825_v16, 0.0 }
 0xf06   :  { %2809 = vadd.xlane.f32.xlu1 %v2808_v3  ;;  %v2838_v21 = vsel %vm187_vm1, %v2824_v25, 0.0  ;;  %v5645_v25 = vld [vmem:[%s8894_s7 + $0x8] sm:$0x3f] }
 0xf07   :  { %v2895_v24 = vrot.slane %v5645_v25, %v7287_v34 }
 0xf08   :  { %2842 = vadd.xlane.f32.xlu0 %v2841_v53 }
 0xf0a   :  { %2839 = vadd.xlane.f32.xlu1 %v2838_v21 }
 0xf7d   :  { %v2801_v37 = vpop.xlane.xlu0 %2800 }
 0xf7e   :  { %v2815_v38 = vmul.f32 0.03125, %v2801_v37 }
 0xf7f   :  { %v2798_v41 = vpop.xlane.xlu1 %2797 }
 0xf80   :  { %v2814_v45 = vmul.f32 0.03125, %v2798_v41  ;;  %v2851_v44 = vmul.f32 %v2815_v38, %v2815_v38  ;;  %v2869_v53 = vsub.f32 %v8054_v50, %v2815_v38 }
 0xf81   :  { %v2831_v17 = vpop.xlane.xlu0 %2830 }
 0xf82   :  { %v2845_v32 = vmul.f32 0.03125, %v2831_v17  ;;  %v2850_v63 = vmul.f32 %v2814_v45, %v2814_v45  ;;  %v2868_v54 = vsub.f32 %v8057_v6, %v2814_v45 }
 0xf83   :  { %v2828_v27 = vpop.xlane.xlu1 %2827 }
 0xf84   :  { %v2857_v39 = vsub.f32 %v2845_v32, %v2851_v44  ;;  %v2844_v11 = vmul.f32 0.03125, %v2828_v27 }
 0xf85   :  { %v2807_v1 = vpop.xlane.xlu0 %2806 }
 0xf86   :  { %v2863_v60 = vmax.f32 %v2857_v39, 0.0  ;;  %v2856_v46 = vsub.f32 %v2844_v11, %v2850_v63  ;;  %v2817_v51 = vmul.f32 0.03125, %v2807_v1  ;;  %v2905_v63 = vrot.slane %v5645_v25, %v7295_v47 }
 0xf87   :  { %v2804_v29 = vpop.xlane.xlu1 %2803 }
 0xf88   :  { %v2875_v36 = vadd.f32 1e-06, %v2863_v60  ;;  %v2862_v42 = vmax.f32 %v2856_v46, 0.0  ;;  %v2816_v58 = vmul.f32 0.03125, %v2804_v29  ;;  %v2853_v55 = vmul.f32 %v2817_v51, %v2817_v51 }
 0xf89   :  { %v2837_v15 = vpop.xlane.xlu0 %2836  ;;  %v2871_v38 = vsub.f32 %v8069_v52, %v2817_v51 }
 0xf8a   :  { %6902 = vrsqrt.f32 %v2875_v36  ;;  %v2874_v18 = vadd.f32 1e-06, %v2862_v42  ;;  %v2847_v59 = vmul.f32 0.03125, %v2837_v15  ;;  %v2852_v19 = vmul.f32 %v2816_v58, %v2816_v58 }
 0xf8b   :  { %v2834_v8 = vpop.xlane.xlu1 %2833  ;;  %v2870_v29 = vsub.f32 %v8073_v5, %v2816_v58 }
 0xf8c   :  { %6904 = vrsqrt.f32 %v2874_v18  ;;  %v2859_v40 = vsub.f32 %v2847_v59, %v2853_v55  ;;  %v2846_v14 = vmul.f32 0.03125, %v2834_v8 }
 0xf8d   :  { %v2813_v61 = vpop.xlane.xlu0 %2812 }
 0xf8e   :  { %v2865_v13 = vmax.f32 %v2859_v40, 0.0  ;;  %v2858_v2 = vsub.f32 %v2846_v14, %v2852_v19  ;;  %v2819_v26 = vmul.f32 0.03125, %v2813_v61 }
 0xf8f   :  { %v2810_v48 = vpop.xlane.xlu1 %2809 }
 0xf90   :  { %v2877_v7 = vadd.f32 1e-06, %v2865_v13  ;;  %v2864_v9 = vmax.f32 %v2858_v2, 0.0  ;;  %v2818_v33 = vmul.f32 0.03125, %v2810_v48  ;;  %v2855_v28 = vmul.f32 %v2819_v26, %v2819_v26 }
 0xf91   :  { %v2843_v0 = vpop.xlane.xlu0 %2842  ;;  %v2873_v55 = vsub.f32 %v8085_v4, %v2819_v26 }
 0xf92   :  { %6906 = vrsqrt.f32 %v2877_v7  ;;  %v2876_v12 = vadd.f32 1e-06, %v2864_v9  ;;  %v2849_v30 = vmul.f32 0.03125, %v2843_v0  ;;  %v2854_v20 = vmul.f32 %v2818_v33, %v2818_v33  ;;  %v5651_v7 = vld [vmem:[%s8892_s5 + $0x1] ss:$0 sm:$0xff] }
 0xf93   :  { %v2840_v10 = vpop.xlane.xlu1 %2839  ;;  %v2872_v51 = vsub.f32 %v8089_v56, %v2818_v33 }
 0xf94   :  { %6908 = vrsqrt.f32 %v2876_v12  ;;  %v2861_v16 = vsub.f32 %v2849_v30, %v2855_v28  ;;  %v2848_v3 = vmul.f32 0.03125, %v2840_v10 }
 0xf96   :  { %v2867_v21 = vmax.f32 %v2861_v16, 0.0  ;;  %v2860_v22 = vsub.f32 %v2848_v3, %v2854_v20 }
 0xf97   :  { %v6903_v31 = vpop.eup %6902 }
 0xf98   :  { %v2887_v37 = vmul.f32 %v6903_v31, %v2869_v53  ;;  %v2879_v41 = vadd.f32 1e-06, %v2867_v21  ;;  %v2866_v17 = vmax.f32 %v2860_v22, 0.0 }
 0xf99   :  { %v6905_v44 = vpop.eup %6904 }
 0xf9a   :  { %6910 = vrsqrt.f32 %v2879_v41  ;;  %v2878_v32 = vadd.f32 1e-06, %v2866_v17  ;;  %v2886_v27 = vmul.f32 %v6905_v44, %v2868_v54  ;;  %v2897_v39 = vmul.f32 %v2895_v24, %v2887_v37 }
 0xf9c   :  { %6912 = vrsqrt.f32 %v2878_v32  ;;  %v2896_v11 = vmul.f32 %v2895_v24, %v2886_v27  ;;  %v2907_v46 = vadd.f32 %v2905_v63, %v2897_v39 }
 0xf9e   :  { %v2906_v1 = vadd.f32 %v2905_v63, %v2896_v11  ;;  %v8204_v11 = vld [vmem:[%s8888_s1 + $0x8] sm:$0xff] }
 0xf9f   :  { %v6907_v60 = vpop.eup %6906 }
 0xfa0   :  { %6453 = vmatprep.mubr.msk.f32.mxu1 %vm187_vm1, %v2906_v1  ;;  %v2889_v45 = vmul.f32 %v6907_v60, %v2871_v38  ;;  %v8210_v60 = vld [vmem:[%s8888_s1] sm:$0xff] }
 0xfa1   :  { %v6909_v36 = vpop.eup %6908  ;;  %6454 = vmatmul.mubr.msk.f32.vlgmr.msra.gmra.mxu1 %vm187_vm1, %v2907_v46 }
 0xfa2   :  { %v2888_v42 = vmul.f32 %v6909_v36, %v2870_v29  ;;  %v2899_v15 = vmul.f32 %v2895_v24, %v2889_v45  ;;  %v8217_v36 = vld [vmem:[%s8888_s1 + $0x18] sm:$0xff] }
 0xfa4   :  { %v2898_v18 = vmul.f32 %v2895_v24, %v2888_v42  ;;  %v2909_v19 = vadd.f32 %v2905_v63, %v2899_v15 }
 0xfa6   :  { %v2908_v59 = vadd.f32 %v2905_v63, %v2898_v18 }
 0xfa7   :  { %v6911_v8 = vpop.eup %6910 }
 0xfa8   :  { %6456 = vmatprep.mubr.msk.f32.mxu1 %vm187_vm1, %v2908_v59  ;;  %v2891_v40 = vmul.f32 %v6911_v8, %v2873_v55  ;;  %v8224_v59 = vld [vmem:[%s8888_s1 + $0x10] sm:$0xff] }
 0xfa9   :  { %v6913_v58 = vpop.eup %6912  ;;  %6457 = vmatmul.mubr.msk.f32.gmra.mxu1 %vm187_vm1, %v2909_v19 }
 0xfaa   :  { %v2890_v14 = vmul.f32 %v6913_v58, %v2872_v51  ;;  %v2901_v61 = vmul.f32 %v2895_v24, %v2891_v40  ;;  %v8231_v40 = vld [vmem:[%s8888_s1 + $0x20] sm:$0xff] }
 0xfac   :  { %v2900_v13 = vmul.f32 %v2895_v24, %v2890_v14  ;;  %v2911_v48 = vadd.f32 %v2905_v63, %v2901_v61  ;;  %v8237_v14 = vld [vmem:[%s8888_s1 + $0x28] sm:$0xff] }
 0xfae   :  { %v2910_v2 = vadd.f32 %v2905_v63, %v2900_v13 }
 0xfb0   :  { %6459 = vmatprep.mubr.msk.f32.mxu1 %vm187_vm1, %v2910_v2 }
 0xfb1   :  { %6460 = vmatmul.mubr.msk.f32.gmra.mxu1 %vm187_vm1, %v2911_v48 }
0x1061   :  { %v6455_v26 = vpop.f32.mrf.mxu1 }
0x1062   :  { %v8147_v3 = vadd.f32 %v6455_v26, %v5651_v7 }
0x1063   :  { %v3009_v9 = vpop.f32.mrf.mxu1 }
0x1064   :  { %v8133_v33 = vadd.f32 %v5651_v7, %v3009_v9 }
0x1066   :  { %6474 = vmatprep.mubr.msk.f32.mxu1 %vm447_vm2, %v8133_v33 }
0x1069   :  { %v6458_v0 = vpop.f32.mrf.mxu1 }
0x106a   :  { %v8143_v16 = vadd.f32 %v6458_v0, %v5651_v7 }
0x106b   :  { %v3019_v12 = vpop.f32.mrf.mxu1 }
0x106c   :  { %v8151_v25 = vadd.f32 %v5651_v7, %v3019_v12 }
0x1071   :  { %v6461_v28 = vpop.f32.mrf.mxu1 }
0x1072   :  { %v8137_v30 = vadd.f32 %v6461_v28, %v5651_v7 }
0x1073   :  { %v3029_v10 = vpop.f32.mrf.mxu1 }
0x1074   :  { %v8139_v20 = vadd.f32 %v5651_v7, %v3029_v10  ;;  %3054 = vrot.lane.b32.xlu1 %v8137_v30, %s7080_s24 }
0x1076   :  { %3052 = vrot.lane.b32.xlu0 %v8139_v20, %s7080_s24 }
0x1078   :  { %3050 = vrot.lane.b32.xlu1 %v8143_v16, %s7080_s24 }
0x107a   :  { %3046 = vrot.lane.b32.xlu0 %v8147_v3, %s7080_s24 }
0x107c   :  { %3048 = vrot.lane.b32.xlu1 %v8151_v25, %s7080_s24 }
0x107e   :  { %3245 = vrot.lane.b32.xlu0 %v8151_v25, %s7081_s25 }
0x1080   :  { %3044 = vrot.lane.b32.xlu1 %v8133_v33, %s7080_s24 }
0x1082   :  { %3396 = vrot.lane.b32.xlu0 %v8137_v30, %s7082_s26 }
0x1084   :  { %3251 = vrot.lane.b32.xlu1 %v8137_v30, %s7081_s25 }
0x1086   :  { %3249 = vrot.lane.b32.xlu0 %v8139_v20, %s7081_s25 }
0x1088   :  { %3247 = vrot.lane.b32.xlu1 %v8143_v16, %s7081_s25 }
0x108c   :  { %3243 = vrot.lane.b32.xlu1 %v8147_v3, %s7081_s25 }
0x1090   :  { %3241 = vrot.lane.b32.xlu1 %v8133_v33, %s7081_s25 }
0x1094   :  { %3394 = vrot.lane.b32.xlu1 %v8139_v20, %s7082_s26 }
0x10e6   :  { %v3055_v53 = vpop.permute.xlu1 %3054 }
0x10e7   :  { %6462 = vmatprep.subr.msk.mxu1 %vm447_vm2, %v3055_v53 }
0x10e8   :  { %6463 = vmatpush3.xpose.msk.msra.mxu1 %vm447_vm2, %v3055_v53  ;;  %v3053_v21 = vpop.permute.xlu0 %3052 }
0x10e9   :  { %6464 = vmatprep.subr.msk.mxu1 %vm447_vm2, %v3053_v21 }
0x10ea   :  { %v3051_v22 = vpop.permute.xlu1 %3050 }
0x10ec   :  { %6465 = vmatpush3.xpose.msk.msra.mxu1 %vm447_vm2, %v3053_v21  ;;  %v3047_v31 = vpop.permute.xlu0 %3046 }
0x10ed   :  { %6466 = vmatprep.subr.msk.mxu1 %vm447_vm2, %v3051_v22 }
0x10ee   :  { %v3049_v24 = vpop.permute.xlu1 %3048 }
0x10f0   :  { %6467 = vmatpush3.xpose.msk.msra.mxu1 %vm447_vm2, %v3051_v22  ;;  %v3246_v54 = vpop.permute.xlu0 %3245 }
0x10f1   :  { %6468 = vmatprep.subr.msk.mxu1 %vm447_vm2, %v3049_v24 }
0x10f2   :  { %v3045_v37 = vpop.permute.xlu1 %3044 }
0x10f4   :  { %6469 = vmatpush3.xpose.msk.msra.mxu1 %vm447_vm2, %v3049_v24  ;;  %v8183_v41 = vpop.permute.xlu0 %3396 }
0x10f5   :  { %6470 = vmatprep.subr.msk.mxu1 %vm447_vm2, %v3047_v31 }
0x10f6   :  { %v3252_v17 = vpop.permute.xlu1 %3251 }
0x10f7   :  { %6483 = vmatprep.subr.mxu0 %v3252_v17 }
0x10f8   :  { %6471 = vmatpush3.xpose.msk.msra.mxu1 %vm447_vm2, %v3047_v31  ;;  %6484 = vmatpush3.msra.mxu0 %v3252_v17  ;;  %v3250_v44 = vpop.permute.xlu0 %3249 }
0x10f9   :  { %6472 = vmatprep.subr.msk.mxu1 %vm447_vm2, %v3045_v37  ;;  %6485 = vmatprep.subr.mxu0 %v3250_v44 }
0x10fa   :  { %v3248_v32 = vpop.permute.xlu1 %3247  ;;  %6486 = vmatpush3.msra.mxu0 %v3250_v44 }
0x10fb   :  { %6487 = vmatprep.subr.mxu0 %v3248_v32 }
0x10fc   :  { %6473 = vmatpush3.xpose.msk.msra.mxu1 %vm447_vm2, %v3045_v37  ;;  %6488 = vmatpush3.msra.mxu0 %v3248_v32 }
0x10fd   :  { %6489 = vmatprep.subr.mxu0 %v3246_v54 }
0x10fe   :  { %v3244_v27 = vpop.permute.xlu1 %3243  ;;  %6490 = vmatpush3.msra.mxu0 %v3246_v54 }
0x10ff   :  { %6475 = vmatmul.mubr.msk.f32.vlgmr.msra.gmra.mxu1 %vm447_vm2, %v8147_v3  ;;  %6491 = vmatprep.subr.mxu0 %v3244_v27 }
0x1100   :  { %6477 = vmatprep.mubr.msk.f32.mxu1 %vm447_vm2, %v8151_v25  ;;  %6492 = vmatpush3.msra.mxu0 %v3244_v27 }
0x1102   :  { %v3242_v63 = vpop.permute.xlu1 %3241 }
0x1103   :  { %6478 = vmatmul.mubr.msk.f32.gmra.mxu1 %vm447_vm2, %v8143_v16  ;;  %6493 = vmatprep.subr.mxu0 %v3242_v63 }
0x1104   :  { %6480 = vmatprep.mubr.msk.f32.mxu1 %vm447_vm2, %v8139_v20  ;;  %6494 = vmatpush3.msra.mxu0 %v3242_v63 }
0x1105   :  { %6504 = vmatprep.subr.msk.mxu0 %vm447_vm2, %v8183_v41 }
0x1106   :  { %v8247_v26 = vpop.permute.xlu1 %3394 }
0x1107   :  { %6481 = vmatmul.mubr.msk.f32.gmra.mxu1 %vm447_vm2, %v8137_v30 }
0x11bf   :  { %v6476_v39 = vpop.f32.mrf.mxu1 }
0x11c0   :  { %v3152_v38 = vadd.f32 %v8204_v11, %v6476_v39 }
0x11c1   :  { %v3146_v1 = vpop.f32.mrf.mxu1 }
0x11c2   :  { %v3147_v46 = vadd.f32 %v8210_v60, %v3146_v1  ;;  %v3178_v29 = vsel %vm72_vm0, %v3152_v38, -inf }
0x11c3   :  { %3179 = vmax.xlane.f32.xlu1 %v3178_v29  ;;  %v6479_v45 = vpop.f32.mrf.mxu1 }
0x11c4   :  { %v3162_v42 = vadd.f32 %v8217_v36, %v6479_v45  ;;  %v3175_v15 = vsel %vm72_vm0, %v3147_v46, -inf }
0x11c5   :  { %v3156_v18 = vpop.f32.mrf.mxu1  ;;  %3176 = vmax.xlane.f32.xlu0 %v3175_v15 }
0x11c6   :  { %v3157_v8 = vadd.f32 %v8224_v59, %v3156_v18  ;;  %v3184_v19 = vsel %vm72_vm0, %v3162_v42, -inf }
0x11c7   :  { %v6482_v55 = vpop.f32.mrf.mxu1 }
0x11c8   :  { %v3172_v61 = vadd.f32 %v8237_v14, %v6482_v55  ;;  %v3181_v2 = vsel %vm72_vm0, %v3157_v8, -inf }
0x11c9   :  { %v3166_v51 = vpop.f32.mrf.mxu1  ;;  %3185 = vmax.xlane.f32.xlu0 %v3184_v19 }
0x11ca   :  { %v3167_v58 = vadd.f32 %v8231_v40, %v3166_v51  ;;  %v3190_v48 = vsel %vm72_vm0, %v3172_v61, -inf }
0x11cc   :  { %v3187_v13 = vsel %vm72_vm0, %v3167_v58, -inf }
0x11cd   :  { %3188 = vmax.xlane.f32.xlu1 %v3187_v13  ;;  %3182 = vmax.xlane.f32.xlu0 %v3181_v2 }
0x11d1   :  { %3191 = vmax.xlane.f32.xlu0 %v3190_v48 }
0x11de   :  { %3390 = vrot.lane.b32.xlu1 %v8151_v25, %s7082_s26 }
0x11e7   :  { %3392 = vrot.lane.b32.xlu0 %v8143_v16, %s7082_s26 }
0x124c   :  { %v3180_v7 = vpop.xlane.xlu1 %3179 }
0x124d   :  { %v3194_v9 = vsub.f32 %v3152_v38, %v3180_v7 }
0x124e   :  { %v3177_v0 = vpop.xlane.xlu0 %3176 }
0x124f   :  { %v3201_v12 = vmul.f32 1.442695, %v3194_v9  ;;  %v3193_v28 = vsub.f32 %v3147_v46, %v3177_v0 }
0x1251   :  { %6914 = vpow2.f32 %v3201_v12  ;;  %v3199_v10 = vmul.f32 1.442695, %v3193_v28 }
0x1252   :  { %v3186_v24 = vpop.xlane.xlu0 %3185 }
0x1253   :  { %6916 = vpow2.f32 %v3199_v10  ;;  %v3196_v37 = vsub.f32 %v3162_v42, %v3186_v24 }
0x1255   :  { %v3205_v27 = vmul.f32 1.442695, %v3196_v37 }
0x1256   :  { %v3183_v54 = vpop.xlane.xlu0 %3182  ;;  %v3189_v32 = vpop.xlane.xlu1 %3188 }
0x1257   :  { %v3195_v44 = vsub.f32 %v3157_v8, %v3183_v54  ;;  %v3197_v39 = vsub.f32 %v3167_v58, %v3189_v32  ;;  %6918 = vpow2.f32 %v3205_v27 }
0x1259   :  { %v3203_v38 = vmul.f32 1.442695, %v3195_v44  ;;  %v3207_v46 = vmul.f32 1.442695, %v3197_v39 }
0x125a   :  { %v3192_v17 = vpop.xlane.xlu0 %3191  ;;  %v3391_v58 = vpop.permute.xlu1 %3390 }
0x125b   :  { %v3198_v63 = vsub.f32 %v3172_v61, %v3192_v17  ;;  %6920 = vpow2.f32 %v3203_v38  ;;  %v5676_v38 = vld [vmem:[%s8893_s6 + $0x20] sm:$0xff] }
0x125d   :  { %v3209_v1 = vmul.f32 1.442695, %v3198_v63 }
0x125e   :  { %v6915_v53 = vpop.eup %6914  ;;  %v3393_v51 = vpop.permute.xlu0 %3392 }
0x125f   :  { %v3214_v21 = vsel %vm72_vm0, %v6915_v53, 0.0  ;;  %6922 = vpow2.f32 %v3209_v1 }
0x1260   :  { %v6917_v22 = vpop.eup %6916  ;;  %3215 = vadd.xlane.f32.xlu0 %v3214_v21  ;;  %6924 = vpow2.f32 %v3207_v46 }
0x1261   :  { %v3211_v31 = vsel %vm72_vm0, %v6917_v22, 0.0 }
0x1262   :  { %3212 = vadd.xlane.f32.xlu1 %v3211_v31 }
0x1264   :  { %v6919_v29 = vpop.eup %6918 }
0x1265   :  { %v3220_v15 = vsel %vm72_vm0, %v6919_v29, 0.0 }
0x1268   :  { %v6921_v45 = vpop.eup %6920 }
0x1269   :  { %v3217_v42 = vsel %vm72_vm0, %v6921_v45, 0.0 }
0x126c   :  { %v6923_v18 = vpop.eup %6922 }
0x126d   :  { %v6925_v55 = vpop.eup %6924  ;;  %v3226_v8 = vsel %vm72_vm0, %v6923_v18, 0.0 }
0x126e   :  { %v3223_v19 = vsel %vm72_vm0, %v6925_v55, 0.0 }
0x1273   :  { %3386 = vrot.lane.b32.xlu1 %v8133_v33, %s7082_s26 }
0x1276   :  { %3388 = vrot.lane.b32.xlu0 %v8147_v3, %s7082_s26 }
0x1295   :  { %3221 = vadd.xlane.f32.xlu0 %v3220_v15 }
0x1297   :  { %3218 = vadd.xlane.f32.xlu1 %v3217_v42 }
0x1299   :  { %3227 = vadd.xlane.f32.xlu0 %v3226_v8 }
0x129b   :  { %3224 = vadd.xlane.f32.xlu1 %v3223_v19 }
0x12ac   :  { %3376 = vrot.lane.b32.xlu1 %v8147_v3, %s7083_s21 }
0x12af   :  { %3374 = vrot.lane.b32.xlu0 %v8133_v33, %s7083_s21 }
0x12b0   :  { %3380 = vrot.lane.b32.xlu1 %v8143_v16, %s7083_s21 }
0x12b3   :  { %3378 = vrot.lane.b32.xlu0 %v8151_v25, %s7083_s21 }
0x12b4   :  { %3384 = vrot.lane.b32.xlu1 %v8137_v30, %s7083_s21 }
0x12b7   :  { %3382 = vrot.lane.b32.xlu0 %v8139_v20, %s7083_s21 }
0x12e9   :  { %v3216_v61 = vpop.xlane.xlu0 %3215 }
0x12ea   :  { %6926 = vrcp.f32 %v3216_v61 }
0x12eb   :  { %v3213_v13 = vpop.xlane.xlu1 %3212 }
0x12ec   :  { %6928 = vrcp.f32 %v3213_v13 }
0x12ed   :  { %v3389_v0 = vpop.permute.xlu0 %3388 }
0x12ef   :  { %v3387_v12 = vpop.permute.xlu1 %3386 }
0x12f7   :  { %v6927_v2 = vpop.eup %6926 }
0x12f8   :  { %v3236_v9 = vmul.f32 %v6927_v2, %v6915_v53 }
0x12f9   :  { %v6929_v48 = vpop.eup %6928 }
0x12fa   :  { %v3235_v7 = vmul.f32 %v6929_v48, %v6917_v22 }
0x12fc   :  { %6495 = vmatprep.mubr.msk.f32.mxu0 %vm72_vm0, %v3235_v7 }
0x12fd   :  { %6496 = vmatmul.mubr.msk.f32.vlgmr.msra.gmra.mxu0 %vm72_vm0, %v3236_v9 }
0x12fe   :  { %6505 = vmatpush3.xpose.msk.msra.mxu0 %vm447_vm2, %v8183_v41 }
0x12ff   :  { %6506 = vmatprep.subr.msk.mxu0 %vm447_vm2, %v8247_v26 }
0x1302   :  { %6507 = vmatpush3.xpose.msk.msra.mxu0 %vm447_vm2, %v8247_v26 }
0x1303   :  { %6508 = vmatprep.subr.msk.mxu0 %vm447_vm2, %v3393_v51 }
0x1306   :  { %6509 = vmatpush3.xpose.msk.msra.mxu0 %vm447_vm2, %v3393_v51 }
0x1307   :  { %6510 = vmatprep.subr.msk.mxu0 %vm447_vm2, %v3391_v58 }
0x130a   :  { %6511 = vmatpush3.xpose.msk.msra.mxu0 %vm447_vm2, %v3391_v58 }
0x130b   :  { %6512 = vmatprep.subr.msk.mxu0 %vm447_vm2, %v3389_v0 }
0x130e   :  { %6513 = vmatpush3.xpose.msk.msra.mxu0 %vm447_vm2, %v3389_v0 }
0x130f   :  { %6514 = vmatprep.subr.msk.mxu0 %vm447_vm2, %v3387_v12 }
0x1312   :  { %6515 = vmatpush3.xpose.msk.msra.mxu0 %vm447_vm2, %v3387_v12 }
0x1313   :  { %6557 = vmatprep.subr.mxu0 %v5676_v38 }
0x131e   :  { %v3222_v41 = vpop.xlane.xlu0 %3221 }
0x131f   :  { %6930 = vrcp.f32 %v3222_v41 }
0x1320   :  { %v3219_v26 = vpop.xlane.xlu1 %3218 }
0x1321   :  { %6932 = vrcp.f32 %v3219_v26 }
0x1322   :  { %v3228_v28 = vpop.xlane.xlu0 %3227 }
0x1323   :  { %6934 = vrcp.f32 %v3228_v28 }
0x1324   :  { %v3225_v10 = vpop.xlane.xlu1 %3224 }
0x1325   :  { %6936 = vrcp.f32 %v3225_v10 }
0x1326   :  { %v3375_v37 = vpop.permute.xlu0 %3374 }
0x1328   :  { %v3377_v32 = vpop.permute.xlu1 %3376 }
0x132a   :  { %v3379_v27 = vpop.permute.xlu0 %3378 }
0x132c   :  { %v6931_v53 = vpop.eup %6930  ;;  %v3381_v63 = vpop.permute.xlu1 %3380 }
0x132d   :  { %v3238_v31 = vmul.f32 %v6931_v53, %v6919_v29 }
0x132e   :  { %v6933_v21 = vpop.eup %6932  ;;  %v3383_v39 = vpop.permute.xlu0 %3382 }
0x132f   :  { %v3237_v22 = vmul.f32 %v6933_v21, %v6921_v45 }
0x1330   :  { %v6935_v24 = vpop.eup %6934  ;;  %v3385_v1 = vpop.permute.xlu1 %3384 }
0x1331   :  { %6498 = vmatprep.mubr.msk.f32.mxu0 %vm72_vm0, %v3237_v22  ;;  %v3240_v44 = vmul.f32 %v6935_v24, %v6923_v18 }
0x1332   :  { %v6937_v54 = vpop.eup %6936  ;;  %6499 = vmatmul.mubr.msk.f32.gmra.mxu0 %vm72_vm0, %v3238_v31 }
0x1333   :  { %v3239_v17 = vmul.f32 %v6937_v54, %v6925_v55 }
0x1335   :  { %6501 = vmatprep.mubr.msk.f32.mxu0 %vm72_vm0, %v3239_v17 }
0x1336   :  { %6502 = vmatmul.mubr.msk.f32.gmra.mxu0 %vm72_vm0, %v3240_v44 }
0x1337   :  { %6516 = vmatprep.mubr.msk.f32.mxu0 %vm447_vm2, %v3375_v37 }
0x133a   :  { %6517 = vmatmul.mubr.msk.f32.vlgmr.msra.gmra.mxu0 %vm447_vm2, %v3377_v32 }
0x133b   :  { %6519 = vmatprep.mubr.msk.f32.mxu0 %vm447_vm2, %v3379_v27  ;;  %6558 = vmatpush3.msra.mxu0 %v5676_v38 }
0x133e   :  { %6520 = vmatmul.mubr.msk.f32.gmra.mxu0 %vm447_vm2, %v3381_v63 }
0x133f   :  { %6522 = vmatprep.mubr.msk.f32.mxu0 %vm447_vm2, %v3383_v39 }
0x1342   :  { %6523 = vmatmul.mubr.msk.f32.gmra.mxu0 %vm447_vm2, %v3385_v1 }
0x13bd   :  { %v6497_v46 = vpop.f32.mrf.mxu0 }
0x13bf   :  { %v3343_v29 = vpop.f32.mrf.mxu0 }
0x13c0   :  { %6559 = vmatprep.mubr.msk.f32.mxu0 %vm447_vm2, %v3343_v29 }
0x13c1   :  { %6560 = vmatmul.mubr.msk.f32.vlgmr.msra.gmra.mxu0 %vm447_vm2, %v6497_v46 }
0x13f2   :  { %v6500_v45 = vpop.f32.mrf.mxu0 }
0x13f4   :  { %v3353_v15 = vpop.f32.mrf.mxu0 }
0x13f5   :  { %6562 = vmatprep.mubr.msk.f32.mxu0 %vm447_vm2, %v3353_v15 }
0x13f6   :  { %v6503_v18 = vpop.f32.mrf.mxu0  ;;  %6563 = vmatmul.mubr.msk.f32.gmra.mxu0 %vm447_vm2, %v6500_v45 }
0x13f8   :  { %v3363_v42 = vpop.f32.mrf.mxu0 }
0x13f9   :  { %6565 = vmatprep.mubr.msk.f32.mxu0 %vm447_vm2, %v3363_v42 }
0x13fa   :  { %v6518_v55 = vpop.f32.mrf.mxu0  ;;  %6566 = vmatmul.mubr.msk.f32.gmra.mxu0 %vm447_vm2, %v6503_v18 }
0x13fb   :  { %v3494_v8 = vadd.f32 %v8204_v11, %v6518_v55 }
0x13fc   :  { %v3488_v19 = vpop.f32.mrf.mxu0 }
0x13fd   :  { %v3489_v51 = vadd.f32 %v8210_v60, %v3488_v19  ;;  %v3520_v58 = vsel %vm72_vm0, %v3494_v8, -inf }
0x13fe   :  { %3521 = vmax.xlane.f32.xlu1 %v3520_v58  ;;  %v6521_v61 = vpop.f32.mrf.mxu0 }
0x13ff   :  { %v3504_v13 = vadd.f32 %v8217_v36, %v6521_v61  ;;  %v3517_v2 = vsel %vm72_vm0, %v3489_v51, -inf }
0x1400   :  { %3518 = vmax.xlane.f32.xlu0 %v3517_v2  ;;  %v3498_v48 = vpop.f32.mrf.mxu0 }
0x1401   :  { %v3499_v9 = vadd.f32 %v8224_v59, %v3498_v48  ;;  %v3526_v0 = vsel %vm72_vm0, %v3504_v13, -inf }
0x1402   :  { %v6524_v7 = vpop.f32.mrf.mxu0 }
0x1403   :  { %v3514_v26 = vadd.f32 %v8237_v14, %v6524_v7  ;;  %v3523_v28 = vsel %vm72_vm0, %v3499_v9, -inf }
0x1404   :  { %3527 = vmax.xlane.f32.xlu0 %v3526_v0  ;;  %v3508_v12 = vpop.f32.mrf.mxu0 }
0x1405   :  { %v3509_v41 = vadd.f32 %v8231_v40, %v3508_v12  ;;  %v3532_v53 = vsel %vm72_vm0, %v3514_v26, -inf }
0x1407   :  { %v3529_v10 = vsel %vm72_vm0, %v3509_v41, -inf }
0x1408   :  { %3524 = vmax.xlane.f32.xlu0 %v3523_v28  ;;  %3530 = vmax.xlane.f32.xlu1 %v3529_v10 }
0x140c   :  { %3533 = vmax.xlane.f32.xlu0 %v3532_v53 }
0x1487   :  { %v3522_v21 = vpop.xlane.xlu1 %3521 }
0x1488   :  { %v3536_v22 = vsub.f32 %v3494_v8, %v3522_v21 }
0x1489   :  { %v3519_v31 = vpop.xlane.xlu0 %3518 }
0x148a   :  { %v3543_v24 = vmul.f32 1.442695, %v3536_v22  ;;  %v3535_v54 = vsub.f32 %v3489_v51, %v3519_v31 }
0x148c   :  { %6938 = vpow2.f32 %v3543_v24  ;;  %v3541_v37 = vmul.f32 1.442695, %v3535_v54 }
0x148d   :  { %v3528_v17 = vpop.xlane.xlu0 %3527 }
0x148e   :  { %6940 = vpow2.f32 %v3541_v37  ;;  %v3538_v44 = vsub.f32 %v3504_v13, %v3528_v17 }
0x1490   :  { %v3547_v32 = vmul.f32 1.442695, %v3538_v44 }
0x1491   :  { %v3525_v27 = vpop.xlane.xlu0 %3524  ;;  %v3531_v19 = vpop.xlane.xlu1 %3530 }
0x1492   :  { %6942 = vpow2.f32 %v3547_v32  ;;  %v3537_v63 = vsub.f32 %v3499_v9, %v3525_v27  ;;  %v3539_v58 = vsub.f32 %v3509_v41, %v3531_v19  ;;  %v5695_v32 = vld [vmem:[%s8893_s6 + $0x28] sm:$0xff] }
0x1494   :  { %v3545_v39 = vmul.f32 1.442695, %v3537_v63  ;;  %v3549_v61 = vmul.f32 1.442695, %v3539_v58 }
0x1495   :  { %v3534_v55 = vpop.xlane.xlu0 %3533 }
0x1496   :  { %6944 = vpow2.f32 %v3545_v39  ;;  %v3540_v8 = vsub.f32 %v3514_v26, %v3534_v55 }
0x1498   :  { %v3551_v51 = vmul.f32 1.442695, %v3540_v8 }
0x1499   :  { %v8318_v38 = vpop.eup %6938 }
0x149a   :  { %v3556_v1 = vsel %vm72_vm0, %v8318_v38, 0.0  ;;  %6946 = vpow2.f32 %v3551_v51 }
0x149b   :  { %v8322_v46 = vpop.eup %6940  ;;  %3557 = vadd.xlane.f32.xlu0 %v3556_v1  ;;  %6948 = vpow2.f32 %v3549_v61 }
0x149c   :  { %v3553_v29 = vsel %vm72_vm0, %v8322_v46, 0.0 }
0x149d   :  { %3554 = vadd.xlane.f32.xlu1 %v3553_v29 }
0x149f   :  { %v8326_v45 = vpop.eup %6942 }
0x14a0   :  { %v3562_v15 = vsel %vm72_vm0, %v8326_v45, 0.0 }
0x14a1   :  { %3563 = vadd.xlane.f32.xlu0 %v3562_v15 }
0x14a3   :  { %v8330_v18 = vpop.eup %6944 }
0x14a4   :  { %v3559_v42 = vsel %vm72_vm0, %v8330_v18, 0.0 }
0x14a5   :  { %3560 = vadd.xlane.f32.xlu1 %v3559_v42 }
0x14a7   :  { %v8344_v13 = vpop.eup %6946 }
0x14a8   :  { %v3568_v2 = vsel %vm72_vm0, %v8344_v13, 0.0  ;;  %v8348_v48 = vpop.eup %6948 }
0x14a9   :  { %v3565_v7 = vsel %vm72_vm0, %v8348_v48, 0.0 }
0x14b6   :  { %3593 = vrot.lane.b32.xlu1 %v8137_v30, %s7084_s0 }
0x14b7   :  { %3591 = vrot.lane.b32.xlu0 %v8139_v20, %s7084_s0 }
0x14bb   :  { %3589 = vrot.lane.b32.xlu0 %v8143_v16, %s7084_s0 }
0x14bf   :  { %3587 = vrot.lane.b32.xlu0 %v8151_v25, %s7084_s0 }
0x14c3   :  { %3585 = vrot.lane.b32.xlu0 %v8147_v3, %s7084_s0 }
0x14da   :  { %3569 = vadd.xlane.f32.xlu1 %v3568_v2 }
0x14e2   :  { %3566 = vadd.xlane.f32.xlu0 %v3565_v7 }
0x14eb   :  { %3958 = vrot.lane.b32.xlu1 %v8151_v25, %s7085_s27 }
0x14ef   :  { %3946 = vrot.lane.b32.xlu1 %v8151_v25, %s7086_s28 }
0x14f3   :  { %3950 = vrot.lane.b32.xlu1 %v8139_v20, %s7086_s28 }
0x14f7   :  { %4425 = vrot.lane.b32.xlu1 %v8137_v30, %s7087_s29 }
0x14f8   :  { %3583 = vrot.lane.b32.xlu0 %v8133_v33, %s7084_s0 }
0x14fb   :  { %4421 = vrot.lane.b32.xlu1 %v8143_v16, %s7087_s29 }
0x14fc   :  { %3964 = vrot.lane.b32.xlu0 %v8137_v30, %s7085_s27 }
0x14ff   :  { %4417 = vrot.lane.b32.xlu1 %v8147_v3, %s7087_s29 }
0x1500   :  { %3962 = vrot.lane.b32.xlu0 %v8139_v20, %s7085_s27 }
0x1503   :  { %4403 = vrot.lane.b32.xlu1 %v8133_v33, %s7088_s30 }
0x1504   :  { %3960 = vrot.lane.b32.xlu0 %v8143_v16, %s7085_s27 }
0x1507   :  { %4407 = vrot.lane.b32.xlu1 %v8151_v25, %s7088_s30 }
0x1508   :  { %3956 = vrot.lane.b32.xlu0 %v8147_v3, %s7085_s27 }
0x150c   :  { %3954 = vrot.lane.b32.xlu0 %v8133_v33, %s7085_s27 }
0x1510   :  { %3942 = vrot.lane.b32.xlu0 %v8133_v33, %s7086_s28 }
0x1514   :  { %3944 = vrot.lane.b32.xlu0 %v8147_v3, %s7086_s28 }
0x1518   :  { %3948 = vrot.lane.b32.xlu0 %v8143_v16, %s7086_s28 }
0x151c   :  { %3952 = vrot.lane.b32.xlu0 %v8137_v30, %s7086_s28 }
0x1520   :  { %4423 = vrot.lane.b32.xlu0 %v8139_v20, %s7087_s29 }
0x1524   :  { %4419 = vrot.lane.b32.xlu0 %v8151_v25, %s7087_s29  ;;  %v3558_v9 = vpop.xlane.xlu0 %3557 }
0x1526   :  { %v3555_v0 = vpop.xlane.xlu1 %3554 }
0x1527   :  { %6950 = vrcp.f32 %v3555_v0 }
0x1528   :  { %4415 = vrot.lane.b32.xlu0 %v8133_v33, %s7087_s29  ;;  %6952 = vrcp.f32 %v3558_v9 }
0x152a   :  { %v3564_v12 = vpop.xlane.xlu0 %3563 }
0x152c   :  { %4405 = vrot.lane.b32.xlu0 %v8147_v3, %s7088_s30 }
0x152e   :  { %v3592_v41 = vpop.permute.xlu0 %3591  ;;  %v3561_v26 = vpop.xlane.xlu1 %3560 }
0x152f   :  { %6954 = vrcp.f32 %v3561_v26 }
0x1530   :  { %4409 = vrot.lane.b32.xlu0 %v8143_v16, %s7088_s30  ;;  %6956 = vrcp.f32 %v3564_v12 }
0x1532   :  { %v3590_v28 = vpop.permute.xlu0 %3589  ;;  %v3594_v10 = vpop.permute.xlu1 %3593 }
0x1533   :  { %6525 = vmatprep.subr.mxu1 %v3594_v10 }
0x1534   :  { %v6951_v53 = vpop.eup %6950  ;;  %6526 = vmatpush3.msra.mxu1 %v3594_v10 }
0x1535   :  { %v3577_v21 = vmul.f32 %v6951_v53, %v8322_v46  ;;  %6527 = vmatprep.subr.mxu1 %v3592_v41  ;;  %v6953_v37 = vpop.eup %6952 }
0x1536   :  { %v3588_v22 = vpop.permute.xlu0 %3587  ;;  %6528 = vmatpush3.msra.mxu1 %v3592_v41  ;;  %v3578_v27 = vmul.f32 %v6953_v37, %v8318_v38 }
0x1537   :  { %6537 = vmatprep.mubr.msk.f32.mxu1 %vm72_vm0, %v3577_v21  ;;  %6529 = vmatprep.subr.mxu1 %v3590_v28 }
0x1538   :  { %6530 = vmatpush3.msra.mxu1 %v3590_v28 }
0x1539   :  { %6531 = vmatprep.subr.mxu1 %v3588_v22 }
0x153a   :  { %v3586_v31 = vpop.permute.xlu0 %3585  ;;  %6532 = vmatpush3.msra.mxu1 %v3588_v22 }
0x153b   :  { %6533 = vmatprep.subr.mxu1 %v3586_v31 }
0x153c   :  { %6534 = vmatpush3.msra.mxu1 %v3586_v31  ;;  %v6955_v17 = vpop.eup %6954 }
0x153d   :  { %v6957_v63 = vpop.eup %6956  ;;  %v3579_v39 = vmul.f32 %v6955_v17, %v8330_v18 }
0x153e   :  { %v3580_v46 = vmul.f32 %v6957_v63, %v8326_v45 }
0x1563   :  { %v3570_v24 = vpop.xlane.xlu1 %3569 }
0x1564   :  { %6958 = vrcp.f32 %v3570_v24 }
0x1567   :  { %v3959_v51 = vpop.permute.xlu1 %3958 }
0x156b   :  { %v3567_v54 = vpop.xlane.xlu0 %3566 }
0x156c   :  { %6960 = vrcp.f32 %v3567_v54 }
0x156f   :  { %v3584_v44 = vpop.permute.xlu0 %3583 }
0x1570   :  { %6535 = vmatprep.subr.mxu1 %v3584_v44 }
0x1571   :  { %6536 = vmatpush3.msra.mxu1 %v3584_v44  ;;  %v6959_v29 = vpop.eup %6958 }
0x1572   :  { %6538 = vmatmul.mubr.msk.f32.vlgmr.msra.gmra.mxu1 %vm72_vm0, %v3578_v27  ;;  %6546 = vmatprep.subr.mxu1 %v5695_v32  ;;  %v3582_v42 = vmul.f32 %v6959_v29, %v8344_v13  ;;  %v3947_v13 = vpop.permute.xlu1 %3946 }
0x1573   :  { %6540 = vmatprep.mubr.msk.f32.mxu1 %vm72_vm0, %v3579_v39  ;;  %6547 = vmatpush3.msra.mxu1 %v5695_v32  ;;  %v3965_v1 = vpop.permute.xlu0 %3964 }
0x1574   :  { %6568 = vmatprep.subr.msk.mxu1 %vm447_vm2, %v3965_v1 }
0x1576   :  { %6541 = vmatmul.mubr.msk.f32.gmra.mxu1 %vm72_vm0, %v3580_v46  ;;  %v3951_v0 = vpop.permute.xlu1 %3950 }
0x1577   :  { %v3963_v18 = vpop.permute.xlu0 %3962 }
0x1579   :  { %v6961_v38 = vpop.eup %6960 }
0x157a   :  { %v3581_v15 = vmul.f32 %v6961_v38, %v8348_v48  ;;  %v4426_v26 = vpop.permute.xlu1 %4425 }
0x157b   :  { %v3961_v55 = vpop.permute.xlu0 %3960 }
0x157c   :  { %6543 = vmatprep.mubr.msk.f32.mxu1 %vm72_vm0, %v3581_v15 }
0x157d   :  { %6544 = vmatmul.mubr.msk.f32.gmra.mxu1 %vm72_vm0, %v3582_v42 }
0x157e   :  { %v4422_v10 = vpop.permute.xlu1 %4421 }
0x157f   :  { %v3957_v8 = vpop.permute.xlu0 %3956 }
0x1582   :  { %v4418_v21 = vpop.permute.xlu1 %4417 }
0x1583   :  { %v3955_v19 = vpop.permute.xlu0 %3954 }
0x1586   :  { %v4404_v22 = vpop.permute.xlu1 %4403 }
0x1587   :  { %v3943_v2 = vpop.permute.xlu0 %3942 }
0x158a   :  { %v4408_v37 = vpop.permute.xlu1 %4407 }
0x158b   :  { %v3945_v7 = vpop.permute.xlu0 %3944 }
0x158f   :  { %v3949_v41 = vpop.permute.xlu0 %3948 }
0x1593   :  { %v3953_v28 = vpop.permute.xlu0 %3952 }
0x1597   :  { %v4424_v53 = vpop.permute.xlu0 %4423 }
0x159b   :  { %v4420_v31 = vpop.permute.xlu0 %4419 }
0x159f   :  { %v4416_v24 = vpop.permute.xlu0 %4415 }
0x15a3   :  { %v4406_v54 = vpop.permute.xlu0 %4405 }
0x15a7   :  { %v4410_v17 = vpop.permute.xlu0 %4409 }
0x1632   :  { %v6539_v58 = vpop.f32.mrf.mxu1 }
0x1634   :  { %v3685_v61 = vpop.f32.mrf.mxu1 }
0x1635   :  { %6548 = vmatprep.mubr.msk.f32.mxu1 %vm447_vm2, %v3685_v61 }
0x1636   :  { %v6542_v45 = vpop.f32.mrf.mxu1  ;;  %6549 = vmatmul.mubr.msk.f32.vlgmr.msra.gmra.mxu1 %vm447_vm2, %v6539_v58 }
0x1637   :  { %6569 = vmatpush3.xpose.msk.msra.mxu1 %vm447_vm2, %v3965_v1 }
0x1638   :  { %6570 = vmatprep.subr.msk.mxu1 %vm447_vm2, %v3963_v18  ;;  %v3695_v48 = vpop.f32.mrf.mxu1 }
0x1639   :  { %6551 = vmatprep.mubr.msk.f32.mxu1 %vm447_vm2, %v3695_v48 }
0x163a   :  { %6552 = vmatmul.mubr.msk.f32.gmra.mxu1 %vm447_vm2, %v6542_v45 }
0x163b   :  { %6571 = vmatpush3.xpose.msk.msra.mxu1 %vm447_vm2, %v3963_v18 }
0x163c   :  { %6572 = vmatprep.subr.msk.mxu1 %vm447_vm2, %v3961_v55 }
0x163d   :  { %v6545_v9 = vpop.f32.mrf.mxu1 }
0x163f   :  { %6573 = vmatpush3.xpose.msk.msra.mxu1 %vm447_vm2, %v3961_v55  ;;  %v3705_v12 = vpop.f32.mrf.mxu1 }
0x1640   :  { %6574 = vmatprep.subr.msk.mxu1 %vm447_vm2, %v3959_v51  ;;  %6554 = vmatprep.mubr.msk.f32.mxu1 %vm447_vm2, %v3705_v12 }
0x1641   :  { %6555 = vmatmul.mubr.msk.f32.gmra.mxu1 %vm447_vm2, %v6545_v9 }
0x1642   :  { %6580 = vmatprep.mubr.msk.f32.mxu1 %vm447_vm2, %v3943_v2 }
0x1643   :  { %6575 = vmatpush3.xpose.msk.msra.mxu1 %vm447_vm2, %v3959_v51 }
0x1644   :  { %6576 = vmatprep.subr.msk.mxu1 %vm447_vm2, %v3957_v8 }
0x1647   :  { %6577 = vmatpush3.xpose.msk.msra.mxu1 %vm447_vm2, %v3957_v8 }
0x1648   :  { %6578 = vmatprep.subr.msk.mxu1 %vm447_vm2, %v3955_v19 }
0x164b   :  { %6579 = vmatpush3.xpose.msk.msra.mxu1 %vm447_vm2, %v3955_v19 }
0x164c   :  { %6621 = vmatprep.subr.msk.mxu1 %vm447_vm2, %v4426_v26 }
0x164e   :  { %6581 = vmatmul.mubr.msk.f32.vlgmr.msra.gmra.mxu1 %vm447_vm2, %v3945_v7 }
0x164f   :  { %6583 = vmatprep.mubr.msk.f32.mxu1 %vm447_vm2, %v3947_v13  ;;  %6622 = vmatpush3.xpose.msk.msra.mxu1 %vm447_vm2, %v4426_v26 }
0x1650   :  { %6623 = vmatprep.subr.msk.mxu1 %vm447_vm2, %v4424_v53 }
0x1652   :  { %6584 = vmatmul.mubr.msk.f32.gmra.mxu1 %vm447_vm2, %v3949_v41 }
0x1653   :  { %6586 = vmatprep.mubr.msk.f32.mxu1 %vm447_vm2, %v3951_v0  ;;  %6624 = vmatpush3.xpose.msk.msra.mxu1 %vm447_vm2, %v4424_v53 }
0x1654   :  { %6625 = vmatprep.subr.msk.mxu1 %vm447_vm2, %v4422_v10 }
0x1656   :  { %6587 = vmatmul.mubr.msk.f32.gmra.mxu1 %vm447_vm2, %v3953_v28 }
0x1657   :  { %6626 = vmatpush3.xpose.msk.msra.mxu1 %vm447_vm2, %v4422_v10  ;;  %6633 = vmatprep.mubr.msk.f32.mxu1 %vm447_vm2, %v4404_v22 }
0x1658   :  { %6627 = vmatprep.subr.msk.mxu1 %vm447_vm2, %v4420_v31 }
0x165b   :  { %6628 = vmatpush3.xpose.msk.msra.mxu1 %vm447_vm2, %v4420_v31 }
0x165c   :  { %6629 = vmatprep.subr.msk.mxu1 %vm447_vm2, %v4418_v21 }
0x165f   :  { %6630 = vmatpush3.xpose.msk.msra.mxu1 %vm447_vm2, %v4418_v21 }
0x1660   :  { %6631 = vmatprep.subr.msk.mxu1 %vm447_vm2, %v4416_v24 }
0x1663   :  { %6632 = vmatpush3.xpose.msk.msra.mxu1 %vm447_vm2, %v4416_v24 }
0x1666   :  { %6634 = vmatmul.mubr.msk.f32.vlgmr.msra.gmra.mxu1 %vm447_vm2, %v4406_v54 }
0x1667   :  { %6636 = vmatprep.mubr.msk.f32.mxu1 %vm447_vm2, %v4408_v37 }
0x166a   :  { %6637 = vmatmul.mubr.msk.f32.gmra.mxu1 %vm447_vm2, %v4410_v17 }
0x16f6   :  { %v8453_v44 = vpop.f32.mrf.mxu1 }
0x16f8   :  { %v8455_v32 = vpop.f32.mrf.mxu1 }
0x16fa   :  { %v8457_v27 = vpop.f32.mrf.mxu1 }
0x16fc   :  { %v8459_v63 = vpop.f32.mrf.mxu1 }
0x1701   :  { %v8461_v39 = vpop.f32.mrf.mxu1 }
0x1703   :  { %v8463_v1 = vpop.f32.mrf.mxu1 }
0x170e   :  { %v6582_v46 = vpop.f32.mrf.mxu1 }
0x170f   :  { %v4062_v29 = vadd.f32 %v8204_v11, %v6582_v46 }
0x1710   :  { %v4056_v38 = vpop.f32.mrf.mxu1 }
0x1711   :  { %v4057_v15 = vadd.f32 %v8210_v60, %v4056_v38  ;;  %v4088_v42 = vsel %vm72_vm0, %v4062_v29, -inf }
0x1712   :  { %4089 = vmax.xlane.f32.xlu0 %v4088_v42  ;;  %v6585_v18 = vpop.f32.mrf.mxu1 }
0x1713   :  { %v4072_v55 = vadd.f32 %v8217_v36, %v6585_v18  ;;  %v4085_v8 = vsel %vm72_vm0, %v4057_v15, -inf }
0x1714   :  { %4086 = vmax.xlane.f32.xlu1 %v4085_v8  ;;  %v4066_v19 = vpop.f32.mrf.mxu1 }
0x1715   :  { %v4067_v51 = vadd.f32 %v8224_v59, %v4066_v19  ;;  %v4094_v45 = vsel %vm72_vm0, %v4072_v55, -inf }
0x1716   :  { %v6588_v58 = vpop.f32.mrf.mxu1 }
0x1717   :  { %v4082_v61 = vadd.f32 %v8237_v14, %v6588_v58  ;;  %v4091_v2 = vsel %vm72_vm0, %v4067_v51, -inf }
0x1718   :  { %4095 = vmax.xlane.f32.xlu1 %v4094_v45  ;;  %4092 = vmax.xlane.f32.xlu0 %v4091_v2  ;;  %v4076_v13 = vpop.f32.mrf.mxu1 }
0x1719   :  { %v4077_v48 = vadd.f32 %v8231_v40, %v4076_v13  ;;  %v4100_v7 = vsel %vm72_vm0, %v4082_v61, -inf }
0x171b   :  { %v4097_v9 = vsel %vm72_vm0, %v4077_v48, -inf }
0x171c   :  { %4101 = vmax.xlane.f32.xlu1 %v4100_v7  ;;  %4098 = vmax.xlane.f32.xlu0 %v4097_v9 }
0x172d   :  { %4159 = vrot.lane.b32.xlu1 %v8139_v20, %s7089_s16 }
0x1731   :  { %4157 = vrot.lane.b32.xlu1 %v8143_v16, %s7089_s16 }
0x1732   :  { %4161 = vrot.lane.b32.xlu0 %v8137_v30, %s7089_s16 }
0x1736   :  { %4155 = vrot.lane.b32.xlu0 %v8151_v25, %s7089_s16 }
0x179b   :  { %v4090_v14 = vpop.xlane.xlu0 %4089 }
0x179c   :  { %v4104_v40 = vsub.f32 %v4062_v29, %v4090_v14  ;;  %v6635_v14 = vpop.f32.mrf.mxu1 }
0x179d   :  { %v4087_v0 = vpop.xlane.xlu1 %4086 }
0x179e   :  { %v4111_v12 = vmul.f32 1.442695, %v4104_v40  ;;  %v4103_v41 = vsub.f32 %v4057_v15, %v4087_v0  ;;  %v4517_v40 = vpop.f32.mrf.mxu1 }
0x17a0   :  { %6962 = vpow2.f32 %v4111_v12  ;;  %v4109_v26 = vmul.f32 1.442695, %v4103_v41  ;;  %v6638_v0 = vpop.f32.mrf.mxu1  ;;  %v8518_v12 = vadd.f32 %v8210_v60, %v4517_v40  ;;  %v8521_v41 = vadd.f32 %v8204_v11, %v6635_v14 }
0x17a1   :  { %v4096_v28 = vpop.xlane.xlu1 %4095  ;;  %v4093_v10 = vpop.xlane.xlu0 %4092 }
0x17a2   :  { %6964 = vpow2.f32 %v4109_v26  ;;  %v4106_v53 = vsub.f32 %v4072_v55, %v4096_v28  ;;  %v4105_v21 = vsub.f32 %v4067_v51, %v4093_v10  ;;  %v4527_v26 = vpop.f32.mrf.mxu1  ;;  %v8524_v28 = vadd.f32 %v8217_v36, %v6638_v0 }
0x17a3   :  { %v4546_v10 = vsel %vm72_vm0, %v8518_v12, -inf }
0x17a4   :  { %v4115_v22 = vmul.f32 1.442695, %v4106_v53  ;;  %v4113_v31 = vmul.f32 1.442695, %v4105_v21  ;;  %v8529_v53 = vadd.f32 %v8224_v59, %v4527_v26  ;;  %v4549_v21 = vsel %vm72_vm0, %v8521_v41, -inf }
0x17a5   :  { %v4102_v24 = vpop.xlane.xlu1 %4101  ;;  %v4099_v54 = vpop.xlane.xlu0 %4098  ;;  %v4555_v60 = vsel %vm72_vm0, %v8524_v28, -inf }
0x17a6   :  { %6966 = vpow2.f32 %v4115_v22  ;;  %v4108_v37 = vsub.f32 %v4082_v61, %v4102_v24  ;;  %v4107_v17 = vsub.f32 %v4077_v48, %v4099_v54  ;;  %v4552_v11 = vsel %vm72_vm0, %v8529_v53, -inf }
0x17a7   :  { %6968 = vpow2.f32 %v4113_v31 }
0x17a8   :  { %v4119_v46 = vmul.f32 1.442695, %v4108_v37  ;;  %v4117_v29 = vmul.f32 1.442695, %v4107_v17 }
0x17a9   :  { %v4160_v38 = vpop.permute.xlu1 %4159  ;;  %v4162_v42 = vpop.permute.xlu0 %4161 }
0x17aa   :  { %6970 = vpow2.f32 %v4119_v46  ;;  %6589 = vmatprep.subr.mxu0 %v4162_v42 }
0x17ab   :  { %6972 = vpow2.f32 %v4117_v29  ;;  %6590 = vmatpush3.msra.mxu0 %v4162_v42  ;;  %v5726_v29 = vld [vmem:[%s8893_s6 + $0x30] sm:$0xff] }
0x17ac   :  { %6591 = vmatprep.subr.mxu0 %v4160_v38 }
0x17ad   :  { %v8485_v15 = vpop.eup %6962  ;;  %v4158_v18 = vpop.permute.xlu1 %4157  ;;  %6592 = vmatpush3.msra.mxu0 %v4160_v38 }
0x17ae   :  { %6593 = vmatprep.subr.mxu0 %v4158_v18  ;;  %v4124_v55 = vsel %vm72_vm0, %v8485_v15, 0.0  ;;  %v4156_v19 = vpop.permute.xlu0 %4155 }
0x17af   :  { %v8489_v8 = vpop.eup %6964  ;;  %4125 = vadd.xlane.f32.xlu1 %v4124_v55  ;;  %6594 = vmatpush3.msra.mxu0 %v4158_v18 }
0x17b0   :  { %6595 = vmatprep.subr.mxu0 %v4156_v19  ;;  %v4121_v51 = vsel %vm72_vm0, %v8489_v8, 0.0 }
0x17b1   :  { %4122 = vadd.xlane.f32.xlu0 %v4121_v51  ;;  %6596 = vmatpush3.msra.mxu0 %v4156_v19 }
0x17b3   :  { %v8493_v58 = vpop.eup %6966 }
0x17b4   :  { %v8495_v61 = vpop.eup %6968  ;;  %v4130_v45 = vsel %vm72_vm0, %v8493_v58, 0.0 }
0x17b5   :  { %4131 = vadd.xlane.f32.xlu1 %v4130_v45  ;;  %v4127_v2 = vsel %vm72_vm0, %v8495_v61, 0.0 }
0x17b6   :  { %4128 = vadd.xlane.f32.xlu0 %v4127_v2 }
0x17b7   :  { %v8501_v13 = vpop.eup %6970 }
0x17b8   :  { %v8503_v48 = vpop.eup %6972  ;;  %v4136_v7 = vsel %vm72_vm0, %v8501_v13, 0.0 }
0x17b9   :  { %4137 = vadd.xlane.f32.xlu1 %v4136_v7  ;;  %v4133_v9 = vsel %vm72_vm0, %v8503_v48, 0.0 }
0x17ba   :  { %4134 = vadd.xlane.f32.xlu0 %v4133_v9 }
0x17ca   :  { %4153 = vrot.lane.b32.xlu1 %v8147_v3, %s7089_s16 }
0x17ce   :  { %4411 = vrot.lane.b32.xlu1 %v8139_v20, %s7088_s30 }
0x17d0   :  { %4151 = vrot.lane.b32.xlu0 %v8133_v33, %s7089_s16 }
0x17d4   :  { %4413 = vrot.lane.b32.xlu0 %v8137_v30, %s7088_s30 }
0x17f2   :  { %4547 = vmax.xlane.f32.xlu1 %v4546_v10 }
0x17f3   :  { %4550 = vmax.xlane.f32.xlu0 %v4549_v21 }
0x17f6   :  { %4556 = vmax.xlane.f32.xlu1 %v4555_v60 }
0x17f7   :  { %4553 = vmax.xlane.f32.xlu0 %v4552_v11 }
0x1807   :  { %4620 = vrot.lane.b32.xlu1 %v8139_v20, %s7090_s2 }
0x180b   :  { %4618 = vrot.lane.b32.xlu1 %v8143_v16, %s7090_s2 }
0x180d   :  { %4622 = vrot.lane.b32.xlu0 %v8137_v30, %s7090_s2 }
0x1811   :  { %4616 = vrot.lane.b32.xlu0 %v8151_v25, %s7090_s2 }
0x1838   :  { %v4126_v36 = vpop.xlane.xlu1 %4125 }
0x1839   :  { %6974 = vrcp.f32 %v4126_v36 }
0x183a   :  { %v4123_v59 = vpop.xlane.xlu0 %4122 }
0x183b   :  { %6976 = vrcp.f32 %v4123_v59 }
0x183e   :  { %v4132_v22 = vpop.xlane.xlu1 %4131 }
0x183f   :  { %6978 = vrcp.f32 %v4132_v22  ;;  %v4129_v31 = vpop.xlane.xlu0 %4128  ;;  %v8586_v22 = vpop.f32.mrf.mxu0 }
0x1840   :  { %6980 = vrcp.f32 %v4129_v31 }
0x1841   :  { %v8588_v31 = vpop.f32.mrf.mxu0 }
0x1842   :  { %v4138_v24 = vpop.xlane.xlu1 %4137 }
0x1843   :  { %6982 = vrcp.f32 %v4138_v24  ;;  %v4135_v20 = vpop.xlane.xlu0 %4134  ;;  %v8590_v24 = vpop.f32.mrf.mxu0 }
0x1844   :  { %6984 = vrcp.f32 %v4135_v20 }
0x1845   :  { %v8592_v20 = vpop.f32.mrf.mxu0 }
0x1846   :  { %v4154_v54 = vpop.permute.xlu1 %4153  ;;  %v6975_v16 = vpop.eup %6974 }
0x1847   :  { %v4152_v37 = vpop.permute.xlu0 %4151  ;;  %6597 = vmatprep.subr.mxu0 %v4154_v54  ;;  %v4146_v17 = vmul.f32 %v6975_v16, %v8485_v15 }
0x1848   :  { %v6977_v30 = vpop.eup %6976  ;;  %6598 = vmatpush3.msra.mxu0 %v4154_v54  ;;  %v8594_v54 = vpop.f32.mrf.mxu0 }
0x1849   :  { %6599 = vmatprep.subr.mxu0 %v4152_v37  ;;  %v4145_v25 = vmul.f32 %v6977_v30, %v8489_v8 }
0x184a   :  { %v4412_v46 = vpop.permute.xlu1 %4411  ;;  %6600 = vmatpush3.msra.mxu0 %v4152_v37  ;;  %v8596_v16 = vpop.f32.mrf.mxu0 }
0x184b   :  { %v4414_v38 = vpop.permute.xlu0 %4413  ;;  %6601 = vmatprep.mubr.msk.f32.mxu0 %vm72_vm0, %v4145_v25  ;;  %6639 = vmatprep.mubr.msk.f32.mxu1 %vm447_vm2, %v4412_v46 }
0x184c   :  { %v6979_v42 = vpop.eup %6978  ;;  %6602 = vmatmul.mubr.msk.f32.vlgmr.msra.gmra.mxu0 %vm72_vm0, %v4146_v17  ;;  %6640 = vmatmul.mubr.msk.f32.gmra.mxu1 %vm447_vm2, %v4414_v38 }
0x184d   :  { %v6981_v18 = vpop.eup %6980  ;;  %v4148_v55 = vmul.f32 %v6979_v42, %v8493_v58  ;;  %6610 = vmatprep.subr.mxu0 %v5726_v29 }
0x184e   :  { %v4147_v15 = vmul.f32 %v6981_v18, %v8495_v61  ;;  %6611 = vmatpush3.msra.mxu0 %v5726_v29  ;;  %v7056_v29 = vld [vmem:[%s8888_s1 + $0x20] sm:$0xff] }
0x1850   :  { %v6983_v8 = vpop.eup %6982  ;;  %6604 = vmatprep.mubr.msk.f32.mxu0 %vm72_vm0, %v4147_v15 }
0x1851   :  { %v6985_v19 = vpop.eup %6984  ;;  %6605 = vmatmul.mubr.msk.f32.gmra.mxu0 %vm72_vm0, %v4148_v55  ;;  %v4150_v51 = vmul.f32 %v6983_v8, %v8501_v13 }
0x1852   :  { %v4149_v45 = vmul.f32 %v6985_v19, %v8503_v48 }
0x1854   :  { %6607 = vmatprep.mubr.msk.f32.mxu0 %vm72_vm0, %v4149_v45 }
0x1855   :  { %6608 = vmatmul.mubr.msk.f32.gmra.mxu0 %vm72_vm0, %v4150_v51 }
0x187b   :  { %v4548_v2 = vpop.xlane.xlu1 %4547 }
0x187c   :  { %v4564_v58 = vsub.f32 %v8518_v12, %v4548_v2  ;;  %v4551_v7 = vpop.xlane.xlu0 %4550 }
0x187d   :  { %v4565_v61 = vsub.f32 %v8521_v41, %v4551_v7 }
0x187e   :  { %v4570_v9 = vmul.f32 1.442695, %v4564_v58 }
0x187f   :  { %v4572_v14 = vmul.f32 1.442695, %v4565_v61  ;;  %v4557_v40 = vpop.xlane.xlu1 %4556 }
0x1880   :  { %6986 = vpow2.f32 %v4570_v9  ;;  %v4567_v0 = vsub.f32 %v8524_v28, %v4557_v40  ;;  %v4554_v26 = vpop.xlane.xlu0 %4553 }
0x1881   :  { %6988 = vpow2.f32 %v4572_v14  ;;  %v4566_v13 = vsub.f32 %v8529_v53, %v4554_v26 }
0x1882   :  { %v4576_v48 = vmul.f32 1.442695, %v4567_v0 }
0x1883   :  { %v4574_v10 = vmul.f32 1.442695, %v4566_v13  ;;  %v4621_v25 = vpop.permute.xlu1 %4620 }
0x1884   :  { %6990 = vpow2.f32 %v4576_v48  ;;  %v4623_v21 = vpop.permute.xlu0 %4622 }
0x1885   :  { %6992 = vpow2.f32 %v4574_v10  ;;  %6642 = vmatprep.subr.mxu0 %v4623_v21 }
0x1887   :  { %v4619_v15 = vpop.permute.xlu1 %4618 }
0x1888   :  { %v4617_v19 = vpop.permute.xlu0 %4616 }
0x188d   :  { %v8566_v12 = vpop.eup %6986 }
0x188e   :  { %v8568_v60 = vpop.eup %6988  ;;  %v4582_v41 = vsel %vm72_vm0, %v8566_v12, 0.0 }
0x188f   :  { %4583 = vadd.xlane.f32.xlu0 %v4582_v41  ;;  %v4585_v28 = vsel %vm72_vm0, %v8568_v60, 0.0 }
0x1890   :  { %4586 = vadd.xlane.f32.xlu1 %v4585_v28 }
0x1891   :  { %v8574_v11 = vpop.eup %6990 }
0x1892   :  { %v8576_v53 = vpop.eup %6992  ;;  %v4591_v36 = vsel %vm72_vm0, %v8574_v11, 0.0 }
0x1893   :  { %v4588_v59 = vsel %vm72_vm0, %v8576_v53, 0.0 }
0x1894   :  { %4592 = vadd.xlane.f32.xlu1 %v4591_v36  ;;  %4589 = vadd.xlane.f32.xlu0 %v4588_v59 }
0x18a5   :  { %4614 = vrot.lane.b32.xlu1 %v8147_v3, %s7090_s2  ;;  %v7055_v3 = vld [vmem:[%s8888_s1 + $0x28] sm:$0xff] }
0x18aa   :  { %4612 = vrot.lane.b32.xlu0 %v8133_v33, %s7090_s2 }
0x190c   :  { %v6603_v37 = vpop.f32.mrf.mxu0  ;;  %v6641_v30 = vpop.f32.mrf.mxu1 }
0x190d   :  { %v4543_v33 = vadd.f32 %v7055_v3, %v6641_v30 }
0x190e   :  { %v4253_v17 = vpop.f32.mrf.mxu0  ;;  %v4537_v46 = vpop.f32.mrf.mxu1 }
0x190f   :  { %v4538_v38 = vadd.f32 %v7056_v29, %v4537_v46  ;;  %6612 = vmatprep.mubr.msk.f32.mxu0 %vm447_vm2, %v4253_v17  ;;  %v4561_v42 = vsel %vm72_vm0, %v4543_v33, -inf  ;;  %v3914_v46 = vadd.f32 %v8588_v31, %v8455_v32  ;;  %v3934_v32 = vadd.f32 %v8596_v16, %v8463_v1 }
0x1910   :  { %6613 = vmatmul.mubr.msk.f32.vlgmr.msra.gmra.mxu0 %vm447_vm2, %v6603_v37  ;;  %4562 = vmax.xlane.f32.xlu0 %v4561_v42 }
0x1911   :  { %v6606_v18 = vpop.f32.mrf.mxu0  ;;  %6643 = vmatpush3.msra.mxu0 %v4623_v21  ;;  %v4558_v55 = vsel %vm72_vm0, %v4538_v38, -inf }
0x1912   :  { %6644 = vmatprep.subr.mxu0 %v4621_v25  ;;  %4559 = vmax.xlane.f32.xlu1 %v4558_v55 }
0x1913   :  { %v4263_v8 = vpop.f32.mrf.mxu0  ;;  %6645 = vmatpush3.msra.mxu0 %v4621_v25 }
0x1914   :  { %6615 = vmatprep.mubr.msk.f32.mxu0 %vm447_vm2, %v4263_v8  ;;  %6646 = vmatprep.subr.mxu0 %v4619_v15 }
0x1915   :  { %v6609_v51 = vpop.f32.mrf.mxu0  ;;  %6616 = vmatmul.mubr.msk.f32.gmra.mxu0 %vm447_vm2, %v6606_v18  ;;  %v3929_v18 = vadd.f32 %v8590_v24, %v8457_v27 }
0x1916   :  { %6647 = vmatpush3.msra.mxu0 %v4619_v15  ;;  %v3924_v15 = vadd.f32 %v8592_v20, %v8459_v63 }
0x1917   :  { %6648 = vmatprep.subr.mxu0 %v4617_v19  ;;  %v4273_v45 = vpop.f32.mrf.mxu0 }
0x1918   :  { %6649 = vmatpush3.msra.mxu0 %v4617_v19  ;;  %6618 = vmatprep.mubr.msk.f32.mxu0 %vm447_vm2, %v4273_v45  ;;  %v4584_v2 = vpop.xlane.xlu0 %4583 }
0x1919   :  { %6619 = vmatmul.mubr.msk.f32.gmra.mxu0 %vm447_vm2, %v6609_v51  ;;  %v4587_v58 = vpop.xlane.xlu1 %4586  ;;  %6994 = vrcp.f32 %v4584_v2  ;;  %v3939_v51 = vadd.f32 %v8594_v54, %v8461_v39 }
0x191a   :  { %6996 = vrcp.f32 %v4587_v58 }
0x191d   :  { %v4593_v7 = vpop.xlane.xlu1 %4592  ;;  %v4590_v61 = vpop.xlane.xlu0 %4589 }
0x191e   :  { %6998 = vrcp.f32 %v4593_v7 }
0x191f   :  { %7000 = vrcp.f32 %v4590_v61 }
0x1921   :  { %v4615_v9 = vpop.permute.xlu1 %4614  ;;  %v4613_v14 = vpop.permute.xlu0 %4612 }
0x1922   :  { %6650 = vmatprep.subr.mxu0 %v4615_v9 }
0x1923   :  { %6651 = vmatpush3.msra.mxu0 %v4615_v9 }
0x1924   :  { %6652 = vmatprep.subr.mxu0 %v4613_v14 }
0x1925   :  { %6653 = vmatpush3.msra.mxu0 %v4613_v14 }
0x1926   :  { %v6995_v40 = vpop.eup %6994 }
0x1927   :  { %v6997_v0 = vpop.eup %6996  ;;  %v4606_v26 = vmul.f32 %v6995_v40, %v8566_v12 }
0x1928   :  { %v4607_v13 = vmul.f32 %v6997_v0, %v8568_v60  ;;  %v8652_v0 = vld [vmem:[%s8894_s7 + $0x8] sm:$0x3f] }
0x1929   :  { %6654 = vmatprep.mubr.msk.f32.mxu0 %vm72_vm0, %v4606_v26  ;;  %v8657_v26 = vrot.slane %v8652_v0, %v2263_v49 }
0x192a   :  { %6655 = vmatmul.mubr.msk.f32.vlgmr.msra.gmra.mxu0 %vm72_vm0, %v4607_v13 }
0x192b   :  { %v6999_v48 = vpop.eup %6998 }
0x192c   :  { %v7001_v10 = vpop.eup %7000  ;;  %v4609_v21 = vmul.f32 %v6999_v48, %v8574_v11 }
0x192d   :  { %v4608_v41 = vmul.f32 %v7001_v10, %v8576_v53  ;;  %v5751_v53 = vld [vmem:[%s8893_s6 + $0x38] sm:$0xff] }
0x192e   :  { %6663 = vmatprep.subr.mxu0 %v5751_v53 }
0x192f   :  { %6657 = vmatprep.mubr.msk.f32.mxu0 %vm72_vm0, %v4608_v41  ;;  %6664 = vmatpush3.msra.mxu0 %v5751_v53 }
0x1930   :  { %6658 = vmatmul.mubr.msk.f32.gmra.mxu0 %vm72_vm0, %v4609_v21 }
0x1999   :  { %v4563_v28 = vpop.xlane.xlu0 %4562 }
0x199a   :  { %v4569_v36 = vsub.f32 %v4543_v33, %v4563_v28  ;;  %v3919_v33 = vadd.f32 %v8586_v22, %v8453_v44 }
0x199b   :  { %v4560_v59 = vpop.xlane.xlu1 %4559 }
0x199c   :  { %v4580_v12 = vmul.f32 1.442695, %v4569_v36  ;;  %v4568_v37 = vsub.f32 %v4538_v38, %v4560_v59 }
0x199e   :  { %7002 = vpow2.f32 %v4580_v12  ;;  %v4578_v60 = vmul.f32 1.442695, %v4568_v37 }
0x19a0   :  { %7004 = vpow2.f32 %v4578_v60 }
0x19ab   :  { %v7003_v30 = vpop.eup %7002 }
0x19ac   :  { %v4597_v25 = vsel %vm72_vm0, %v7003_v30, 0.0 }
0x19ad   :  { %v7005_v3 = vpop.eup %7004  ;;  %4598 = vadd.xlane.f32.xlu1 %v4597_v25 }
0x19ae   :  { %v4594_v11 = vsel %vm72_vm0, %v7005_v3, 0.0 }
0x19af   :  { %4595 = vadd.xlane.f32.xlu0 %v4594_v11 }
0x19d0   :  { %v6614_v17 = vpop.f32.mrf.mxu0 }
0x19d1   :  { %v4398_v29 = vadd.f32 %v6614_v17, %v3919_v33 }
0x19d2   :  { %v4368_v38 = vpop.f32.mrf.mxu0 }
0x19d3   :  { %v4397_v42 = vadd.f32 %v4368_v38, %v3914_v46 }
0x19d5   :  { %v6617_v55 = vpop.f32.mrf.mxu0 }
0x19d6   :  { %v4400_v8 = vadd.f32 %v6617_v55, %v3929_v18  ;;  %v5760_v18 = vld [vmem:[%s8895_s8 + $0x30] sm:$0xff]  ;;  %v5759_v55 = vld [vmem:[%s8895_s8 + $0x28] sm:$0xff] }
0x19d7   :  { %v4378_v19 = vpop.f32.mrf.mxu0 }
0x19d8   :  { %v4399_v44 = vadd.f32 %v4378_v19, %v3924_v15  ;;  %v5758_v15 = vld [vmem:[%s8895_s8 + $0x20] sm:$0xff] }
0x19d9   :  { %v6620_v22 = vpop.f32.mrf.mxu0 }
0x19da   :  { %v8637_v31 = vadd.f32 %v6620_v22, %v3939_v51 }
0x19db   :  { %v4388_v45 = vpop.f32.mrf.mxu0 }
0x19dc   :  { %v8639_v2 = vadd.f32 %v4388_v45, %v3934_v32 }
0x19ea   :  { %v6656_v63 = vpop.f32.mrf.mxu0 }
0x19ec   :  { %v4714_v7 = vpop.f32.mrf.mxu0 }
0x19f0   :  { %v6659_v54 = vpop.f32.mrf.mxu0 }
0x19f2   :  { %v4724_v1 = vpop.f32.mrf.mxu0 }
0x1a36   :  { %v4599_v27 = vpop.xlane.xlu1 %4598 }
0x1a37   :  { %7006 = vrcp.f32 %v4599_v27 }
0x1a38   :  { %v4596_v24 = vpop.xlane.xlu0 %4595 }
0x1a39   :  { %7008 = vrcp.f32 %v4596_v24 }
0x1a44   :  { %v7007_v20 = vpop.eup %7006 }
0x1a45   :  { %v4611_v39 = vmul.f32 %v7007_v20, %v7003_v30 }
0x1a46   :  { %v7009_v58 = vpop.eup %7008 }
0x1a47   :  { %v4610_v61 = vmul.f32 %v7009_v58, %v7005_v3 }
0x1a49   :  { %6660 = vmatprep.mubr.msk.f32.mxu0 %vm72_vm0, %v4610_v61 }
0x1a4a   :  { %6661 = vmatmul.mubr.msk.f32.gmra.mxu0 %vm72_vm0, %v4611_v39  ;;  %vm5400_vm0 = vcmask 254976  }
0x1a4b   :  { %6665 = vmatprep.mubr.msk.f32.mxu0 %vm447_vm2, %v4714_v7 }
0x1a4e   :  { %6666 = vmatmul.mubr.msk.f32.vlgmr.msra.gmra.mxu0 %vm447_vm2, %v6656_v63 }
0x1a4f   :  { %6668 = vmatprep.mubr.msk.f32.mxu0 %vm447_vm2, %v4724_v1 }
0x1a52   :  { %6669 = vmatmul.mubr.msk.f32.gmra.mxu0 %vm447_vm2, %v6659_v54 }
0x1b0a   :  { %v6662_v16 = vpop.f32.mrf.mxu0 }
0x1b0c   :  { %v4734_v9 = vpop.f32.mrf.mxu0 }
0x1b0d   :  { %6671 = vmatprep.mubr.msk.f32.mxu0 %vm447_vm2, %v4734_v9 }
0x1b0e   :  { %v6667_v14 = vpop.f32.mrf.mxu0  ;;  %6672 = vmatmul.mubr.msk.f32.gmra.mxu0 %vm447_vm2, %v6662_v16  ;;  %vm7093_vm2 = vmmov 0  }
0x1b0f   :  { %v4859_v40 = vadd.f32 %v6667_v14, %v4398_v29 }
0x1b10   :  { %v4829_v13 = vpop.f32.mrf.mxu0 }
0x1b11   :  { %v4865_v48 = vadd.f32 %v4859_v40, %v8054_v50  ;;  %v4858_v10 = vadd.f32 %v4829_v13, %v4397_v42  ;;  %v5761_v42 = vld [vmem:[%s8895_s8 + $0x38] sm:$0xff] }
0x1b12   :  { %v6670_v21 = vpop.f32.mrf.mxu0  ;;  %6674 = vmatprep.subr.mxu1 %v5761_v42 }
0x1b13   :  { %v8661_v41 = vadd.f32 %v8657_v26, %v4865_v48  ;;  %v4864_v28 = vadd.f32 %v4858_v10, %v8057_v6  ;;  %v4861_v36 = vadd.f32 %v6670_v21, %v4400_v8  ;;  %6675 = vmatpush3.msra.mxu1 %v5761_v42 }
0x1b14   :  { %v4839_v59 = vpop.f32.mrf.mxu0  ;;  %6676 = vmatprep.subr.mxu1 %v5760_v18 }
0x1b15   :  { %v8665_v12 = vadd.f32 %v8657_v26, %v4864_v28  ;;  %v4867_v37 = vadd.f32 %v4861_v36, %v8069_v52  ;;  %v4860_v60 = vadd.f32 %v4839_v59, %v4399_v44  ;;  %v4883_v49 = vsel %vm187_vm1, %v8661_v41, 0.0  ;;  %6677 = vmatpush3.msra.mxu1 %v5760_v18 }
0x1b16   :  { %4884 = vadd.xlane.f32.xlu1 %v4883_v49  ;;  %v4905_v50 = vmul.f32 %v8661_v41, %v8661_v41  ;;  %6678 = vmatprep.subr.mxu1 %v5759_v55 }
0x1b17   :  { %v4866_v30 = vadd.f32 %v4860_v60, %v8073_v5  ;;  %v4880_v6 = vsel %vm187_vm1, %v8665_v12, 0.0  ;;  %v4904_v25 = vmul.f32 %v8665_v12, %v8665_v12  ;;  %v8678_v3 = vadd.f32 %v8657_v26, %v4867_v37  ;;  %6679 = vmatpush3.msra.mxu1 %v5759_v55 }
0x1b18   :  { %4881 = vadd.xlane.f32.xlu0 %v4880_v6  ;;  %v4913_v52 = vsel %vm187_vm1, %v4905_v50, 0.0  ;;  %6680 = vmatprep.subr.mxu1 %v5758_v15 }
0x1b19   :  { %v8682_v11 = vadd.f32 %v8657_v26, %v4866_v30  ;;  %v4910_v53 = vsel %vm187_vm1, %v4904_v25, 0.0  ;;  %v4889_v5 = vsel %vm187_vm1, %v8678_v3, 0.0  ;;  %v4907_v33 = vmul.f32 %v8678_v3, %v8678_v3  ;;  %6681 = vmatpush3.msra.mxu1 %v5758_v15 }
0x1b1a   :  { %4914 = vadd.xlane.f32.xlu1 %v4913_v52  ;;  %v8711_v25 = vrot.slane %v8652_v0, %v2369_v57 }
0x1b1b   :  { %v4886_v17 = vsel %vm187_vm1, %v8682_v11, 0.0  ;;  %v4906_v46 = vmul.f32 %v8682_v11, %v8682_v11  ;;  %v4919_v29 = vsel %vm187_vm1, %v4907_v33, 0.0 }
0x1b1c   :  { %4911 = vadd.xlane.f32.xlu0 %v4910_v53 }
0x1b1d   :  { %v4916_v38 = vsel %vm187_vm1, %v4906_v46, 0.0 }
0x1b1e   :  { %4890 = vadd.xlane.f32.xlu1 %v4889_v5 }
0x1b20   :  { %4887 = vadd.xlane.f32.xlu0 %v4886_v17  ;;  %v8717_v17 = vrot.slane %v8652_v0, %v2379_v62 }
0x1b22   :  { %4920 = vadd.xlane.f32.xlu1 %v4919_v29 }
0x1b24   :  { %4917 = vadd.xlane.f32.xlu0 %v4916_v38 }
0x1b9f   :  { %v4885_v8 = vpop.xlane.xlu1 %4884 }
0x1ba0   :  { %v4899_v19 = vmul.f32 0.03125, %v4885_v8 }
0x1ba1   :  { %v4882_v51 = vpop.xlane.xlu0 %4881 }
0x1ba2   :  { %v4898_v44 = vmul.f32 0.03125, %v4882_v51  ;;  %v4935_v32 = vmul.f32 %v4899_v19, %v4899_v19  ;;  %v4953_v30 = vsub.f32 %v8661_v41, %v4899_v19 }
0x1ba3   :  { %v4915_v22 = vpop.xlane.xlu1 %4914 }
0x1ba4   :  { %v4929_v45 = vmul.f32 0.03125, %v4915_v22  ;;  %v4934_v24 = vmul.f32 %v4898_v44, %v4898_v44  ;;  %v4952_v52 = vsub.f32 %v8665_v12, %v4898_v44 }
0x1ba5   :  { %v4912_v27 = vpop.xlane.xlu0 %4911 }
0x1ba6   :  { %v4941_v63 = vsub.f32 %v4929_v45, %v4935_v32  ;;  %v4928_v20 = vmul.f32 0.03125, %v4912_v27 }
0x1ba7   :  { %v4891_v58 = vpop.xlane.xlu1 %4890 }
0x1ba8   :  { %v4947_v7 = vmax.f32 %v4941_v63, 0.0  ;;  %v4940_v61 = vsub.f32 %v4928_v20, %v4934_v24  ;;  %v4901_v39 = vmul.f32 0.03125, %v4891_v58 }
0x1ba9   :  { %v4888_v54 = vpop.xlane.xlu0 %4887 }
0x1baa   :  { %v4959_v1 = vadd.f32 1e-06, %v4947_v7  ;;  %v4946_v16 = vmax.f32 %v4940_v61, 0.0  ;;  %v4900_v9 = vmul.f32 0.03125, %v4888_v54  ;;  %v4937_v13 = vmul.f32 %v4901_v39, %v4901_v39  ;;  %v5784_v61 = vld [vmem:[%s8897_s10 + $0xf0] sm:$0xff]  ;;  %v5782_v54 = vld [vmem:[%s8897_s10 + $0xe0] sm:$0xff] }
0x1bab   :  { %v4921_v14 = vpop.xlane.xlu1 %4920  ;;  %v4955_v29 = vsub.f32 %v8678_v3, %v4901_v39  ;;  %v5783_v39 = vld [vmem:[%s8897_s10 + $0xe8] sm:$0xff] }
0x1bac   :  { %7010 = vrsqrt.f32 %v4959_v1  ;;  %v4958_v40 = vadd.f32 1e-06, %v4946_v16  ;;  %v4931_v48 = vmul.f32 0.03125, %v4921_v14  ;;  %v4936_v21 = vmul.f32 %v4900_v9, %v4900_v9  ;;  %v5781_v1 = vld [vmem:[%s8897_s10 + $0xd8] sm:$0xff]  ;;  %v5780_v16 = vld [vmem:[%s8897_s10 + $0xd0] sm:$0xff]  ;;  %v5778_v14 = vld [vmem:[%s8897_s10 + $0xc0] sm:$0xff] }
0x1bad   :  { %v4918_v10 = vpop.xlane.xlu0 %4917  ;;  %v4954_v18 = vsub.f32 %v8682_v11, %v4900_v9  ;;  %v5779_v9 = vld [vmem:[%s8897_s10 + $0xc8] sm:$0xff] }
0x1bae   :  { %7012 = vrsqrt.f32 %v4958_v40  ;;  %v4943_v28 = vsub.f32 %v4931_v48, %v4937_v13  ;;  %v4930_v36 = vmul.f32 0.03125, %v4918_v10  ;;  %v5777_v40 = vld [vmem:[%s8897_s10 + $0xb8] sm:$0xff]  ;;  %v5776_v13 = vld [vmem:[%s8897_s10 + $0xb0] sm:$0xff]  ;;  %v5775_v48 = vld [vmem:[%s8897_s10 + $0xa8] sm:$0xff] }
0x1baf   :  { %v5774_v10 = vld [vmem:[%s8897_s10 + $0xa0] sm:$0xff] }
0x1bb0   :  { %v4949_v59 = vmax.f32 %v4943_v28, 0.0  ;;  %v4942_v37 = vsub.f32 %v4930_v36, %v4936_v21  ;;  %v5773_v21 = vld [vmem:[%s8897_s10 + $0x98] sm:$0xff]  ;;  %v5772_v28 = vld [vmem:[%s8897_s10 + $0x90] sm:$0xff]  ;;  %v5771_v36 = vld [vmem:[%s8897_s10 + $0x88] sm:$0xff] }
0x1bb2   :  { %v4961_v60 = vadd.f32 1e-06, %v4949_v59  ;;  %v4948_v49 = vmax.f32 %v4942_v37, 0.0  ;;  %v5770_v59 = vld [vmem:[%s8897_s10 + $0x80] sm:$0xff] }
0x1bb4   :  { %7014 = vrsqrt.f32 %v4961_v60  ;;  %v4960_v50 = vadd.f32 1e-06, %v4948_v49 }
0x1bb6   :  { %7016 = vrsqrt.f32 %v4960_v50 }
0x1bb9   :  { %v7011_v6 = vpop.eup %7010 }
0x1bba   :  { %v4971_v53 = vmul.f32 %v7011_v6, %v4953_v30 }
0x1bbb   :  { %v7013_v5 = vpop.eup %7012 }
0x1bbc   :  { %v4970_v33 = vmul.f32 %v7013_v5, %v4952_v52  ;;  %v4981_v46 = vmul.f32 %v8711_v25, %v4971_v53 }
0x1bbe   :  { %v4980_v41 = vmul.f32 %v8711_v25, %v4970_v33  ;;  %v4991_v42 = vadd.f32 %v8717_v17, %v4981_v46 }
0x1bc0   :  { %v4990_v38 = vadd.f32 %v8717_v17, %v4980_v41 }
0x1bc1   :  { %v7015_v57 = vpop.eup %7014 }
0x1bc2   :  { %6682 = vmatprep.mubr.msk.f32.mxu1 %vm187_vm1, %v4990_v38  ;;  %v4973_v55 = vmul.f32 %v7015_v57, %v4955_v29 }
0x1bc3   :  { %v7017_v15 = vpop.eup %7016  ;;  %6683 = vmatmul.mubr.msk.f32.vlgmr.msra.gmra.mxu1 %vm187_vm1, %v4991_v42 }
0x1bc4   :  { %v4972_v62 = vmul.f32 %v7017_v15, %v4954_v18  ;;  %v4983_v8 = vmul.f32 %v8711_v25, %v4973_v55 }
0x1bc6   :  { %v4982_v19 = vmul.f32 %v8711_v25, %v4972_v62  ;;  %v4993_v44 = vadd.f32 %v8717_v17, %v4983_v8 }
0x1bc8   :  { %v4992_v51 = vadd.f32 %v8717_v17, %v4982_v19 }
0x1bca   :  { %6685 = vmatprep.mubr.msk.f32.mxu1 %vm187_vm1, %v4992_v51 }
0x1bcb   :  { %6686 = vmatmul.mubr.msk.f32.gmra.mxu1 %vm187_vm1, %v4993_v44 }
0x1bce   :  { %v6673_v11 = vpop.f32.mrf.mxu0 }
0x1bcf   :  { %v4863_v22 = vadd.f32 %v6673_v11, %v8637_v31 }
0x1bd0   :  { %v4849_v32 = vpop.f32.mrf.mxu0 }
0x1bd1   :  { %v4869_v45 = vadd.f32 %v4863_v22, %v8085_v4  ;;  %v4862_v27 = vadd.f32 %v4849_v32, %v8639_v2  ;;  %v8809_v22 = vld [vmem:[%s8896_s9 + $0x1] ss:$0 sm:$0xff] }
0x1bd3   :  { %v8737_v24 = vadd.f32 %v8657_v26, %v4869_v45  ;;  %v4868_v63 = vadd.f32 %v4862_v27, %v8089_v56 }
0x1bd5   :  { %v8741_v20 = vadd.f32 %v8657_v26, %v4868_v63  ;;  %v4895_v58 = vsel %vm187_vm1, %v8737_v24, 0.0  ;;  %v4909_v7 = vmul.f32 %v8737_v24, %v8737_v24  ;;  %v5785_v26 = vld [vmem:[%s8897_s10 + $0xf8] sm:$0xff] }
0x1bd6   :  { %4896 = vadd.xlane.f32.xlu1 %v4895_v58  ;;  %6691 = vmatprep.subr.mxu0 %v5785_v26 }
0x1bd7   :  { %v4892_v4 = vsel %vm187_vm1, %v8741_v20, 0.0  ;;  %v4908_v31 = vmul.f32 %v8741_v20, %v8741_v20  ;;  %v4925_v2 = vsel %vm187_vm1, %v4909_v7, 0.0  ;;  %6692 = vmatpush3.msra.mxu0 %v5785_v26 }
0x1bd8   :  { %4893 = vadd.xlane.f32.xlu0 %v4892_v4  ;;  %6693 = vmatprep.subr.mxu0 %v5784_v61 }
0x1bd9   :  { %v4922_v56 = vsel %vm187_vm1, %v4908_v31, 0.0  ;;  %6694 = vmatpush3.msra.mxu0 %v5784_v61 }
0x1bda   :  { %4926 = vadd.xlane.f32.xlu1 %v4925_v2  ;;  %6695 = vmatprep.subr.mxu0 %v5783_v39 }
0x1bdb   :  { %6696 = vmatpush3.msra.mxu0 %v5783_v39 }
0x1bdc   :  { %4923 = vadd.xlane.f32.xlu0 %v4922_v56  ;;  %6697 = vmatprep.subr.mxu0 %v5782_v54 }
0x1bdd   :  { %6698 = vmatpush3.msra.mxu0 %v5782_v54 }
0x1bde   :  { %6699 = vmatprep.subr.mxu0 %v5781_v1 }
0x1bdf   :  { %6700 = vmatpush3.msra.mxu0 %v5781_v1 }
0x1be0   :  { %6701 = vmatprep.subr.mxu0 %v5780_v16 }
0x1be1   :  { %6702 = vmatpush3.msra.mxu0 %v5780_v16 }
0x1be2   :  { %6703 = vmatprep.subr.mxu0 %v5779_v9 }
0x1be3   :  { %6704 = vmatpush3.msra.mxu0 %v5779_v9 }
0x1be4   :  { %6705 = vmatprep.subr.mxu0 %v5778_v14 }
0x1be5   :  { %6706 = vmatpush3.msra.mxu0 %v5778_v14 }
0x1be6   :  { %6707 = vmatprep.subr.mxu0 %v5777_v40 }
0x1be7   :  { %6708 = vmatpush3.msra.mxu0 %v5777_v40 }
0x1be8   :  { %6709 = vmatprep.subr.mxu0 %v5776_v13 }
0x1be9   :  { %6710 = vmatpush3.msra.mxu0 %v5776_v13 }
0x1bea   :  { %6711 = vmatprep.subr.mxu0 %v5775_v48 }
0x1beb   :  { %6712 = vmatpush3.msra.mxu0 %v5775_v48 }
0x1bec   :  { %6713 = vmatprep.subr.mxu0 %v5774_v10 }
0x1bed   :  { %6714 = vmatpush3.msra.mxu0 %v5774_v10 }
0x1bee   :  { %6715 = vmatprep.subr.mxu0 %v5773_v21 }
0x1bef   :  { %6716 = vmatpush3.msra.mxu0 %v5773_v21 }
0x1bf0   :  { %6717 = vmatprep.subr.mxu0 %v5772_v28 }
0x1bf1   :  { %6718 = vmatpush3.msra.mxu0 %v5772_v28 }
0x1bf2   :  { %6719 = vmatprep.subr.mxu0 %v5771_v36 }
0x1bf3   :  { %6720 = vmatpush3.msra.mxu0 %v5771_v36 }
0x1bf4   :  { %6721 = vmatprep.subr.mxu0 %v5770_v59 }
0x1bf5   :  { %6722 = vmatpush3.msra.mxu0 %v5770_v59 }
0x1c5f   :  { %v4897_v37 = vpop.xlane.xlu1 %4896 }
0x1c60   :  { %v4903_v60 = vmul.f32 0.03125, %v4897_v37 }
0x1c61   :  { %v4894_v49 = vpop.xlane.xlu0 %4893 }
0x1c62   :  { %v4902_v50 = vmul.f32 0.03125, %v4894_v49  ;;  %v4939_v6 = vmul.f32 %v4903_v60, %v4903_v60  ;;  %v4957_v18 = vsub.f32 %v8737_v24, %v4903_v60 }
0x1c63   :  { %v4927_v30 = vpop.xlane.xlu1 %4926 }
0x1c64   :  { %v4933_v52 = vmul.f32 0.03125, %v4927_v30  ;;  %v4938_v5 = vmul.f32 %v4902_v50, %v4902_v50  ;;  %v4956_v15 = vsub.f32 %v8741_v20, %v4902_v50 }
0x1c65   :  { %v4924_v53 = vpop.xlane.xlu0 %4923 }
0x1c66   :  { %v4945_v33 = vsub.f32 %v4933_v52, %v4939_v6  ;;  %v4932_v46 = vmul.f32 0.03125, %v4924_v53 }
0x1c68   :  { %v4951_v41 = vmax.f32 %v4945_v33, 0.0  ;;  %v4944_v29 = vsub.f32 %v4932_v46, %v4938_v5 }
0x1c6a   :  { %v4963_v38 = vadd.f32 1e-06, %v4951_v41  ;;  %v4950_v57 = vmax.f32 %v4944_v29, 0.0 }
0x1c6c   :  { %7018 = vrsqrt.f32 %v4963_v38  ;;  %v4962_v42 = vadd.f32 1e-06, %v4950_v57 }
0x1c6e   :  { %7020 = vrsqrt.f32 %v4962_v42 }
0x1c79   :  { %v7019_v55 = vpop.eup %7018 }
0x1c7a   :  { %v4975_v62 = vmul.f32 %v7019_v55, %v4957_v18 }
0x1c7b   :  { %v7021_v8 = vpop.eup %7020 }
0x1c7c   :  { %v4974_v19 = vmul.f32 %v7021_v8, %v4956_v15  ;;  %v4985_v51 = vmul.f32 %v8711_v25, %v4975_v62 }
0x1c7e   :  { %v4984_v44 = vmul.f32 %v8711_v25, %v4974_v19  ;;  %v4995_v32 = vadd.f32 %v8717_v17, %v4985_v51 }
0x1c80   :  { %v4994_v11 = vadd.f32 %v8717_v17, %v4984_v44 }
0x1c82   :  { %6688 = vmatprep.mubr.msk.f32.mxu1 %vm187_vm1, %v4994_v11 }
0x1c83   :  { %v6684_v45 = vpop.f32.mrf.mxu1  ;;  %6689 = vmatmul.mubr.msk.f32.gmra.mxu1 %vm187_vm1, %v4995_v32 }
0x1c84   :  { %v8815_v27 = vadd.f32 %v6684_v45, %v8809_v22 }
0x1c85   :  { %v5093_v24 = vpop.f32.mrf.mxu1 }
0x1c86   :  { %v8818_v25 = vmul.f32 0.70710677, %v8815_v27  ;;  %v8821_v63 = vadd.f32 %v8809_v22, %v5093_v24 }
0x1c88   :  { %v5147_v20 = vand.u32 2147483647, %v8818_v25  ;;  %v8825_v58 = vmul.f32 0.70710677, %v8821_v63  ;;  %vm5135_vm9 = vcmp.lt.f32.partialorder %v8818_v25, 0.0 }
0x1c8a   :  { %v5153_v17 = vmul.f32 0.3275911, %v5147_v20  ;;  %v5146_v7 = vand.u32 2147483647, %v8825_v58  ;;  %v5225_v14 = vsub.f32 0.0, %v5147_v20  ;;  %vm5134_vm10 = vcmp.lt.f32.partialorder %v8825_v58, 0.0 }
0x1c8b   :  { %v6687_v4 = vpop.f32.mrf.mxu1 }
0x1c8c   :  { %v5159_v31 = vadd.f32 1.0, %v5153_v17  ;;  %v5152_v2 = vmul.f32 0.3275911, %v5146_v7  ;;  %v8829_v56 = vadd.f32 %v6687_v4, %v8809_v22  ;;  %v5224_v10 = vsub.f32 0.0, %v5146_v7 }
0x1c8d   :  { %v5103_v26 = vpop.f32.mrf.mxu1  ;;  %v5231_v21 = vmul.f32 %v5225_v14, %v5147_v20 }
0x1c8e   :  { %7022 = vrcp.f32 %v5159_v31  ;;  %v5158_v61 = vadd.f32 1.0, %v5152_v2  ;;  %v8832_v39 = vmul.f32 0.70710677, %v8829_v56  ;;  %v8835_v54 = vadd.f32 %v8809_v22, %v5103_v26 }
0x1c8f   :  { %v5230_v59 = vmul.f32 %v5224_v10, %v5146_v7  ;;  %v5238_v60 = vmul.f32 1.442695, %v5231_v21 }
0x1c90   :  { %7024 = vrcp.f32 %v5158_v61  ;;  %v5149_v1 = vand.u32 2147483647, %v8832_v39  ;;  %v8839_v16 = vmul.f32 0.70710677, %v8835_v54  ;;  %vm5137_vm11 = vcmp.lt.f32.partialorder %v8832_v39, 0.0 }
0x1c91   :  { %v5236_v6 = vmul.f32 1.442695, %v5230_v59 }
0x1c92   :  { %v5155_v9 = vmul.f32 0.3275911, %v5149_v1  ;;  %v5148_v40 = vand.u32 2147483647, %v8839_v16  ;;  %v5227_v49 = vsub.f32 0.0, %v5149_v1  ;;  %vm5136_vm12 = vcmp.lt.f32.partialorder %v8839_v16, 0.0 }
0x1c93   :  { %v5142_v39 = vsel %vm5136_vm12, -1.0, %v7091_v43 }
0x1c94   :  { %v5161_v13 = vadd.f32 1.0, %v5155_v9  ;;  %v5154_v48 = vmul.f32 0.3275911, %v5148_v40  ;;  %v5226_v5 = vsub.f32 0.0, %v5148_v40  ;;  %v5233_v33 = vmul.f32 %v5227_v49, %v5149_v1 }
0x1c96   :  { %7026 = vrcp.f32 %v5161_v13  ;;  %v5160_v28 = vadd.f32 1.0, %v5154_v48  ;;  %v5232_v42 = vmul.f32 %v5226_v5, %v5148_v40  ;;  %v5242_v18 = vmul.f32 1.442695, %v5233_v33 }
0x1c98   :  { %7028 = vrcp.f32 %v5160_v28  ;;  %v5240_v11 = vmul.f32 1.442695, %v5232_v42  ;;  %v5141_v28 = vsel %vm5135_vm9, -1.0, %v7091_v43 }
0x1c99   :  { %7030 = vpow2.f32 %v5238_v60 }
0x1c9a   :  { %7032 = vpow2.f32 %v5236_v6  ;;  %v5140_v6 = vsel %vm5134_vm10, -1.0, %v7091_v43 }
0x1c9b   :  { %v7023_v36 = vpop.eup %7022  ;;  %7034 = vpow2.f32 %v5242_v18 }
0x1c9c   :  { %v5171_v37 = vmul.f32 1.0614054, %v7023_v36  ;;  %7036 = vpow2.f32 %v5240_v11  ;;  %v5125_v11 = vmul.f32 0.5, %v8829_v56 }
0x1c9d   :  { %v7025_v50 = vpop.eup %7024 }
0x1c9e   :  { %v5177_v30 = vadd.f32 -1.4531521, %v5171_v37  ;;  %v5170_v52 = vmul.f32 1.0614054, %v7025_v50 }
0x1ca0   :  { %v5183_v53 = vmul.f32 %v7023_v36, %v5177_v30  ;;  %v5176_v46 = vadd.f32 -1.4531521, %v5170_v52 }
0x1ca2   :  { %v5189_v41 = vadd.f32 1.4214138, %v5183_v53  ;;  %v5182_v29 = vmul.f32 %v7025_v50, %v5176_v46  ;;  %v5122_v46 = vmul.f32 0.5, %v8821_v63 }
0x1ca3   :  { %v7027_v38 = vpop.eup %7026 }
0x1ca4   :  { %v5195_v57 = vmul.f32 %v7023_v36, %v5189_v41  ;;  %v5188_v55 = vadd.f32 1.4214138, %v5182_v29  ;;  %v5173_v15 = vmul.f32 1.0614054, %v7027_v38  ;;  %v5123_v29 = vmul.f32 0.5, %v8815_v27 }
0x1ca5   :  { %v7029_v8 = vpop.eup %7028  ;;  %v5124_v27 = vmul.f32 0.5, %v8835_v54 }
0x1ca6   :  { %v5201_v62 = vadd.f32 -0.28449672, %v5195_v57  ;;  %v5194_v19 = vmul.f32 %v7025_v50, %v5188_v55  ;;  %v5179_v51 = vadd.f32 -1.4531521, %v5173_v15  ;;  %v5172_v32 = vmul.f32 1.0614054, %v7029_v8  ;;  %v7031_v26 = vpop.eup %7030 }
0x1ca7   :  { %v7033_v48 = vpop.eup %7032 }
0x1ca8   :  { %v5207_v44 = vmul.f32 %v7023_v36, %v5201_v62  ;;  %v5200_v45 = vadd.f32 -0.28449672, %v5194_v19  ;;  %v5185_v24 = vmul.f32 %v7027_v38, %v5179_v51  ;;  %v5178_v17 = vadd.f32 -1.4531521, %v5172_v32 }
0x1ca9   :  { %v5143_v62 = vsel %vm5137_vm11, -1.0, %v7091_v43 }
0x1caa   :  { %v5213_v20 = vadd.f32 0.2548296, %v5207_v44  ;;  %v5206_v7 = vmul.f32 %v7025_v50, %v5200_v45  ;;  %v5191_v4 = vadd.f32 1.4214138, %v5185_v24  ;;  %v5184_v2 = vmul.f32 %v7029_v8, %v5178_v17 }
0x1cac   :  { %v5219_v31 = vmul.f32 %v7023_v36, %v5213_v20  ;;  %v5212_v61 = vadd.f32 0.2548296, %v5206_v7  ;;  %v5197_v1 = vmul.f32 %v7027_v38, %v5191_v4  ;;  %v5190_v14 = vadd.f32 1.4214138, %v5184_v2 }
0x1cae   :  { %v5249_v9 = vmul.f32 %v7031_v26, %v5219_v31  ;;  %v5218_v40 = vmul.f32 %v7025_v50, %v5212_v61  ;;  %v5203_v13 = vadd.f32 -0.28449672, %v5197_v1  ;;  %v5196_v21 = vmul.f32 %v7029_v8, %v5190_v14  ;;  %v7035_v50 = vpop.eup %7034 }
0x1caf   :  { %v7037_v42 = vpop.eup %7036 }
0x1cb0   :  { %v5255_v10 = vsub.f32 1.0, %v5249_v9  ;;  %v5248_v59 = vmul.f32 %v7033_v48, %v5218_v40  ;;  %v5209_v36 = vmul.f32 %v7027_v38, %v5203_v13  ;;  %v5202_v60 = vadd.f32 -0.28449672, %v5196_v21 }
0x1cb2   :  { %v5261_v37 = vmul.f32 %v5255_v10, %v5141_v28  ;;  %v5254_v49 = vsub.f32 1.0, %v5248_v59  ;;  %v5215_v30 = vadd.f32 0.2548296, %v5209_v36  ;;  %v5208_v25 = vmul.f32 %v7029_v8, %v5202_v60 }
0x1cb4   :  { %v5260_v52 = vmul.f32 %v5254_v49, %v5140_v6  ;;  %v5221_v53 = vmul.f32 %v7027_v38, %v5215_v30  ;;  %v5267_v5 = vadd.f32 1.0, %v5261_v37  ;;  %v5214_v33 = vadd.f32 0.2548296, %v5208_v25 }
0x1cb6   :  { %v5266_v41 = vadd.f32 1.0, %v5260_v52  ;;  %v5251_v58 = vmul.f32 %v7035_v50, %v5221_v53  ;;  %v5220_v57 = vmul.f32 %v7029_v8, %v5214_v33  ;;  %v5273_v15 = vmul.f32 %v5267_v5, %v5123_v29 }
0x1cb8   :  { %v5272_v18 = vmul.f32 %v5266_v41, %v5122_v46  ;;  %v5257_v55 = vsub.f32 1.0, %v5251_v58  ;;  %v5250_v38 = vmul.f32 %v7037_v42, %v5220_v57 }
0x1cba   :  { %6723 = vmatprep.mubr.f32.mxu0 %v5272_v18  ;;  %v5263_v19 = vmul.f32 %v5257_v55, %v5143_v62  ;;  %v5256_v63 = vsub.f32 1.0, %v5250_v38 }
0x1cbb   :  { %6724 = vmatmul.mubr.f32.vlgmr.msra.gmra.mxu0 %v5273_v15 }
0x1cbc   :  { %v5262_v51 = vmul.f32 %v5256_v63, %v5142_v39  ;;  %v5269_v44 = vadd.f32 1.0, %v5263_v19 }
0x1cbe   :  { %v5268_v8 = vadd.f32 1.0, %v5262_v51  ;;  %v5275_v45 = vmul.f32 %v5269_v44, %v5125_v11 }
0x1cc0   :  { %v5274_v32 = vmul.f32 %v5268_v8, %v5124_v27 }
0x1cc2   :  { %6726 = vmatprep.mubr.f32.mxu0 %v5274_v32 }
0x1cc3   :  { %6727 = vmatmul.mubr.f32.gmra.mxu0 %v5275_v45 }
0x1d43   :  { %v6690_v24 = vpop.f32.mrf.mxu1 }
0x1d44   :  { %v5119_v16 = vadd.f32 %v6690_v24, %v8809_v22 }
0x1d45   :  { %v5113_v20 = vpop.f32.mrf.mxu1 }
0x1d46   :  { %v5133_v17 = vmul.f32 0.70710677, %v5119_v16  ;;  %v5114_v7 = vadd.f32 %v8809_v22, %v5113_v20  ;;  %v5127_v27 = vmul.f32 0.5, %v5119_v16 }
0x1d48   :  { %v5151_v4 = vand.u32 2147483647, %v5133_v17  ;;  %v5132_v31 = vmul.f32 0.70710677, %v5114_v7  ;;  %vm5139_vm13 = vcmp.lt.f32.partialorder %v5133_v17, 0.0  ;;  %v5126_v51 = vmul.f32 0.5, %v5114_v7 }
0x1d49   :  { %v5145_v55 = vsel %vm5139_vm13, -1.0, %v7091_v43  ;;  %v5391_v17 = vrot.slane %v8652_v0, %v2786_v35  ;;  %v5429_v35 = vld [vmem:[%s8899_s12 + $0x10] sm:$0xff]  ;;  %v5428_v0 = vld [vmem:[%s8899_s12 + $0x8] sm:$0xff] }
0x1d4a   :  { %v5157_v2 = vmul.f32 0.3275911, %v5151_v4  ;;  %v5150_v26 = vand.u32 2147483647, %v5132_v31  ;;  %v5229_v56 = vsub.f32 0.0, %v5151_v4  ;;  %vm5138_vm14 = vcmp.lt.f32.partialorder %v5132_v31, 0.0 }
0x1d4b   :  { %v5144_v19 = vsel %vm5138_vm14, -1.0, %v7091_v43 }
0x1d4c   :  { %v5163_v61 = vadd.f32 1.0, %v5157_v2  ;;  %v5156_v54 = vmul.f32 0.3275911, %v5150_v26  ;;  %v5228_v9 = vsub.f32 0.0, %v5150_v26  ;;  %v5235_v14 = vmul.f32 %v5229_v56, %v5151_v4 }
0x1d4e   :  { %7038 = vrcp.f32 %v5163_v61  ;;  %v5162_v1 = vadd.f32 1.0, %v5156_v54  ;;  %v5234_v13 = vmul.f32 %v5228_v9, %v5150_v26  ;;  %v5246_v48 = vmul.f32 1.442695, %v5235_v14 }
0x1d50   :  { %7040 = vrcp.f32 %v5162_v1  ;;  %v5244_v59 = vmul.f32 1.442695, %v5234_v13  ;;  %v7092_v1 = vmov 0.0  }
0x1d51   :  { %7042 = vpow2.f32 %v5246_v48  ;;  %6732 = vmatprep.subr.mxu1 %v7092_v1  ;;  %6740 = vmatprep.mubr.msk.f32.mxu1 %vm7093_vm2, %v7092_v1 }
0x1d52   :  { %7044 = vpow2.f32 %v5244_v59  ;;  %6733 = vmatpush3.msra.mxu1 %v5430_v23 }
0x1d53   :  { %6734 = vmatprep.subr.mxu1 %v7092_v1 }
0x1d54   :  { %6735 = vmatpush3.msra.mxu1 %v5429_v35 }
0x1d55   :  { %6736 = vmatprep.subr.mxu1 %v7092_v1 }
0x1d56   :  { %6737 = vmatpush3.msra.mxu1 %v5428_v0 }
0x1d57   :  { %6738 = vmatprep.subr.mxu1 %v7092_v1 }
0x1d5b   :  { %v7039_v40 = vpop.eup %7038 }
0x1d5c   :  { %v5175_v10 = vmul.f32 1.0614054, %v7039_v40 }
0x1d5d   :  { %v7041_v21 = vpop.eup %7040 }
0x1d5e   :  { %v5181_v28 = vadd.f32 -1.4531521, %v5175_v10  ;;  %v5174_v22 = vmul.f32 1.0614054, %v7041_v21  ;;  %v7043_v41 = vpop.eup %7042 }
0x1d5f   :  { %v7045_v42 = vpop.eup %7044 }
0x1d60   :  { %v5187_v36 = vmul.f32 %v7039_v40, %v5181_v28  ;;  %v5180_v37 = vadd.f32 -1.4531521, %v5174_v22 }
0x1d62   :  { %v5193_v60 = vadd.f32 1.4214138, %v5187_v36  ;;  %v5186_v49 = vmul.f32 %v7041_v21, %v5180_v37 }
0x1d64   :  { %v5199_v30 = vmul.f32 %v7039_v40, %v5193_v60  ;;  %v5192_v6 = vadd.f32 1.4214138, %v5186_v49 }
0x1d66   :  { %v5205_v25 = vadd.f32 -0.28449672, %v5199_v30  ;;  %v5198_v52 = vmul.f32 %v7041_v21, %v5192_v6 }
0x1d68   :  { %v5211_v53 = vmul.f32 %v7039_v40, %v5205_v25  ;;  %v5204_v50 = vadd.f32 -0.28449672, %v5198_v52  ;;  %v5786_v25 = vld [vmem:[%s8900_s13] ss:$0 sm:$0xff] }
0x1d6a   :  { %v5217_v5 = vadd.f32 0.2548296, %v5211_v53  ;;  %v5210_v33 = vmul.f32 %v7041_v21, %v5204_v50 }
0x1d6c   :  { %v5223_v46 = vmul.f32 %v7039_v40, %v5217_v5  ;;  %v5216_v58 = vadd.f32 0.2548296, %v5210_v33 }
0x1d6e   :  { %v5253_v29 = vmul.f32 %v7043_v41, %v5223_v46  ;;  %v5222_v57 = vmul.f32 %v7041_v21, %v5216_v58  ;;  %v5399_v21 = vld [vmem:[%s8898_s11] sm:$0x3]  ;;  %s7058_s11 = scalar_lea.vmem %s5519_s22, 32 }
0x1d6f   :  { %v5420_v59 = vrot.slane %v5399_v21, %v7287_v34  ;;  %v5425_v37 = vrot.slane %v5399_v21, %v7295_v47  ;;  %p7059_p0 = scmp.ne.s32.totalorder %s5519_s22, %s7058_s11  ;;  %p7064_p2 = scmp.lt.s32.totalorder %s7058_s11, %s7058_s11 }
0x1d70   :  { %v5259_v18 = vsub.f32 1.0, %v5253_v29  ;;  %v5252_v15 = vmul.f32 %v7045_v42, %v5222_v57 }
0x1d71   :  { %p7065_p3 = por %p7064_p2, %p7063_p1 }
0x1d72   :  { %v5265_v62 = vmul.f32 %v5259_v18, %v5145_v55  ;;  %v5258_v38 = vsub.f32 1.0, %v5252_v15 }
0x1d73   :  { %p7066_p4 = pnand %p7065_p3, %p7059_p0 }
0x1d74   :  { %v5264_v63 = vmul.f32 %v5258_v38, %v5144_v19  ;;  %v5271_v39 = vadd.f32 1.0, %v5265_v62 }
0x1d76   :  { %v5270_v44 = vadd.f32 1.0, %v5264_v63  ;;  %v5277_v11 = vmul.f32 %v5271_v39, %v5127_v27 }
0x1d78   :  { %v5276_v8 = vmul.f32 %v5270_v44, %v5126_v51 }
0x1d7a   :  { %6729 = vmatprep.mubr.f32.mxu0 %v5276_v8 }
0x1d7b   :  { %v6725_v32 = vpop.f32.mrf.mxu0  ;;  %6730 = vmatmul.mubr.f32.gmra.mxu0 %v5277_v11 }
0x1d7d   :  { %v5361_v45 = vpop.f32.mrf.mxu0 }
0x1d7e   :  { %v5386_v20 = vadd.f32 %v5361_v45, %v8665_v12  ;;  %v5427_v12 = vld [vmem:[%s8899_s12] sm:$0xff] }
0x1d7f   :  { %6739 = vmatpush3.msra.mxu1 %v5427_v12 }
0x1d80   :  { %v5392_v7 = vadd.f32 %v5391_v17, %v5386_v20 }
0x1d83   :  { %v6728_v24 = vpop.f32.mrf.mxu0 }
0x1d84   :  { %v5387_v43 = vadd.f32 %v6728_v24, %v8678_v3 }
0x1d85   :  { %v5370_v4 = vpop.f32.mrf.mxu0 }
0x1d86   :  { %v5393_v31 = vadd.f32 %v5391_v17, %v5387_v43 }
0x1d88   :  { %v5395_v16 = vrot.slane %v5393_v31, 7 }
0x1d8a   :  { %v5398_v2 = vsel %vm5397_vm15, %v5392_v7, %v5395_v16 }
0x1d8b   :  { %v5401_v26 = vsel %vm5400_vm0, %v5398_v2, 0.0  ;;  %v5405_v61 = vmul.f32 %v5398_v2, %v5398_v2 }
0x1d8c   :  { %5402 = vadd.xlane.f32.xlu0 %v5401_v26 }
0x1d8d   :  { %v5406_v54 = vsel %vm5400_vm0, %v5405_v61, 0.0 }
0x1d8e   :  { %5407 = vadd.xlane.f32.xlu1 %v5406_v54 }
0x1e15   :  { %v5403_v3 = vpop.xlane.xlu0 %5402 }
0x1e16   :  { %v5404_v56 = vmul.f32 0.03125, %v5403_v3 }
0x1e17   :  { %v5408_v9 = vpop.xlane.xlu1 %5407 }
0x1e18   :  { %v5410_v14 = vmul.f32 %v5404_v56, %v5404_v56  ;;  %v5409_v40 = vmul.f32 0.03125, %v5408_v9  ;;  %v5413_v28 = vsub.f32 %v5398_v2, %v5404_v56 }
0x1e1a   :  { %v5411_v13 = vsub.f32 %v5409_v40, %v5410_v14 }
0x1e1c   :  { %v5412_v48 = vmax.f32 %v5411_v13, 0.0 }
0x1e1e   :  { %v5414_v10 = vadd.f32 1e-06, %v5412_v48 }
0x1e20   :  { %7046 = vrsqrt.f32 %v5414_v10 }
0x1e2d   :  { %v7047_v22 = vpop.eup %7046 }
0x1e2e   :  { %v5416_v36 = vmul.f32 %v7047_v22, %v5413_v28 }
0x1e30   :  { %v5421_v60 = vmul.f32 %v5420_v59, %v5416_v36 }
0x1e32   :  { %v5426_v49 = vadd.f32 %v5425_v37, %v5421_v60 }
0x1e34   :  { %6741 = vmatmul.mubr.msk.f32.vlgmr.msra.gmra.mxu1 %vm187_vm1, %v5426_v49 }
0x1e3b   :  { %v6731_v30 = vpop.f32.mrf.mxu0 }
0x1e3d   :  { %v5379_v6 = vpop.f32.mrf.mxu0 }
0x1ef4   :  { %v5507_v52 = vpop.f32.mrf.mxu1 }
0x1ef5   :  { %v5508_v53 = vadd.f32 %v5786_v25, %v5507_v52 }
0x1ef6   :  { %v6742_v34 = vpop.f32.mrf.mxu1 }
0x1ef7   :  { %5511 = vst [vmem:[#allocation2] sm:$0x3] %v5508_v53 }
0x1ef8   :  { %7069 = shalt.err (!%p7066_p4)
}
0x1ef9   :  { %5521 = dma.vmem_to_hbm [thread:$0]  %s5519_s22, 32, %s8901_s14, [#allocation3]  }
0x1efa   :  { %7078 = dma.done.wait [#allocation3], 32  }
0x1efb   :  { %7079 = vsyncadd [#allocation3], 4294967264 }
0x1efc   :  { %5525 = vsyncpa [#allocation3], 1 }

</bundles_post_ra>
